<compile_context>
chip_gen: v6e
topology: v6e:2x2x1
jax: 0.10.0
libtpu: 0.0.40
codegen_flags: <defaults>
</compile_context>

<pallas_src>
import math
from functools import partial

import jax
import jax.numpy as jnp
import numpy as np
from jax.experimental import pallas as pl
from jax.experimental.pallas import tpu as pltpu

_NEG_INF = -1e18


# -----------------------------------------------------------------------------
# Fused decoder kernel: grid = (batch, layer); layer axis streams weights.
# -----------------------------------------------------------------------------
def _decoder_kernel(
    # per-batch / global inputs (DMA'd once per batch element)
    x_ref, enc_ref, smask_ref, tmask_ref, timing_ref, embw_ref, lnf_g_ref, lnf_b_ref,
    # per-layer (streamed) weights
    ln1_g, ln1_b, wqkv_ref, wo_s_ref,
    ln2_g, ln2_b, wq_c_ref, wkv_c_ref, wo_c_ref,
    ln3_g, ln3_b, c1_w, c1_b, c2_w, c2_b,
    # outputs (lane-dense, written at the last layer only)
    y_ref, attn_ref,
    # scratch
    x_s, qkv_s, qc_s, kv_s, ctx_s, cat1_s, cat2_s,
    *, num_heads, kd, vd, eps=1e-6,
):
    f32, bf16 = jnp.float32, jnp.bfloat16
    lyr = pl.program_id(1)
    last_layer = pl.num_programs(1) - 1

    L, hidden = x_s.shape
    Ls = kv_s.shape[1]
    filt = cat2_s.shape[1] // 3
    dhk = kd // num_heads
    dhv = vd // num_heads
    d_self = 2 * dhk + dhv       # [q | k | v] per head (self-attn)
    d_cross = dhk + dhv          # [k | v] per head (cross-attn)
    scale = float(dhk) ** -0.5

    def layernorm(v, g, b):
        # gamma * (x - mean) / (std + eps) + beta; unbiased (n-1) std (torch .std()).
        d = v.shape[-1]
        mean = jnp.mean(v, axis=-1, keepdims=True)
        cen = v - mean
        var = jnp.sum(cen * cen, axis=-1, keepdims=True) * (1.0 / (d - 1))
        return g * cen / (jnp.sqrt(var) + eps) + b

    # ---- causal/padding biases rebuilt per step (cheap VPU filler; no HBM mask DMA)
    col_ll = jax.lax.broadcasted_iota(jnp.int32, (L, L), 1)
    row_ll = jax.lax.broadcasted_iota(jnp.int32, (L, L), 0)
    dbias = jnp.where(jnp.logical_or(col_ll > row_ll, tmask_ref[0] > 0.5),
                      _NEG_INF, 0.0)                       # (L, L) f32
    sbias = smask_ref[0] * _NEG_INF                        # (1, Ls) f32, row-broadcast

    # ---- causal shift masks (for the k=3, left-padded Conv1d taps)
    row1 = jax.lax.broadcasted_iota(jnp.int32, (L, 1), 0)
    shift_ge1 = row1 >= 1
    shift_ge2 = row1 >= 2

    def shift_down(a, ge_mask, s):
        # y[t] = a[t-s], zero-filled for t < s.
        r = pltpu.roll(a, shift=s, axis=0)
        return jnp.where(ge_mask, r, jnp.zeros_like(r))

    # ---- layer 0: embedding projection (bias-free) + timing; input_dropout(p=0)=id
    @pl.when(lyr == 0)
    def _():
        emb = jnp.dot(x_ref[0].astype(bf16), embw_ref[...],
                      preferred_element_type=f32)
        x_s[...] = emb + timing_ref[...]

    x = x_s[...]                          # (L, H) f32 residual stream
    enc_bf = enc_ref[0].astype(bf16)      # (Ls, H)

    def attention(q_sref, q_off, kv_sref, k_off, v_off, bias, collect_weights):
        # Head-major scratch: per-head tiles are full leading-axis loads ref[h].
        w_sum = None
        for h in range(num_heads):
            qb = q_sref[h]                                  # (Lq, *) bf16
            q = qb[:, q_off:q_off + dhk]
            kvb = kv_sref[h]                                # (Lk, *) bf16
            k = kvb[:, k_off:k_off + dhk]
            v = kvb[:, v_off:v_off + dhv]
            logits = jnp.dot(q, k.T, preferred_element_type=f32) * scale + bias
            m = jnp.max(logits, axis=-1, keepdims=True)
            e = jnp.exp(logits - m)
            w = e * pl.reciprocal(jnp.sum(e, axis=-1, keepdims=True), approx=True)
            ctx_s[:, pl.ds(h * dhv, dhv)] = jnp.dot(
                w.astype(bf16), v, preferred_element_type=f32).astype(bf16)
            if collect_weights:
                w_sum = w if w_sum is None else w_sum + w
        return w_sum

    # ---- masked self-attention (pre-LN + residual), fused head-major QKV ----
    xn = layernorm(x, ln1_g[0], ln1_b[0])
    proj = jnp.dot(xn.astype(bf16), wqkv_ref[0], preferred_element_type=f32)
    for h in range(num_heads):
        qkv_s[h] = proj[:, h * d_self:(h + 1) * d_self].astype(bf16)
    attention(qkv_s, 0, qkv_s, dhk, 2 * dhk, dbias, False)
    x = x + jnp.dot(ctx_s[...], wo_s_ref[0], preferred_element_type=f32)

    # ---- encoder-decoder attention (fused head-major KV) ----
    xn = layernorm(x, ln2_g[0], ln2_b[0])
    projq = jnp.dot(xn.astype(bf16), wq_c_ref[0], preferred_element_type=f32)
    projkv = jnp.dot(enc_bf, wkv_c_ref[0], preferred_element_type=f32)
    for h in range(num_heads):
        qc_s[h] = projq[:, h * dhk:(h + 1) * dhk].astype(bf16)
        kv_s[h] = projkv[:, h * d_cross:(h + 1) * d_cross].astype(bf16)
    w_sum = attention(qc_s, 0, kv_s, 0, dhk, sbias, True)
    attn_mean = w_sum * (1.0 / num_heads)        # head-averaged cross-attn weights
    x = x + jnp.dot(ctx_s[...], wo_c_ref[0], preferred_element_type=f32)

    # ---- positionwise FFN: two causal Conv1d (k=3, left pad), ReLU between ----
    xn = layernorm(x, ln3_g[0], ln3_b[0])
    cat1_s[:, pl.ds(0, hidden)] = shift_down(xn, shift_ge2, 2).astype(bf16)
    cat1_s[:, pl.ds(hidden, hidden)] = shift_down(xn, shift_ge1, 1).astype(bf16)
    cat1_s[:, pl.ds(2 * hidden, hidden)] = xn.astype(bf16)
    hmid = jnp.dot(cat1_s[...], c1_w[0], preferred_element_type=f32) + c1_b[0]
    hmid = jnp.maximum(hmid, 0.0)                              # relu_dropout=0
    cat2_s[:, pl.ds(0, filt)] = shift_down(hmid, shift_ge2, 2).astype(bf16)
    cat2_s[:, pl.ds(filt, filt)] = shift_down(hmid, shift_ge1, 1).astype(bf16)
    cat2_s[:, pl.ds(2 * filt, filt)] = hmid.astype(bf16)
    x = x + jnp.dot(cat2_s[...], c2_w[0], preferred_element_type=f32) + c2_b[0]

    x_s[...] = x

    # ---- final LayerNorm + lane-dense output stores (last layer only) ----
    @pl.when(lyr == last_layer)
    def _():
        def pad_lanes(v, width):
            d = v.shape[-1]
            if d == width:
                return v
            return jnp.concatenate(
                [v, jnp.zeros((v.shape[0], width - d), v.dtype)], axis=-1)

        yv = layernorm(x, lnf_g_ref[...], lnf_b_ref[...])
        y_ref[0] = pad_lanes(yv, y_ref.shape[-1]).astype(y_ref.dtype)
        attn_ref[0] = pad_lanes(attn_mean, attn_ref.shape[-1]).astype(attn_ref.dtype)


def _round_up(x, m):
    return ((x + m - 1) // m) * m


# -----------------------------------------------------------------------------
# Decoder forward (equivalent of Decoder.forward, eval mode)
# -----------------------------------------------------------------------------
def decoder_forward(params, num_heads, inputs, encoder_output, mask_src, mask_trg):
    b, l, e = inputs.shape
    ls = encoder_output.shape[1]
    hidden = params["emb_w"].shape[1]
    num_layers = params["wqkv_self"].shape[0]
    kd = params["wq_cross"].shape[2]
    vd = params["wo_cross"].shape[1]
    filt = params["conv1_w"].shape[2]
    dhk, dhv = kd // num_heads, vd // num_heads

    h_pad = _round_up(hidden, 128)      # lane-dense output widths
    ls_pad = _round_up(ls, 128)

    # Only padding ROWS are shipped; the (L,L)/(L,Ls) biases are built in-kernel.
    smask_row = mask_src.astype(jnp.float32).reshape(b, 1, ls)   # 1.0 where src pad
    tmask_row = mask_trg.astype(jnp.float32).reshape(b, 1, l)    # 1.0 where trg pad
    timing = params["timing"][0, :l, :]                          # (L, H)

    fixed = [inputs, encoder_output, smask_row, tmask_row, timing,
             params["emb_w"], params["lnf_g"], params["lnf_b"]]
    fixed_specs = [
        pl.BlockSpec((1, l, e), lambda i, j: (i, 0, 0)),
        pl.BlockSpec((1, ls, hidden), lambda i, j: (i, 0, 0)),
        pl.BlockSpec((1, 1, ls), lambda i, j: (i, 0, 0)),
        pl.BlockSpec((1, 1, l), lambda i, j: (i, 0, 0)),
        pl.BlockSpec((l, hidden), lambda i, j: (0, 0)),
        pl.BlockSpec((e, hidden), lambda i, j: (0, 0)),
        pl.BlockSpec((1, hidden), lambda i, j: (0, 0)),
        pl.BlockSpec((1, hidden), lambda i, j: (0, 0)),
    ]

    layer_names = ["ln1_g", "ln1_b", "wqkv_self", "wo_self",
                   "ln2_g", "ln2_b", "wq_cross", "wkv_cross", "wo_cross",
                   "ln3_g", "ln3_b", "conv1_w", "conv1_b", "conv2_w", "conv2_b"]
    layer_args = [params[n] for n in layer_names]

    def layer_spec(arr):
        blk = (1,) + arr.shape[1:]
        return pl.BlockSpec(blk, lambda i, j: (j, 0, 0))   # stream layer j's block

    layer_specs = [layer_spec(a) for a in layer_args]

    # Advisory cost estimate so XLA schedules around the fused custom call sanely.
    flops_layer = (
        2 * l * hidden * (2 * kd + vd)          # fused self QKV
        + 2 * l * l * (kd + vd)                 # self-attn scores + ctx
        + 2 * l * vd * hidden                   # self out proj
        + 2 * l * hidden * kd                   # cross Q
        + 2 * ls * hidden * (kd + vd)           # cross KV
        + 2 * l * ls * (kd + vd)                # cross-attn scores + ctx
        + 2 * l * vd * hidden                   # cross out proj
        + 2 * l * 3 * hidden * filt             # conv1 (3-tap fused)
        + 2 * l * 3 * filt * hidden)            # conv2 (3-tap fused)
    flops = b * (2 * l * e * hidden + num_layers * flops_layer)
    transc = b * num_layers * num_heads * (l * l + l * ls)
    weight_bytes = sum(int(np.prod(a.shape)) * a.dtype.itemsize for a in layer_args)
    act_bytes = sum(int(np.prod(a.shape)) * a.dtype.itemsize for a in fixed)
    out_bytes = b * l * (h_pad + ls_pad) * 4
    cost = pl.CostEstimate(flops=int(flops), transcendentals=int(transc),
                           bytes_accessed=int(b * weight_bytes + act_bytes + out_bytes))

    kernel = partial(_decoder_kernel, num_heads=num_heads, kd=kd, vd=vd)

    y_pad, attn_pad = pl.pallas_call(
        kernel,
        grid=(b, num_layers),                      # batch parallel, layers streamed
        in_specs=fixed_specs + layer_specs,
        out_specs=[pl.BlockSpec((1, l, h_pad), lambda i, j: (i, 0, 0)),
                   pl.BlockSpec((1, l, ls_pad), lambda i, j: (i, 0, 0))],
        out_shape=[jax.ShapeDtypeStruct((b, l, h_pad), jnp.float32),
                   jax.ShapeDtypeStruct((b, l, ls_pad), jnp.float32)],
        scratch_shapes=[
            pltpu.VMEM((l, hidden), jnp.float32),                    # x (carried)
            pltpu.VMEM((num_heads, l, 2 * dhk + dhv), jnp.bfloat16),  # self q|k|v
            pltpu.VMEM((num_heads, l, dhk), jnp.bfloat16),            # cross q
            pltpu.VMEM((num_heads, ls, dhk + dhv), jnp.bfloat16),     # cross k|v
            pltpu.VMEM((l, vd), jnp.bfloat16),                        # merged ctx
            pltpu.VMEM((l, 3 * hidden), jnp.bfloat16),                # conv1 taps
            pltpu.VMEM((l, 3 * filt), jnp.bfloat16),                  # conv2 taps
        ],
        compiler_params=pltpu.CompilerParams(
            dimension_semantics=("parallel", "arbitrary"),
            vmem_limit_bytes=48 * 1024 * 1024),    # fits v7x's 64 MiB with headroom
        cost_estimate=cost,
    )(*fixed, *layer_args)

    y = y_pad[:, :, :hidden]
    attn_dist = attn_pad[:, :, :ls]
    aln_loss = 0.0
    return y, attn_dist, aln_loss


# -----------------------------------------------------------------------------
# Timing signal + deterministic parameter construction
# -----------------------------------------------------------------------------
def gen_timing_signal(length, channels, min_timescale=1.0, max_timescale=1.0e4):
    position = np.arange(length)
    num_timescales = channels // 2
    log_inc = math.log(float(max_timescale) / float(min_timescale)) / (float(num_timescales) - 1)
    inv = min_timescale * np.exp(np.arange(num_timescales).astype(np.float64) * -log_inc)
    scaled = position[:, None] * inv[None, :]
    signal = np.concatenate([np.sin(scaled), np.cos(scaled)], axis=1)
    signal = np.pad(signal, [[0, 0], [0, channels % 2]], "constant")
    return jnp.asarray(signal.reshape(1, length, channels), dtype=jnp.float32)


def init_params(key, embedding_size, hidden_size, num_layers, num_heads,
                total_key_depth, total_value_depth, filter_size, max_length):
    # Matmul weights in bf16 (MXU-native, halves HBM/VMEM traffic); LN params and
    # conv biases in f32.  Per-layer weights are stacked on a leading layer axis
    # and attention projections are column-reordered head-major so the kernel's
    # per-head scratch slices are contiguous.
    bf16 = jnp.bfloat16
    dhk = total_key_depth // num_heads
    dhv = total_value_depth // num_heads

    def nrm(k, shape, scale=0.02):
        return scale * jax.random.normal(k, shape, dtype=jnp.float32)

    keys = iter(jax.random.split(key, 4 + num_layers * 12))
    params = {
        "emb_w": nrm(next(keys), (embedding_size, hidden_size)).astype(bf16),
        "timing": gen_timing_signal(max_length, hidden_size),
        "lnf_g": jnp.ones((1, hidden_size), jnp.float32),
        "lnf_b": jnp.zeros((1, hidden_size), jnp.float32),
    }

    acc = {n: [] for n in
           ["ln1_g", "ln1_b", "wqkv_self", "wo_self", "ln2_g", "ln2_b",
            "wq_cross", "wkv_cross", "wo_cross", "ln3_g", "ln3_b",
            "conv1_w", "conv1_b", "conv2_w", "conv2_b"]}

    for _ in range(num_layers):
        wq_s = nrm(next(keys), (hidden_size, total_key_depth))
        wk_s = nrm(next(keys), (hidden_size, total_key_depth))
        wv_s = nrm(next(keys), (hidden_size, total_value_depth))
        wq_c = nrm(next(keys), (hidden_size, total_key_depth))
        wk_c = nrm(next(keys), (hidden_size, total_key_depth))
        wv_c = nrm(next(keys), (hidden_size, total_value_depth))

        # head-major fused columns: per head [q_h | k_h | v_h] (self), [k_h | v_h] (cross)
        wqkv = jnp.concatenate(
            [jnp.concatenate([wq_s[:, h * dhk:(h + 1) * dhk],
                              wk_s[:, h * dhk:(h + 1) * dhk],
                              wv_s[:, h * dhv:(h + 1) * dhv]], axis=1)
             for h in range(num_heads)], axis=1)
        wkv = jnp.concatenate(
            [jnp.concatenate([wk_c[:, h * dhk:(h + 1) * dhk],
                              wv_c[:, h * dhv:(h + 1) * dhv]], axis=1)
             for h in range(num_heads)], axis=1)

        acc["ln1_g"].append(jnp.ones((1, hidden_size), jnp.float32))
        acc["ln1_b"].append(jnp.zeros((1, hidden_size), jnp.float32))
        acc["ln2_g"].append(jnp.ones((1, hidden_size), jnp.float32))
        acc["ln2_b"].append(jnp.zeros((1, hidden_size), jnp.float32))
        acc["ln3_g"].append(jnp.ones((1, hidden_size), jnp.float32))
        acc["ln3_b"].append(jnp.zeros((1, hidden_size), jnp.float32))
        acc["wqkv_self"].append(wqkv.astype(bf16))
        acc["wo_self"].append(nrm(next(keys), (total_value_depth, hidden_size)).astype(bf16))
        acc["wq_cross"].append(wq_c.astype(bf16))
        acc["wkv_cross"].append(wkv.astype(bf16))
        acc["wo_cross"].append(nrm(next(keys), (total_value_depth, hidden_size)).astype(bf16))
        # causal conv weights tap-stacked along Cin: rows [0:Cin] act on x[t-2],
        # [Cin:2Cin] on x[t-1], [2Cin:3Cin] on x[t]  (== pytorch weight[:,:,k].T)
        acc["conv1_w"].append(nrm(next(keys), (3 * hidden_size, filter_size)).astype(bf16))
        acc["conv1_b"].append(nrm(next(keys), (1, filter_size)))
        acc["conv2_w"].append(nrm(next(keys), (3 * filter_size, hidden_size)).astype(bf16))
        acc["conv2_b"].append(nrm(next(keys), (1, hidden_size)))

    for name, lst in acc.items():
        params[name] = jnp.stack(lst, axis=0)
    return params


# -----------------------------------------------------------------------------
# Main
# -----------------------------------------------------------------------------
if __name__ == "__main__":
    embedding_size = 32
    hidden_size = 32
    num_layers = 2
    num_heads = 4
    total_key_depth = 32
    total_value_depth = 32
    filter_size = 64
    max_length = 100

    B, L_TGT, L_SRC = 2, 8, 10    # keep B even so both v7x TensorCores are fed

    root = jax.random.PRNGKey(0)
    k_param, k_in, k_enc = jax.random.split(root, 3)

    params = init_params(k_param, embedding_size, hidden_size, num_layers, num_heads,
                         total_key_depth, total_value_depth, filter_size, max_length)

    inputs = jax.random.normal(k_in, (B, L_TGT, embedding_size), dtype=jnp.float32)
    encoder_output = jax.random.normal(k_enc, (B, L_SRC, hidden_size), dtype=jnp.float32)

    # padding masks: True where padded (same convention as .eq(PAD_idx).unsqueeze(1))
    src_lens = jnp.array([10, 8])
    trg_lens = jnp.array([8, 6])
    mask_src = (jnp.arange(L_SRC)[None, :] >= src_lens[:, None])[:, None, :]   # (B, 1, L_src)
    mask_trg = (jnp.arange(L_TGT)[None, :] >= trg_lens[:, None])[:, None, :]   # (B, 1, L_tgt)

    y, attn_dist, aln_loss = decoder_forward(
        params, num_heads, inputs, encoder_output, mask_src, mask_trg
    )
    y = jax.block_until_ready(y)
    attn_dist = jax.block_until_ready(attn_dist)

    assert y.shape == (B, L_TGT, hidden_size)
    assert attn_dist.shape == (B, L_TGT, L_SRC)
    assert bool(jnp.all(jnp.isfinite(y)))
    assert bool(jnp.all(jnp.isfinite(attn_dist)))
    print("KERNEL_OK")
</pallas_src>

<mosaic_0001>
module attributes {stable_mosaic.version = 11 : i64} {
  func.func @_decoder_kernel(%arg0: i32, %arg1: i32, %arg2: memref<1x8x32xf32, #tpu.memory_space<vmem>>, %arg3: memref<1x10x32xf32, #tpu.memory_space<vmem>>, %arg4: memref<1x1x10xf32, #tpu.memory_space<vmem>>, %arg5: memref<1x1x8xf32, #tpu.memory_space<vmem>>, %arg6: memref<8x32xf32, #tpu.memory_space<vmem>>, %arg7: memref<32x32xbf16, #tpu.memory_space<vmem>>, %arg8: memref<1x32xf32, #tpu.memory_space<vmem>>, %arg9: memref<1x32xf32, #tpu.memory_space<vmem>>, %arg10: memref<1x1x32xf32, #tpu.memory_space<vmem>>, %arg11: memref<1x1x32xf32, #tpu.memory_space<vmem>>, %arg12: memref<1x32x96xbf16, #tpu.memory_space<vmem>>, %arg13: memref<1x32x32xbf16, #tpu.memory_space<vmem>>, %arg14: memref<1x1x32xf32, #tpu.memory_space<vmem>>, %arg15: memref<1x1x32xf32, #tpu.memory_space<vmem>>, %arg16: memref<1x32x32xbf16, #tpu.memory_space<vmem>>, %arg17: memref<1x32x64xbf16, #tpu.memory_space<vmem>>, %arg18: memref<1x32x32xbf16, #tpu.memory_space<vmem>>, %arg19: memref<1x1x32xf32, #tpu.memory_space<vmem>>, %arg20: memref<1x1x32xf32, #tpu.memory_space<vmem>>, %arg21: memref<1x96x64xbf16, #tpu.memory_space<vmem>>, %arg22: memref<1x1x64xf32, #tpu.memory_space<vmem>>, %arg23: memref<1x192x32xbf16, #tpu.memory_space<vmem>>, %arg24: memref<1x1x32xf32, #tpu.memory_space<vmem>>, %arg25: memref<1x8x128xf32, #tpu.memory_space<vmem>>, %arg26: memref<1x8x128xf32, #tpu.memory_space<vmem>>, %arg27: memref<8x32xf32, #tpu.memory_space<vmem>>, %arg28: memref<4x8x24xbf16, #tpu.memory_space<vmem>>, %arg29: memref<4x8x8xbf16, #tpu.memory_space<vmem>>, %arg30: memref<4x10x16xbf16, #tpu.memory_space<vmem>>, %arg31: memref<8x32xbf16, #tpu.memory_space<vmem>>, %arg32: memref<8x96xbf16, #tpu.memory_space<vmem>>, %arg33: memref<8x192xbf16, #tpu.memory_space<vmem>>) attributes {dimension_semantics = [#tpu.dimension_semantics<parallel>, #tpu.dimension_semantics<arbitrary>], iteration_bounds = array<i64: 2, 2>, scalar_prefetch = 0 : i64, scratch_operands = 7 : i64, tpu.core_type = #tpu.core_type<tc>, window_params = [{transform_indices = @transform_0, window_bounds = array<i64: 1, 8, 32>}, {transform_indices = @transform_1, window_bounds = array<i64: 1, 10, 32>}, {transform_indices = @transform_2, window_bounds = array<i64: 1, 1, 10>}, {transform_indices = @transform_3, window_bounds = array<i64: 1, 1, 8>}, {pipeline_mode = #tpu.pipeline_mode<synchronous>, transform_indices = @transform_4, window_bounds = array<i64: 8, 32>}, {pipeline_mode = #tpu.pipeline_mode<synchronous>, transform_indices = @transform_5, window_bounds = array<i64: 32, 32>}, {pipeline_mode = #tpu.pipeline_mode<synchronous>, transform_indices = @transform_6, window_bounds = array<i64: 1, 32>}, {pipeline_mode = #tpu.pipeline_mode<synchronous>, transform_indices = @transform_7, window_bounds = array<i64: 1, 32>}, {transform_indices = @transform_8, window_bounds = array<i64: 1, 1, 32>}, {transform_indices = @transform_9, window_bounds = array<i64: 1, 1, 32>}, {transform_indices = @transform_10, window_bounds = array<i64: 1, 32, 96>}, {transform_indices = @transform_11, window_bounds = array<i64: 1, 32, 32>}, {transform_indices = @transform_12, window_bounds = array<i64: 1, 1, 32>}, {transform_indices = @transform_13, window_bounds = array<i64: 1, 1, 32>}, {transform_indices = @transform_14, window_bounds = array<i64: 1, 32, 32>}, {transform_indices = @transform_15, window_bounds = array<i64: 1, 32, 64>}, {transform_indices = @transform_16, window_bounds = array<i64: 1, 32, 32>}, {transform_indices = @transform_17, window_bounds = array<i64: 1, 1, 32>}, {transform_indices = @transform_18, window_bounds = array<i64: 1, 1, 32>}, {transform_indices = @transform_19, window_bounds = array<i64: 1, 96, 64>}, {transform_indices = @transform_20, window_bounds = array<i64: 1, 1, 64>}, {transform_indices = @transform_21, window_bounds = array<i64: 1, 192, 32>}, {transform_indices = @transform_22, window_bounds = array<i64: 1, 1, 32>}, {transform_indices = @transform_23, window_bounds = array<i64: 1, 8, 128>}, {transform_indices = @transform_24, window_bounds = array<i64: 1, 8, 128>}]} {
    %0 = tpu.iota {dimensions = array<i32: 1>} : vector<8x8xi32>
    %1 = tpu.iota {dimensions = array<i32: 0>} : vector<8x8xi32>
    %2 = arith.cmpi sgt, %0, %1 : vector<8x8xi32>
    %c0 = arith.constant 0 : index
    %c0_0 = arith.constant 0 : index
    %c0_1 = arith.constant 0 : index
    %3 = vector.load %arg5[%c0, %c0_0, %c0_1] : memref<1x1x8xf32, #tpu.memory_space<vmem>>, vector<1x1x8xf32>
    %4 = vector.shape_cast %3 : vector<1x1x8xf32> to vector<1x8xf32>
    %cst = arith.constant 5.000000e-01 : f32
    %5 = vector.broadcast %cst : f32 to vector<1x8xf32>
    %6 = arith.cmpf ogt, %4, %5 : vector<1x8xf32>
    %7 = vector.broadcast %6 : vector<1x8xi1> to vector<8x8xi1>
    %8 = arith.ori %2, %7 : vector<8x8xi1>
    %cst_2 = arith.constant -9.99999984E+17 : f32
    %cst_3 = arith.constant 0.000000e+00 : f32
    %9 = vector.broadcast %cst_2 : f32 to vector<8x8xf32>
    %10 = vector.broadcast %cst_3 : f32 to vector<8x8xf32>
    %11 = arith.select %8, %9, %10 : vector<8x8xi1>, vector<8x8xf32>
    %c0_4 = arith.constant 0 : index
    %c0_5 = arith.constant 0 : index
    %c0_6 = arith.constant 0 : index
    %12 = vector.load %arg4[%c0_4, %c0_5, %c0_6] : memref<1x1x10xf32, #tpu.memory_space<vmem>>, vector<1x1x10xf32>
    %13 = vector.shape_cast %12 : vector<1x1x10xf32> to vector<1x10xf32>
    %cst_7 = arith.constant -9.99999984E+17 : f32
    %14 = vector.broadcast %cst_7 : f32 to vector<1x10xf32>
    %15 = arith.mulf %13, %14 : vector<1x10xf32>
    %16 = tpu.iota {dimensions = array<i32: 0>} : vector<8x1xi32>
    %c1_i32 = arith.constant 1 : i32
    %17 = vector.broadcast %c1_i32 : i32 to vector<8x1xi32>
    %18 = arith.cmpi sge, %16, %17 : vector<8x1xi32>
    %c2_i32 = arith.constant 2 : i32
    %19 = vector.broadcast %c2_i32 : i32 to vector<8x1xi32>
    %20 = arith.cmpi sge, %16, %19 : vector<8x1xi32>
    %c0_i32 = arith.constant 0 : i32
    %21 = arith.cmpi eq, %arg1, %c0_i32 : i32
    %22 = arith.extui %21 : i1 to i32
    %c0_i32_8 = arith.constant 0 : i32
    %23 = arith.cmpi ne, %22, %c0_i32_8 : i32
    scf.if %23 {
      %c0_246 = arith.constant 0 : index
      %c0_247 = arith.constant 0 : index
      %c0_248 = arith.constant 0 : index
      %449 = vector.load %arg2[%c0_246, %c0_247, %c0_248] : memref<1x8x32xf32, #tpu.memory_space<vmem>>, vector<1x8x32xf32>
      %450 = vector.shape_cast %449 : vector<1x8x32xf32> to vector<8x32xf32>
      %451 = arith.truncf %450 : vector<8x32xf32> to vector<8x32xbf16>
      %c0_249 = arith.constant 0 : index
      %c0_250 = arith.constant 0 : index
      %452 = vector.load %arg7[%c0_249, %c0_250] : memref<32x32xbf16, #tpu.memory_space<vmem>>, vector<32x32xbf16>
      %cst_251 = arith.constant dense<0.000000e+00> : vector<8x32xf32>
      %453 = tpu.matmul %451, %452, %cst_251 {dimension_numbers = #tpu.dot_dimension_numbers<[1], [0], [0], [1], [0, 0, 1, 1], [], []>} : vector<8x32xbf16>, vector<32x32xbf16>, vector<8x32xf32> -> vector<8x32xf32>
      %c0_252 = arith.constant 0 : index
      %c0_253 = arith.constant 0 : index
      %454 = vector.load %arg6[%c0_252, %c0_253] : memref<8x32xf32, #tpu.memory_space<vmem>>, vector<8x32xf32>
      %455 = arith.addf %453, %454 : vector<8x32xf32>
      %c0_254 = arith.constant 0 : index
      %c0_255 = arith.constant 0 : index
      %456 = vector.load %arg27[%c0_254, %c0_255] : memref<8x32xf32, #tpu.memory_space<vmem>>, vector<8x32xf32>
      tpu.vector_store %arg27[%c0_254, %c0_255], %455 {strides = array<i32>} : memref<8x32xf32, #tpu.memory_space<vmem>>, vector<8x32xf32>,
    } else {
    }
    %c0_9 = arith.constant 0 : index
    %c0_10 = arith.constant 0 : index
    %24 = vector.load %arg27[%c0_9, %c0_10] : memref<8x32xf32, #tpu.memory_space<vmem>>, vector<8x32xf32>
    %c0_11 = arith.constant 0 : index
    %c0_12 = arith.constant 0 : index
    %c0_13 = arith.constant 0 : index
    %25 = vector.load %arg3[%c0_11, %c0_12, %c0_13] : memref<1x10x32xf32, #tpu.memory_space<vmem>>, vector<1x10x32xf32>
    %26 = vector.shape_cast %25 : vector<1x10x32xf32> to vector<10x32xf32>
    %27 = arith.truncf %26 : vector<10x32xf32> to vector<10x32xbf16>
    %c0_14 = arith.constant 0 : index
    %c0_15 = arith.constant 0 : index
    %c0_16 = arith.constant 0 : index
    %28 = vector.load %arg10[%c0_14, %c0_15, %c0_16] : memref<1x1x32xf32, #tpu.memory_space<vmem>>, vector<1x1x32xf32>
    %29 = vector.shape_cast %28 : vector<1x1x32xf32> to vector<1x32xf32>
    %c0_17 = arith.constant 0 : index
    %c0_18 = arith.constant 0 : index
    %c0_19 = arith.constant 0 : index
    %30 = vector.load %arg11[%c0_17, %c0_18, %c0_19] : memref<1x1x32xf32, #tpu.memory_space<vmem>>, vector<1x1x32xf32>
    %31 = vector.shape_cast %30 : vector<1x1x32xf32> to vector<1x32xf32>
    %cst_20 = arith.constant dense<0.000000e+00> : vector<8xf32>
    %32 = vector.multi_reduction <add>, %24, %cst_20 [1] : vector<8x32xf32> to vector<8xf32>
    %33 = vector.shape_cast %32 : vector<8xf32> to vector<8x1xf32>
    %cst_21 = arith.constant 3.200000e+01 : f32
    %34 = vector.broadcast %cst_21 : f32 to vector<8x1xf32>
    %35 = arith.divf %33, %34 : vector<8x1xf32>
    %36 = vector.broadcast %35 : vector<8x1xf32> to vector<8x32xf32>
    %37 = arith.subf %24, %36 : vector<8x32xf32>
    %38 = arith.mulf %37, %37 : vector<8x32xf32>
    %cst_22 = arith.constant dense<0.000000e+00> : vector<8xf32>
    %39 = vector.multi_reduction <add>, %38, %cst_22 [1] : vector<8x32xf32> to vector<8xf32>
    %40 = vector.shape_cast %39 : vector<8xf32> to vector<8x1xf32>
    %cst_23 = arith.constant 0.0322580636 : f32
    %41 = vector.broadcast %cst_23 : f32 to vector<8x1xf32>
    %42 = arith.mulf %40, %41 : vector<8x1xf32>
    %43 = vector.broadcast %29 : vector<1x32xf32> to vector<8x32xf32>
    %44 = arith.mulf %43, %37 : vector<8x32xf32>
    %45 = math.sqrt %42 : vector<8x1xf32>
    %cst_24 = arith.constant 9.99999997E-7 : f32
    %46 = vector.broadcast %cst_24 : f32 to vector<8x1xf32>
    %47 = arith.addf %45, %46 : vector<8x1xf32>
    %48 = vector.broadcast %47 : vector<8x1xf32> to vector<8x32xf32>
    %49 = arith.divf %44, %48 : vector<8x32xf32>
    %50 = vector.broadcast %31 : vector<1x32xf32> to vector<8x32xf32>
    %51 = arith.addf %49, %50 : vector<8x32xf32>
    %52 = arith.truncf %51 : vector<8x32xf32> to vector<8x32xbf16>
    %c0_25 = arith.constant 0 : index
    %c0_26 = arith.constant 0 : index
    %c0_27 = arith.constant 0 : index
    %53 = vector.load %arg12[%c0_25, %c0_26, %c0_27] : memref<1x32x96xbf16, #tpu.memory_space<vmem>>, vector<1x32x96xbf16>
    %54 = vector.shape_cast %53 : vector<1x32x96xbf16> to vector<32x96xbf16>
    %cst_28 = arith.constant dense<0.000000e+00> : vector<8x96xf32>
    %55 = tpu.matmul %52, %54, %cst_28 {dimension_numbers = #tpu.dot_dimension_numbers<[1], [0], [0], [1], [0, 0, 1, 1], [], []>} : vector<8x32xbf16>, vector<32x96xbf16>, vector<8x96xf32> -> vector<8x96xf32>
    %56 = vector.extract_strided_slice %55 {offsets = [0, 0], sizes = [8, 24], strides = [1, 1]} : vector<8x96xf32> to vector<8x24xf32>
    %57 = arith.truncf %56 : vector<8x24xf32> to vector<8x24xbf16>
    %c0_29 = arith.constant 0 : index
    %c0_30 = arith.constant 0 : index
    %c0_31 = arith.constant 0 : index
    %58 = vector.load %arg28[%c0_29, %c0_30, %c0_31] : memref<4x8x24xbf16, #tpu.memory_space<vmem>>, vector<1x8x24xbf16>
    %59 = vector.shape_cast %58 : vector<1x8x24xbf16> to vector<8x24xbf16>
    %60 = vector.shape_cast %57 : vector<8x24xbf16> to vector<1x8x24xbf16>
    tpu.vector_store %arg28[%c0_29, %c0_30, %c0_31], %60 {strides = array<i32>} : memref<4x8x24xbf16, #tpu.memory_space<vmem>>, vector<1x8x24xbf16>,
    %61 = vector.extract_strided_slice %55 {offsets = [0, 24], sizes = [8, 24], strides = [1, 1]} : vector<8x96xf32> to vector<8x24xf32>
    %62 = arith.truncf %61 : vector<8x24xf32> to vector<8x24xbf16>
    %c1 = arith.constant 1 : index
    %c0_32 = arith.constant 0 : index
    %c0_33 = arith.constant 0 : index
    %63 = vector.load %arg28[%c1, %c0_32, %c0_33] : memref<4x8x24xbf16, #tpu.memory_space<vmem>>, vector<1x8x24xbf16>
    %64 = vector.shape_cast %63 : vector<1x8x24xbf16> to vector<8x24xbf16>
    %65 = vector.shape_cast %62 : vector<8x24xbf16> to vector<1x8x24xbf16>
    tpu.vector_store %arg28[%c1, %c0_32, %c0_33], %65 {strides = array<i32>} : memref<4x8x24xbf16, #tpu.memory_space<vmem>>, vector<1x8x24xbf16>,
    %66 = vector.extract_strided_slice %55 {offsets = [0, 48], sizes = [8, 24], strides = [1, 1]} : vector<8x96xf32> to vector<8x24xf32>
    %67 = arith.truncf %66 : vector<8x24xf32> to vector<8x24xbf16>
    %c2 = arith.constant 2 : index
    %c0_34 = arith.constant 0 : index
    %c0_35 = arith.constant 0 : index
    %68 = vector.load %arg28[%c2, %c0_34, %c0_35] : memref<4x8x24xbf16, #tpu.memory_space<vmem>>, vector<1x8x24xbf16>
    %69 = vector.shape_cast %68 : vector<1x8x24xbf16> to vector<8x24xbf16>
    %70 = vector.shape_cast %67 : vector<8x24xbf16> to vector<1x8x24xbf16>
    tpu.vector_store %arg28[%c2, %c0_34, %c0_35], %70 {strides = array<i32>} : memref<4x8x24xbf16, #tpu.memory_space<vmem>>, vector<1x8x24xbf16>,
    %71 = vector.extract_strided_slice %55 {offsets = [0, 72], sizes = [8, 24], strides = [1, 1]} : vector<8x96xf32> to vector<8x24xf32>
    %72 = arith.truncf %71 : vector<8x24xf32> to vector<8x24xbf16>
    %c3 = arith.constant 3 : index
    %c0_36 = arith.constant 0 : index
    %c0_37 = arith.constant 0 : index
    %73 = vector.load %arg28[%c3, %c0_36, %c0_37] : memref<4x8x24xbf16, #tpu.memory_space<vmem>>, vector<1x8x24xbf16>
    %74 = vector.shape_cast %73 : vector<1x8x24xbf16> to vector<8x24xbf16>
    %75 = vector.shape_cast %72 : vector<8x24xbf16> to vector<1x8x24xbf16>
    tpu.vector_store %arg28[%c3, %c0_36, %c0_37], %75 {strides = array<i32>} : memref<4x8x24xbf16, #tpu.memory_space<vmem>>, vector<1x8x24xbf16>,
    %c0_38 = arith.constant 0 : index
    %c0_39 = arith.constant 0 : index
    %c0_40 = arith.constant 0 : index
    %76 = vector.load %arg28[%c0_38, %c0_39, %c0_40] : memref<4x8x24xbf16, #tpu.memory_space<vmem>>, vector<1x8x24xbf16>
    %77 = vector.shape_cast %76 : vector<1x8x24xbf16> to vector<8x24xbf16>
    %78 = vector.extract_strided_slice %77 {offsets = [0, 0], sizes = [8, 8], strides = [1, 1]} : vector<8x24xbf16> to vector<8x8xbf16>
    %c0_41 = arith.constant 0 : index
    %c0_42 = arith.constant 0 : index
    %c0_43 = arith.constant 0 : index
    %79 = vector.load %arg28[%c0_41, %c0_42, %c0_43] : memref<4x8x24xbf16, #tpu.memory_space<vmem>>, vector<1x8x24xbf16>
    %80 = vector.shape_cast %79 : vector<1x8x24xbf16> to vector<8x24xbf16>
    %81 = vector.extract_strided_slice %80 {offsets = [0, 8], sizes = [8, 8], strides = [1, 1]} : vector<8x24xbf16> to vector<8x8xbf16>
    %82 = vector.extract_strided_slice %80 {offsets = [0, 16], sizes = [8, 8], strides = [1, 1]} : vector<8x24xbf16> to vector<8x8xbf16>
    %83 = tpu.transpose %81, [1, 0] : vector<8x8xbf16> -> vector<8x8xbf16>
    %cst_44 = arith.constant dense<0.000000e+00> : vector<8x8xf32>
    %84 = tpu.matmul %78, %83, %cst_44 {dimension_numbers = #tpu.dot_dimension_numbers<[1], [0], [0], [1], [0, 0, 1, 1], [], []>} : vector<8x8xbf16>, vector<8x8xbf16>, vector<8x8xf32> -> vector<8x8xf32>
    %cst_45 = arith.constant 0.353553385 : f32
    %85 = vector.broadcast %cst_45 : f32 to vector<8x8xf32>
    %86 = arith.mulf %84, %85 : vector<8x8xf32>
    %87 = arith.addf %86, %11 : vector<8x8xf32>
    %cst_46 = arith.constant dense<0xFF800000> : vector<8xf32>
    %88 = vector.multi_reduction <maximumf>, %87, %cst_46 [1] : vector<8x8xf32> to vector<8xf32>
    %89 = vector.shape_cast %88 : vector<8xf32> to vector<8x1xf32>
    %90 = vector.broadcast %89 : vector<8x1xf32> to vector<8x8xf32>
    %91 = arith.subf %87, %90 : vector<8x8xf32>
    %92 = math.exp %91 : vector<8x8xf32>
    %cst_47 = arith.constant dense<0.000000e+00> : vector<8xf32>
    %93 = vector.multi_reduction <add>, %92, %cst_47 [1] : vector<8x8xf32> to vector<8xf32>
    %94 = vector.shape_cast %93 : vector<8xf32> to vector<8x1xf32>
    %95 = tpu.reciprocal %94 {approx = true} : vector<8x1xf32> -> vector<8x1xf32>
    %96 = vector.broadcast %95 : vector<8x1xf32> to vector<8x8xf32>
    %97 = arith.mulf %92, %96 : vector<8x8xf32>
    %98 = arith.truncf %97 : vector<8x8xf32> to vector<8x8xbf16>
    %cst_48 = arith.constant dense<0.000000e+00> : vector<8x8xf32>
    %99 = tpu.matmul %98, %82, %cst_48 {dimension_numbers = #tpu.dot_dimension_numbers<[1], [0], [0], [1], [0, 0, 1, 1], [], []>} : vector<8x8xbf16>, vector<8x8xbf16>, vector<8x8xf32> -> vector<8x8xf32>
    %100 = arith.truncf %99 : vector<8x8xf32> to vector<8x8xbf16>
    %c0_49 = arith.constant 0 : index
    %c0_50 = arith.constant 0 : index
    %101 = vector.load %arg31[%c0_49, %c0_50] : memref<8x32xbf16, #tpu.memory_space<vmem>>, vector<8x8xbf16>
    tpu.vector_store %arg31[%c0_49, %c0_50], %100 {strides = array<i32>} : memref<8x32xbf16, #tpu.memory_space<vmem>>, vector<8x8xbf16>,
    %c1_51 = arith.constant 1 : index
    %c0_52 = arith.constant 0 : index
    %c0_53 = arith.constant 0 : index
    %102 = vector.load %arg28[%c1_51, %c0_52, %c0_53] : memref<4x8x24xbf16, #tpu.memory_space<vmem>>, vector<1x8x24xbf16>
    %103 = vector.shape_cast %102 : vector<1x8x24xbf16> to vector<8x24xbf16>
    %104 = vector.extract_strided_slice %103 {offsets = [0, 0], sizes = [8, 8], strides = [1, 1]} : vector<8x24xbf16> to vector<8x8xbf16>
    %c1_54 = arith.constant 1 : index
    %c0_55 = arith.constant 0 : index
    %c0_56 = arith.constant 0 : index
    %105 = vector.load %arg28[%c1_54, %c0_55, %c0_56] : memref<4x8x24xbf16, #tpu.memory_space<vmem>>, vector<1x8x24xbf16>
    %106 = vector.shape_cast %105 : vector<1x8x24xbf16> to vector<8x24xbf16>
    %107 = vector.extract_strided_slice %106 {offsets = [0, 8], sizes = [8, 8], strides = [1, 1]} : vector<8x24xbf16> to vector<8x8xbf16>
    %108 = vector.extract_strided_slice %106 {offsets = [0, 16], sizes = [8, 8], strides = [1, 1]} : vector<8x24xbf16> to vector<8x8xbf16>
    %109 = tpu.transpose %107, [1, 0] : vector<8x8xbf16> -> vector<8x8xbf16>
    %cst_57 = arith.constant dense<0.000000e+00> : vector<8x8xf32>
    %110 = tpu.matmul %104, %109, %cst_57 {dimension_numbers = #tpu.dot_dimension_numbers<[1], [0], [0], [1], [0, 0, 1, 1], [], []>} : vector<8x8xbf16>, vector<8x8xbf16>, vector<8x8xf32> -> vector<8x8xf32>
    %cst_58 = arith.constant 0.353553385 : f32
    %111 = vector.broadcast %cst_58 : f32 to vector<8x8xf32>
    %112 = arith.mulf %110, %111 : vector<8x8xf32>
    %113 = arith.addf %112, %11 : vector<8x8xf32>
    %cst_59 = arith.constant dense<0xFF800000> : vector<8xf32>
    %114 = vector.multi_reduction <maximumf>, %113, %cst_59 [1] : vector<8x8xf32> to vector<8xf32>
    %115 = vector.shape_cast %114 : vector<8xf32> to vector<8x1xf32>
    %116 = vector.broadcast %115 : vector<8x1xf32> to vector<8x8xf32>
    %117 = arith.subf %113, %116 : vector<8x8xf32>
    %118 = math.exp %117 : vector<8x8xf32>
    %cst_60 = arith.constant dense<0.000000e+00> : vector<8xf32>
    %119 = vector.multi_reduction <add>, %118, %cst_60 [1] : vector<8x8xf32> to vector<8xf32>
    %120 = vector.shape_cast %119 : vector<8xf32> to vector<8x1xf32>
    %121 = tpu.reciprocal %120 {approx = true} : vector<8x1xf32> -> vector<8x1xf32>
    %122 = vector.broadcast %121 : vector<8x1xf32> to vector<8x8xf32>
    %123 = arith.mulf %118, %122 : vector<8x8xf32>
    %124 = arith.truncf %123 : vector<8x8xf32> to vector<8x8xbf16>
    %cst_61 = arith.constant dense<0.000000e+00> : vector<8x8xf32>
    %125 = tpu.matmul %124, %108, %cst_61 {dimension_numbers = #tpu.dot_dimension_numbers<[1], [0], [0], [1], [0, 0, 1, 1], [], []>} : vector<8x8xbf16>, vector<8x8xbf16>, vector<8x8xf32> -> vector<8x8xf32>
    %126 = arith.truncf %125 : vector<8x8xf32> to vector<8x8xbf16>
    %c0_62 = arith.constant 0 : index
    %c8 = arith.constant 8 : index
    %127 = vector.load %arg31[%c0_62, %c8] : memref<8x32xbf16, #tpu.memory_space<vmem>>, vector<8x8xbf16>
    tpu.vector_store %arg31[%c0_62, %c8], %126 {strides = array<i32>} : memref<8x32xbf16, #tpu.memory_space<vmem>>, vector<8x8xbf16>,
    %c2_63 = arith.constant 2 : index
    %c0_64 = arith.constant 0 : index
    %c0_65 = arith.constant 0 : index
    %128 = vector.load %arg28[%c2_63, %c0_64, %c0_65] : memref<4x8x24xbf16, #tpu.memory_space<vmem>>, vector<1x8x24xbf16>
    %129 = vector.shape_cast %128 : vector<1x8x24xbf16> to vector<8x24xbf16>
    %130 = vector.extract_strided_slice %129 {offsets = [0, 0], sizes = [8, 8], strides = [1, 1]} : vector<8x24xbf16> to vector<8x8xbf16>
    %c2_66 = arith.constant 2 : index
    %c0_67 = arith.constant 0 : index
    %c0_68 = arith.constant 0 : index
    %131 = vector.load %arg28[%c2_66, %c0_67, %c0_68] : memref<4x8x24xbf16, #tpu.memory_space<vmem>>, vector<1x8x24xbf16>
    %132 = vector.shape_cast %131 : vector<1x8x24xbf16> to vector<8x24xbf16>
    %133 = vector.extract_strided_slice %132 {offsets = [0, 8], sizes = [8, 8], strides = [1, 1]} : vector<8x24xbf16> to vector<8x8xbf16>
    %134 = vector.extract_strided_slice %132 {offsets = [0, 16], sizes = [8, 8], strides = [1, 1]} : vector<8x24xbf16> to vector<8x8xbf16>
    %135 = tpu.transpose %133, [1, 0] : vector<8x8xbf16> -> vector<8x8xbf16>
    %cst_69 = arith.constant dense<0.000000e+00> : vector<8x8xf32>
    %136 = tpu.matmul %130, %135, %cst_69 {dimension_numbers = #tpu.dot_dimension_numbers<[1], [0], [0], [1], [0, 0, 1, 1], [], []>} : vector<8x8xbf16>, vector<8x8xbf16>, vector<8x8xf32> -> vector<8x8xf32>
    %cst_70 = arith.constant 0.353553385 : f32
    %137 = vector.broadcast %cst_70 : f32 to vector<8x8xf32>
    %138 = arith.mulf %136, %137 : vector<8x8xf32>
    %139 = arith.addf %138, %11 : vector<8x8xf32>
    %cst_71 = arith.constant dense<0xFF800000> : vector<8xf32>
    %140 = vector.multi_reduction <maximumf>, %139, %cst_71 [1] : vector<8x8xf32> to vector<8xf32>
    %141 = vector.shape_cast %140 : vector<8xf32> to vector<8x1xf32>
    %142 = vector.broadcast %141 : vector<8x1xf32> to vector<8x8xf32>
    %143 = arith.subf %139, %142 : vector<8x8xf32>
    %144 = math.exp %143 : vector<8x8xf32>
    %cst_72 = arith.constant dense<0.000000e+00> : vector<8xf32>
    %145 = vector.multi_reduction <add>, %144, %cst_72 [1] : vector<8x8xf32> to vector<8xf32>
    %146 = vector.shape_cast %145 : vector<8xf32> to vector<8x1xf32>
    %147 = tpu.reciprocal %146 {approx = true} : vector<8x1xf32> -> vector<8x1xf32>
    %148 = vector.broadcast %147 : vector<8x1xf32> to vector<8x8xf32>
    %149 = arith.mulf %144, %148 : vector<8x8xf32>
    %150 = arith.truncf %149 : vector<8x8xf32> to vector<8x8xbf16>
    %cst_73 = arith.constant dense<0.000000e+00> : vector<8x8xf32>
    %151 = tpu.matmul %150, %134, %cst_73 {dimension_numbers = #tpu.dot_dimension_numbers<[1], [0], [0], [1], [0, 0, 1, 1], [], []>} : vector<8x8xbf16>, vector<8x8xbf16>, vector<8x8xf32> -> vector<8x8xf32>
    %152 = arith.truncf %151 : vector<8x8xf32> to vector<8x8xbf16>
    %c0_74 = arith.constant 0 : index
    %c16 = arith.constant 16 : index
    %153 = vector.load %arg31[%c0_74, %c16] : memref<8x32xbf16, #tpu.memory_space<vmem>>, vector<8x8xbf16>
    tpu.vector_store %arg31[%c0_74, %c16], %152 {strides = array<i32>} : memref<8x32xbf16, #tpu.memory_space<vmem>>, vector<8x8xbf16>,
    %c3_75 = arith.constant 3 : index
    %c0_76 = arith.constant 0 : index
    %c0_77 = arith.constant 0 : index
    %154 = vector.load %arg28[%c3_75, %c0_76, %c0_77] : memref<4x8x24xbf16, #tpu.memory_space<vmem>>, vector<1x8x24xbf16>
    %155 = vector.shape_cast %154 : vector<1x8x24xbf16> to vector<8x24xbf16>
    %156 = vector.extract_strided_slice %155 {offsets = [0, 0], sizes = [8, 8], strides = [1, 1]} : vector<8x24xbf16> to vector<8x8xbf16>
    %c3_78 = arith.constant 3 : index
    %c0_79 = arith.constant 0 : index
    %c0_80 = arith.constant 0 : index
    %157 = vector.load %arg28[%c3_78, %c0_79, %c0_80] : memref<4x8x24xbf16, #tpu.memory_space<vmem>>, vector<1x8x24xbf16>
    %158 = vector.shape_cast %157 : vector<1x8x24xbf16> to vector<8x24xbf16>
    %159 = vector.extract_strided_slice %158 {offsets = [0, 8], sizes = [8, 8], strides = [1, 1]} : vector<8x24xbf16> to vector<8x8xbf16>
    %160 = vector.extract_strided_slice %158 {offsets = [0, 16], sizes = [8, 8], strides = [1, 1]} : vector<8x24xbf16> to vector<8x8xbf16>
    %161 = tpu.transpose %159, [1, 0] : vector<8x8xbf16> -> vector<8x8xbf16>
    %cst_81 = arith.constant dense<0.000000e+00> : vector<8x8xf32>
    %162 = tpu.matmul %156, %161, %cst_81 {dimension_numbers = #tpu.dot_dimension_numbers<[1], [0], [0], [1], [0, 0, 1, 1], [], []>} : vector<8x8xbf16>, vector<8x8xbf16>, vector<8x8xf32> -> vector<8x8xf32>
    %cst_82 = arith.constant 0.353553385 : f32
    %163 = vector.broadcast %cst_82 : f32 to vector<8x8xf32>
    %164 = arith.mulf %162, %163 : vector<8x8xf32>
    %165 = arith.addf %164, %11 : vector<8x8xf32>
    %cst_83 = arith.constant dense<0xFF800000> : vector<8xf32>
    %166 = vector.multi_reduction <maximumf>, %165, %cst_83 [1] : vector<8x8xf32> to vector<8xf32>
    %167 = vector.shape_cast %166 : vector<8xf32> to vector<8x1xf32>
    %168 = vector.broadcast %167 : vector<8x1xf32> to vector<8x8xf32>
    %169 = arith.subf %165, %168 : vector<8x8xf32>
    %170 = math.exp %169 : vector<8x8xf32>
    %cst_84 = arith.constant dense<0.000000e+00> : vector<8xf32>
    %171 = vector.multi_reduction <add>, %170, %cst_84 [1] : vector<8x8xf32> to vector<8xf32>
    %172 = vector.shape_cast %171 : vector<8xf32> to vector<8x1xf32>
    %173 = tpu.reciprocal %172 {approx = true} : vector<8x1xf32> -> vector<8x1xf32>
    %174 = vector.broadcast %173 : vector<8x1xf32> to vector<8x8xf32>
    %175 = arith.mulf %170, %174 : vector<8x8xf32>
    %176 = arith.truncf %175 : vector<8x8xf32> to vector<8x8xbf16>
    %cst_85 = arith.constant dense<0.000000e+00> : vector<8x8xf32>
    %177 = tpu.matmul %176, %160, %cst_85 {dimension_numbers = #tpu.dot_dimension_numbers<[1], [0], [0], [1], [0, 0, 1, 1], [], []>} : vector<8x8xbf16>, vector<8x8xbf16>, vector<8x8xf32> -> vector<8x8xf32>
    %178 = arith.truncf %177 : vector<8x8xf32> to vector<8x8xbf16>
    %c0_86 = arith.constant 0 : index
    %c24 = arith.constant 24 : index
    %179 = vector.load %arg31[%c0_86, %c24] : memref<8x32xbf16, #tpu.memory_space<vmem>>, vector<8x8xbf16>
    tpu.vector_store %arg31[%c0_86, %c24], %178 {strides = array<i32>} : memref<8x32xbf16, #tpu.memory_space<vmem>>, vector<8x8xbf16>,
    %c0_87 = arith.constant 0 : index
    %c0_88 = arith.constant 0 : index
    %180 = vector.load %arg31[%c0_87, %c0_88] : memref<8x32xbf16, #tpu.memory_space<vmem>>, vector<8x32xbf16>
    %c0_89 = arith.constant 0 : index
    %c0_90 = arith.constant 0 : index
    %c0_91 = arith.constant 0 : index
    %181 = vector.load %arg13[%c0_89, %c0_90, %c0_91] : memref<1x32x32xbf16, #tpu.memory_space<vmem>>, vector<1x32x32xbf16>
    %182 = vector.shape_cast %181 : vector<1x32x32xbf16> to vector<32x32xbf16>
    %cst_92 = arith.constant dense<0.000000e+00> : vector<8x32xf32>
    %183 = tpu.matmul %180, %182, %cst_92 {dimension_numbers = #tpu.dot_dimension_numbers<[1], [0], [0], [1], [0, 0, 1, 1], [], []>} : vector<8x32xbf16>, vector<32x32xbf16>, vector<8x32xf32> -> vector<8x32xf32>
    %184 = arith.addf %24, %183 : vector<8x32xf32>
    %c0_93 = arith.constant 0 : index
    %c0_94 = arith.constant 0 : index
    %c0_95 = arith.constant 0 : index
    %185 = vector.load %arg14[%c0_93, %c0_94, %c0_95] : memref<1x1x32xf32, #tpu.memory_space<vmem>>, vector<1x1x32xf32>
    %186 = vector.shape_cast %185 : vector<1x1x32xf32> to vector<1x32xf32>
    %c0_96 = arith.constant 0 : index
    %c0_97 = arith.constant 0 : index
    %c0_98 = arith.constant 0 : index
    %187 = vector.load %arg15[%c0_96, %c0_97, %c0_98] : memref<1x1x32xf32, #tpu.memory_space<vmem>>, vector<1x1x32xf32>
    %188 = vector.shape_cast %187 : vector<1x1x32xf32> to vector<1x32xf32>
    %cst_99 = arith.constant dense<0.000000e+00> : vector<8xf32>
    %189 = vector.multi_reduction <add>, %184, %cst_99 [1] : vector<8x32xf32> to vector<8xf32>
    %190 = vector.shape_cast %189 : vector<8xf32> to vector<8x1xf32>
    %cst_100 = arith.constant 3.200000e+01 : f32
    %191 = vector.broadcast %cst_100 : f32 to vector<8x1xf32>
    %192 = arith.divf %190, %191 : vector<8x1xf32>
    %193 = vector.broadcast %192 : vector<8x1xf32> to vector<8x32xf32>
    %194 = arith.subf %184, %193 : vector<8x32xf32>
    %195 = arith.mulf %194, %194 : vector<8x32xf32>
    %cst_101 = arith.constant dense<0.000000e+00> : vector<8xf32>
    %196 = vector.multi_reduction <add>, %195, %cst_101 [1] : vector<8x32xf32> to vector<8xf32>
    %197 = vector.shape_cast %196 : vector<8xf32> to vector<8x1xf32>
    %cst_102 = arith.constant 0.0322580636 : f32
    %198 = vector.broadcast %cst_102 : f32 to vector<8x1xf32>
    %199 = arith.mulf %197, %198 : vector<8x1xf32>
    %200 = vector.broadcast %186 : vector<1x32xf32> to vector<8x32xf32>
    %201 = arith.mulf %200, %194 : vector<8x32xf32>
    %202 = math.sqrt %199 : vector<8x1xf32>
    %cst_103 = arith.constant 9.99999997E-7 : f32
    %203 = vector.broadcast %cst_103 : f32 to vector<8x1xf32>
    %204 = arith.addf %202, %203 : vector<8x1xf32>
    %205 = vector.broadcast %204 : vector<8x1xf32> to vector<8x32xf32>
    %206 = arith.divf %201, %205 : vector<8x32xf32>
    %207 = vector.broadcast %188 : vector<1x32xf32> to vector<8x32xf32>
    %208 = arith.addf %206, %207 : vector<8x32xf32>
    %209 = arith.truncf %208 : vector<8x32xf32> to vector<8x32xbf16>
    %c0_104 = arith.constant 0 : index
    %c0_105 = arith.constant 0 : index
    %c0_106 = arith.constant 0 : index
    %210 = vector.load %arg16[%c0_104, %c0_105, %c0_106] : memref<1x32x32xbf16, #tpu.memory_space<vmem>>, vector<1x32x32xbf16>
    %211 = vector.shape_cast %210 : vector<1x32x32xbf16> to vector<32x32xbf16>
    %cst_107 = arith.constant dense<0.000000e+00> : vector<8x32xf32>
    %212 = tpu.matmul %209, %211, %cst_107 {dimension_numbers = #tpu.dot_dimension_numbers<[1], [0], [0], [1], [0, 0, 1, 1], [], []>} : vector<8x32xbf16>, vector<32x32xbf16>, vector<8x32xf32> -> vector<8x32xf32>
    %c0_108 = arith.constant 0 : index
    %c0_109 = arith.constant 0 : index
    %c0_110 = arith.constant 0 : index
    %213 = vector.load %arg17[%c0_108, %c0_109, %c0_110] : memref<1x32x64xbf16, #tpu.memory_space<vmem>>, vector<1x32x64xbf16>
    %214 = vector.shape_cast %213 : vector<1x32x64xbf16> to vector<32x64xbf16>
    %cst_111 = arith.constant dense<0.000000e+00> : vector<10x64xf32>
    %215 = tpu.matmul %27, %214, %cst_111 {dimension_numbers = #tpu.dot_dimension_numbers<[1], [0], [0], [1], [0, 0, 1, 1], [], []>} : vector<10x32xbf16>, vector<32x64xbf16>, vector<10x64xf32> -> vector<10x64xf32>
    %216 = vector.extract_strided_slice %212 {offsets = [0, 0], sizes = [8, 8], strides = [1, 1]} : vector<8x32xf32> to vector<8x8xf32>
    %217 = arith.truncf %216 : vector<8x8xf32> to vector<8x8xbf16>
    %c0_112 = arith.constant 0 : index
    %c0_113 = arith.constant 0 : index
    %c0_114 = arith.constant 0 : index
    %218 = vector.load %arg29[%c0_112, %c0_113, %c0_114] : memref<4x8x8xbf16, #tpu.memory_space<vmem>>, vector<1x8x8xbf16>
    %219 = vector.shape_cast %218 : vector<1x8x8xbf16> to vector<8x8xbf16>
    %220 = vector.shape_cast %217 : vector<8x8xbf16> to vector<1x8x8xbf16>
    tpu.vector_store %arg29[%c0_112, %c0_113, %c0_114], %220 {strides = array<i32>} : memref<4x8x8xbf16, #tpu.memory_space<vmem>>, vector<1x8x8xbf16>,
    %221 = vector.extract_strided_slice %215 {offsets = [0, 0], sizes = [10, 16], strides = [1, 1]} : vector<10x64xf32> to vector<10x16xf32>
    %222 = arith.truncf %221 : vector<10x16xf32> to vector<10x16xbf16>
    %c0_115 = arith.constant 0 : index
    %c0_116 = arith.constant 0 : index
    %c0_117 = arith.constant 0 : index
    %223 = vector.load %arg30[%c0_115, %c0_116, %c0_117] : memref<4x10x16xbf16, #tpu.memory_space<vmem>>, vector<1x10x16xbf16>
    %224 = vector.shape_cast %223 : vector<1x10x16xbf16> to vector<10x16xbf16>
    %225 = vector.shape_cast %222 : vector<10x16xbf16> to vector<1x10x16xbf16>
    tpu.vector_store %arg30[%c0_115, %c0_116, %c0_117], %225 {strides = array<i32>} : memref<4x10x16xbf16, #tpu.memory_space<vmem>>, vector<1x10x16xbf16>,
    %226 = vector.extract_strided_slice %212 {offsets = [0, 8], sizes = [8, 8], strides = [1, 1]} : vector<8x32xf32> to vector<8x8xf32>
    %227 = arith.truncf %226 : vector<8x8xf32> to vector<8x8xbf16>
    %c1_118 = arith.constant 1 : index
    %c0_119 = arith.constant 0 : index
    %c0_120 = arith.constant 0 : index
    %228 = vector.load %arg29[%c1_118, %c0_119, %c0_120] : memref<4x8x8xbf16, #tpu.memory_space<vmem>>, vector<1x8x8xbf16>
    %229 = vector.shape_cast %228 : vector<1x8x8xbf16> to vector<8x8xbf16>
    %230 = vector.shape_cast %227 : vector<8x8xbf16> to vector<1x8x8xbf16>
    tpu.vector_store %arg29[%c1_118, %c0_119, %c0_120], %230 {strides = array<i32>} : memref<4x8x8xbf16, #tpu.memory_space<vmem>>, vector<1x8x8xbf16>,
    %231 = vector.extract_strided_slice %215 {offsets = [0, 16], sizes = [10, 16], strides = [1, 1]} : vector<10x64xf32> to vector<10x16xf32>
    %232 = arith.truncf %231 : vector<10x16xf32> to vector<10x16xbf16>
    %c1_121 = arith.constant 1 : index
    %c0_122 = arith.constant 0 : index
    %c0_123 = arith.constant 0 : index
    %233 = vector.load %arg30[%c1_121, %c0_122, %c0_123] : memref<4x10x16xbf16, #tpu.memory_space<vmem>>, vector<1x10x16xbf16>
    %234 = vector.shape_cast %233 : vector<1x10x16xbf16> to vector<10x16xbf16>
    %235 = vector.shape_cast %232 : vector<10x16xbf16> to vector<1x10x16xbf16>
    tpu.vector_store %arg30[%c1_121, %c0_122, %c0_123], %235 {strides = array<i32>} : memref<4x10x16xbf16, #tpu.memory_space<vmem>>, vector<1x10x16xbf16>,
    %236 = vector.extract_strided_slice %212 {offsets = [0, 16], sizes = [8, 8], strides = [1, 1]} : vector<8x32xf32> to vector<8x8xf32>
    %237 = arith.truncf %236 : vector<8x8xf32> to vector<8x8xbf16>
    %c2_124 = arith.constant 2 : index
    %c0_125 = arith.constant 0 : index
    %c0_126 = arith.constant 0 : index
    %238 = vector.load %arg29[%c2_124, %c0_125, %c0_126] : memref<4x8x8xbf16, #tpu.memory_space<vmem>>, vector<1x8x8xbf16>
    %239 = vector.shape_cast %238 : vector<1x8x8xbf16> to vector<8x8xbf16>
    %240 = vector.shape_cast %237 : vector<8x8xbf16> to vector<1x8x8xbf16>
    tpu.vector_store %arg29[%c2_124, %c0_125, %c0_126], %240 {strides = array<i32>} : memref<4x8x8xbf16, #tpu.memory_space<vmem>>, vector<1x8x8xbf16>,
    %241 = vector.extract_strided_slice %215 {offsets = [0, 32], sizes = [10, 16], strides = [1, 1]} : vector<10x64xf32> to vector<10x16xf32>
    %242 = arith.truncf %241 : vector<10x16xf32> to vector<10x16xbf16>
    %c2_127 = arith.constant 2 : index
    %c0_128 = arith.constant 0 : index
    %c0_129 = arith.constant 0 : index
    %243 = vector.load %arg30[%c2_127, %c0_128, %c0_129] : memref<4x10x16xbf16, #tpu.memory_space<vmem>>, vector<1x10x16xbf16>
    %244 = vector.shape_cast %243 : vector<1x10x16xbf16> to vector<10x16xbf16>
    %245 = vector.shape_cast %242 : vector<10x16xbf16> to vector<1x10x16xbf16>
    tpu.vector_store %arg30[%c2_127, %c0_128, %c0_129], %245 {strides = array<i32>} : memref<4x10x16xbf16, #tpu.memory_space<vmem>>, vector<1x10x16xbf16>,
    %246 = vector.extract_strided_slice %212 {offsets = [0, 24], sizes = [8, 8], strides = [1, 1]} : vector<8x32xf32> to vector<8x8xf32>
    %247 = arith.truncf %246 : vector<8x8xf32> to vector<8x8xbf16>
    %c3_130 = arith.constant 3 : index
    %c0_131 = arith.constant 0 : index
    %c0_132 = arith.constant 0 : index
    %248 = vector.load %arg29[%c3_130, %c0_131, %c0_132] : memref<4x8x8xbf16, #tpu.memory_space<vmem>>, vector<1x8x8xbf16>
    %249 = vector.shape_cast %248 : vector<1x8x8xbf16> to vector<8x8xbf16>
    %250 = vector.shape_cast %247 : vector<8x8xbf16> to vector<1x8x8xbf16>
    tpu.vector_store %arg29[%c3_130, %c0_131, %c0_132], %250 {strides = array<i32>} : memref<4x8x8xbf16, #tpu.memory_space<vmem>>, vector<1x8x8xbf16>,
    %251 = vector.extract_strided_slice %215 {offsets = [0, 48], sizes = [10, 16], strides = [1, 1]} : vector<10x64xf32> to vector<10x16xf32>
    %252 = arith.truncf %251 : vector<10x16xf32> to vector<10x16xbf16>
    %c3_133 = arith.constant 3 : index
    %c0_134 = arith.constant 0 : index
    %c0_135 = arith.constant 0 : index
    %253 = vector.load %arg30[%c3_133, %c0_134, %c0_135] : memref<4x10x16xbf16, #tpu.memory_space<vmem>>, vector<1x10x16xbf16>
    %254 = vector.shape_cast %253 : vector<1x10x16xbf16> to vector<10x16xbf16>
    %255 = vector.shape_cast %252 : vector<10x16xbf16> to vector<1x10x16xbf16>
    tpu.vector_store %arg30[%c3_133, %c0_134, %c0_135], %255 {strides = array<i32>} : memref<4x10x16xbf16, #tpu.memory_space<vmem>>, vector<1x10x16xbf16>,
    %c0_136 = arith.constant 0 : index
    %c0_137 = arith.constant 0 : index
    %c0_138 = arith.constant 0 : index
    %256 = vector.load %arg29[%c0_136, %c0_137, %c0_138] : memref<4x8x8xbf16, #tpu.memory_space<vmem>>, vector<1x8x8xbf16>
    %257 = vector.shape_cast %256 : vector<1x8x8xbf16> to vector<8x8xbf16>
    %c0_139 = arith.constant 0 : index
    %c0_140 = arith.constant 0 : index
    %c0_141 = arith.constant 0 : index
    %258 = vector.load %arg30[%c0_139, %c0_140, %c0_141] : memref<4x10x16xbf16, #tpu.memory_space<vmem>>, vector<1x10x16xbf16>
    %259 = vector.shape_cast %258 : vector<1x10x16xbf16> to vector<10x16xbf16>
    %260 = vector.extract_strided_slice %259 {offsets = [0, 0], sizes = [10, 8], strides = [1, 1]} : vector<10x16xbf16> to vector<10x8xbf16>
    %261 = vector.extract_strided_slice %259 {offsets = [0, 8], sizes = [10, 8], strides = [1, 1]} : vector<10x16xbf16> to vector<10x8xbf16>
    %262 = tpu.transpose %260, [1, 0] : vector<10x8xbf16> -> vector<8x10xbf16>
    %cst_142 = arith.constant dense<0.000000e+00> : vector<8x10xf32>
    %263 = tpu.matmul %257, %262, %cst_142 {dimension_numbers = #tpu.dot_dimension_numbers<[1], [0], [0], [1], [0, 0, 1, 1], [], []>} : vector<8x8xbf16>, vector<8x10xbf16>, vector<8x10xf32> -> vector<8x10xf32>
    %cst_143 = arith.constant 0.353553385 : f32
    %264 = vector.broadcast %cst_143 : f32 to vector<8x10xf32>
    %265 = arith.mulf %263, %264 : vector<8x10xf32>
    %266 = vector.broadcast %15 : vector<1x10xf32> to vector<8x10xf32>
    %267 = arith.addf %265, %266 : vector<8x10xf32>
    %cst_144 = arith.constant dense<0xFF800000> : vector<8xf32>
    %268 = vector.multi_reduction <maximumf>, %267, %cst_144 [1] : vector<8x10xf32> to vector<8xf32>
    %269 = vector.shape_cast %268 : vector<8xf32> to vector<8x1xf32>
    %270 = vector.broadcast %269 : vector<8x1xf32> to vector<8x10xf32>
    %271 = arith.subf %267, %270 : vector<8x10xf32>
    %272 = math.exp %271 : vector<8x10xf32>
    %cst_145 = arith.constant dense<0.000000e+00> : vector<8xf32>
    %273 = vector.multi_reduction <add>, %272, %cst_145 [1] : vector<8x10xf32> to vector<8xf32>
    %274 = vector.shape_cast %273 : vector<8xf32> to vector<8x1xf32>
    %275 = tpu.reciprocal %274 {approx = true} : vector<8x1xf32> -> vector<8x1xf32>
    %276 = vector.broadcast %275 : vector<8x1xf32> to vector<8x10xf32>
    %277 = arith.mulf %272, %276 : vector<8x10xf32>
    %278 = arith.truncf %277 : vector<8x10xf32> to vector<8x10xbf16>
    %cst_146 = arith.constant dense<0.000000e+00> : vector<8x8xf32>
    %279 = tpu.matmul %278, %261, %cst_146 {dimension_numbers = #tpu.dot_dimension_numbers<[1], [0], [0], [1], [0, 0, 1, 1], [], []>} : vector<8x10xbf16>, vector<10x8xbf16>, vector<8x8xf32> -> vector<8x8xf32>
    %280 = arith.truncf %279 : vector<8x8xf32> to vector<8x8xbf16>
    %c0_147 = arith.constant 0 : index
    %c0_148 = arith.constant 0 : index
    %281 = vector.load %arg31[%c0_147, %c0_148] : memref<8x32xbf16, #tpu.memory_space<vmem>>, vector<8x8xbf16>
    tpu.vector_store %arg31[%c0_147, %c0_148], %280 {strides = array<i32>} : memref<8x32xbf16, #tpu.memory_space<vmem>>, vector<8x8xbf16>,
    %c1_149 = arith.constant 1 : index
    %c0_150 = arith.constant 0 : index
    %c0_151 = arith.constant 0 : index
    %282 = vector.load %arg29[%c1_149, %c0_150, %c0_151] : memref<4x8x8xbf16, #tpu.memory_space<vmem>>, vector<1x8x8xbf16>
    %283 = vector.shape_cast %282 : vector<1x8x8xbf16> to vector<8x8xbf16>
    %c1_152 = arith.constant 1 : index
    %c0_153 = arith.constant 0 : index
    %c0_154 = arith.constant 0 : index
    %284 = vector.load %arg30[%c1_152, %c0_153, %c0_154] : memref<4x10x16xbf16, #tpu.memory_space<vmem>>, vector<1x10x16xbf16>
    %285 = vector.shape_cast %284 : vector<1x10x16xbf16> to vector<10x16xbf16>
    %286 = vector.extract_strided_slice %285 {offsets = [0, 0], sizes = [10, 8], strides = [1, 1]} : vector<10x16xbf16> to vector<10x8xbf16>
    %287 = vector.extract_strided_slice %285 {offsets = [0, 8], sizes = [10, 8], strides = [1, 1]} : vector<10x16xbf16> to vector<10x8xbf16>
    %288 = tpu.transpose %286, [1, 0] : vector<10x8xbf16> -> vector<8x10xbf16>
    %cst_155 = arith.constant dense<0.000000e+00> : vector<8x10xf32>
    %289 = tpu.matmul %283, %288, %cst_155 {dimension_numbers = #tpu.dot_dimension_numbers<[1], [0], [0], [1], [0, 0, 1, 1], [], []>} : vector<8x8xbf16>, vector<8x10xbf16>, vector<8x10xf32> -> vector<8x10xf32>
    %cst_156 = arith.constant 0.353553385 : f32
    %290 = vector.broadcast %cst_156 : f32 to vector<8x10xf32>
    %291 = arith.mulf %289, %290 : vector<8x10xf32>
    %292 = vector.broadcast %15 : vector<1x10xf32> to vector<8x10xf32>
    %293 = arith.addf %291, %292 : vector<8x10xf32>
    %cst_157 = arith.constant dense<0xFF800000> : vector<8xf32>
    %294 = vector.multi_reduction <maximumf>, %293, %cst_157 [1] : vector<8x10xf32> to vector<8xf32>
    %295 = vector.shape_cast %294 : vector<8xf32> to vector<8x1xf32>
    %296 = vector.broadcast %295 : vector<8x1xf32> to vector<8x10xf32>
    %297 = arith.subf %293, %296 : vector<8x10xf32>
    %298 = math.exp %297 : vector<8x10xf32>
    %cst_158 = arith.constant dense<0.000000e+00> : vector<8xf32>
    %299 = vector.multi_reduction <add>, %298, %cst_158 [1] : vector<8x10xf32> to vector<8xf32>
    %300 = vector.shape_cast %299 : vector<8xf32> to vector<8x1xf32>
    %301 = tpu.reciprocal %300 {approx = true} : vector<8x1xf32> -> vector<8x1xf32>
    %302 = vector.broadcast %301 : vector<8x1xf32> to vector<8x10xf32>
    %303 = arith.mulf %298, %302 : vector<8x10xf32>
    %304 = arith.truncf %303 : vector<8x10xf32> to vector<8x10xbf16>
    %cst_159 = arith.constant dense<0.000000e+00> : vector<8x8xf32>
    %305 = tpu.matmul %304, %287, %cst_159 {dimension_numbers = #tpu.dot_dimension_numbers<[1], [0], [0], [1], [0, 0, 1, 1], [], []>} : vector<8x10xbf16>, vector<10x8xbf16>, vector<8x8xf32> -> vector<8x8xf32>
    %306 = arith.truncf %305 : vector<8x8xf32> to vector<8x8xbf16>
    %c0_160 = arith.constant 0 : index
    %c8_161 = arith.constant 8 : index
    %307 = vector.load %arg31[%c0_160, %c8_161] : memref<8x32xbf16, #tpu.memory_space<vmem>>, vector<8x8xbf16>
    tpu.vector_store %arg31[%c0_160, %c8_161], %306 {strides = array<i32>} : memref<8x32xbf16, #tpu.memory_space<vmem>>, vector<8x8xbf16>,
    %308 = arith.addf %277, %303 : vector<8x10xf32>
    %c2_162 = arith.constant 2 : index
    %c0_163 = arith.constant 0 : index
    %c0_164 = arith.constant 0 : index
    %309 = vector.load %arg29[%c2_162, %c0_163, %c0_164] : memref<4x8x8xbf16, #tpu.memory_space<vmem>>, vector<1x8x8xbf16>
    %310 = vector.shape_cast %309 : vector<1x8x8xbf16> to vector<8x8xbf16>
    %c2_165 = arith.constant 2 : index
    %c0_166 = arith.constant 0 : index
    %c0_167 = arith.constant 0 : index
    %311 = vector.load %arg30[%c2_165, %c0_166, %c0_167] : memref<4x10x16xbf16, #tpu.memory_space<vmem>>, vector<1x10x16xbf16>
    %312 = vector.shape_cast %311 : vector<1x10x16xbf16> to vector<10x16xbf16>
    %313 = vector.extract_strided_slice %312 {offsets = [0, 0], sizes = [10, 8], strides = [1, 1]} : vector<10x16xbf16> to vector<10x8xbf16>
    %314 = vector.extract_strided_slice %312 {offsets = [0, 8], sizes = [10, 8], strides = [1, 1]} : vector<10x16xbf16> to vector<10x8xbf16>
    %315 = tpu.transpose %313, [1, 0] : vector<10x8xbf16> -> vector<8x10xbf16>
    %cst_168 = arith.constant dense<0.000000e+00> : vector<8x10xf32>
    %316 = tpu.matmul %310, %315, %cst_168 {dimension_numbers = #tpu.dot_dimension_numbers<[1], [0], [0], [1], [0, 0, 1, 1], [], []>} : vector<8x8xbf16>, vector<8x10xbf16>, vector<8x10xf32> -> vector<8x10xf32>
    %cst_169 = arith.constant 0.353553385 : f32
    %317 = vector.broadcast %cst_169 : f32 to vector<8x10xf32>
    %318 = arith.mulf %316, %317 : vector<8x10xf32>
    %319 = vector.broadcast %15 : vector<1x10xf32> to vector<8x10xf32>
    %320 = arith.addf %318, %319 : vector<8x10xf32>
    %cst_170 = arith.constant dense<0xFF800000> : vector<8xf32>
    %321 = vector.multi_reduction <maximumf>, %320, %cst_170 [1] : vector<8x10xf32> to vector<8xf32>
    %322 = vector.shape_cast %321 : vector<8xf32> to vector<8x1xf32>
    %323 = vector.broadcast %322 : vector<8x1xf32> to vector<8x10xf32>
    %324 = arith.subf %320, %323 : vector<8x10xf32>
    %325 = math.exp %324 : vector<8x10xf32>
    %cst_171 = arith.constant dense<0.000000e+00> : vector<8xf32>
    %326 = vector.multi_reduction <add>, %325, %cst_171 [1] : vector<8x10xf32> to vector<8xf32>
    %327 = vector.shape_cast %326 : vector<8xf32> to vector<8x1xf32>
    %328 = tpu.reciprocal %327 {approx = true} : vector<8x1xf32> -> vector<8x1xf32>
    %329 = vector.broadcast %328 : vector<8x1xf32> to vector<8x10xf32>
    %330 = arith.mulf %325, %329 : vector<8x10xf32>
    %331 = arith.truncf %330 : vector<8x10xf32> to vector<8x10xbf16>
    %cst_172 = arith.constant dense<0.000000e+00> : vector<8x8xf32>
    %332 = tpu.matmul %331, %314, %cst_172 {dimension_numbers = #tpu.dot_dimension_numbers<[1], [0], [0], [1], [0, 0, 1, 1], [], []>} : vector<8x10xbf16>, vector<10x8xbf16>, vector<8x8xf32> -> vector<8x8xf32>
    %333 = arith.truncf %332 : vector<8x8xf32> to vector<8x8xbf16>
    %c0_173 = arith.constant 0 : index
    %c16_174 = arith.constant 16 : index
    %334 = vector.load %arg31[%c0_173, %c16_174] : memref<8x32xbf16, #tpu.memory_space<vmem>>, vector<8x8xbf16>
    tpu.vector_store %arg31[%c0_173, %c16_174], %333 {strides = array<i32>} : memref<8x32xbf16, #tpu.memory_space<vmem>>, vector<8x8xbf16>,
    %335 = arith.addf %308, %330 : vector<8x10xf32>
    %c3_175 = arith.constant 3 : index
    %c0_176 = arith.constant 0 : index
    %c0_177 = arith.constant 0 : index
    %336 = vector.load %arg29[%c3_175, %c0_176, %c0_177] : memref<4x8x8xbf16, #tpu.memory_space<vmem>>, vector<1x8x8xbf16>
    %337 = vector.shape_cast %336 : vector<1x8x8xbf16> to vector<8x8xbf16>
    %c3_178 = arith.constant 3 : index
    %c0_179 = arith.constant 0 : index
    %c0_180 = arith.constant 0 : index
    %338 = vector.load %arg30[%c3_178, %c0_179, %c0_180] : memref<4x10x16xbf16, #tpu.memory_space<vmem>>, vector<1x10x16xbf16>
    %339 = vector.shape_cast %338 : vector<1x10x16xbf16> to vector<10x16xbf16>
    %340 = vector.extract_strided_slice %339 {offsets = [0, 0], sizes = [10, 8], strides = [1, 1]} : vector<10x16xbf16> to vector<10x8xbf16>
    %341 = vector.extract_strided_slice %339 {offsets = [0, 8], sizes = [10, 8], strides = [1, 1]} : vector<10x16xbf16> to vector<10x8xbf16>
    %342 = tpu.transpose %340, [1, 0] : vector<10x8xbf16> -> vector<8x10xbf16>
    %cst_181 = arith.constant dense<0.000000e+00> : vector<8x10xf32>
    %343 = tpu.matmul %337, %342, %cst_181 {dimension_numbers = #tpu.dot_dimension_numbers<[1], [0], [0], [1], [0, 0, 1, 1], [], []>} : vector<8x8xbf16>, vector<8x10xbf16>, vector<8x10xf32> -> vector<8x10xf32>
    %cst_182 = arith.constant 0.353553385 : f32
    %344 = vector.broadcast %cst_182 : f32 to vector<8x10xf32>
    %345 = arith.mulf %343, %344 : vector<8x10xf32>
    %346 = vector.broadcast %15 : vector<1x10xf32> to vector<8x10xf32>
    %347 = arith.addf %345, %346 : vector<8x10xf32>
    %cst_183 = arith.constant dense<0xFF800000> : vector<8xf32>
    %348 = vector.multi_reduction <maximumf>, %347, %cst_183 [1] : vector<8x10xf32> to vector<8xf32>
    %349 = vector.shape_cast %348 : vector<8xf32> to vector<8x1xf32>
    %350 = vector.broadcast %349 : vector<8x1xf32> to vector<8x10xf32>
    %351 = arith.subf %347, %350 : vector<8x10xf32>
    %352 = math.exp %351 : vector<8x10xf32>
    %cst_184 = arith.constant dense<0.000000e+00> : vector<8xf32>
    %353 = vector.multi_reduction <add>, %352, %cst_184 [1] : vector<8x10xf32> to vector<8xf32>
    %354 = vector.shape_cast %353 : vector<8xf32> to vector<8x1xf32>
    %355 = tpu.reciprocal %354 {approx = true} : vector<8x1xf32> -> vector<8x1xf32>
    %356 = vector.broadcast %355 : vector<8x1xf32> to vector<8x10xf32>
    %357 = arith.mulf %352, %356 : vector<8x10xf32>
    %358 = arith.truncf %357 : vector<8x10xf32> to vector<8x10xbf16>
    %cst_185 = arith.constant dense<0.000000e+00> : vector<8x8xf32>
    %359 = tpu.matmul %358, %341, %cst_185 {dimension_numbers = #tpu.dot_dimension_numbers<[1], [0], [0], [1], [0, 0, 1, 1], [], []>} : vector<8x10xbf16>, vector<10x8xbf16>, vector<8x8xf32> -> vector<8x8xf32>
    %360 = arith.truncf %359 : vector<8x8xf32> to vector<8x8xbf16>
    %c0_186 = arith.constant 0 : index
    %c24_187 = arith.constant 24 : index
    %361 = vector.load %arg31[%c0_186, %c24_187] : memref<8x32xbf16, #tpu.memory_space<vmem>>, vector<8x8xbf16>
    tpu.vector_store %arg31[%c0_186, %c24_187], %360 {strides = array<i32>} : memref<8x32xbf16, #tpu.memory_space<vmem>>, vector<8x8xbf16>,
    %362 = arith.addf %335, %357 : vector<8x10xf32>
    %cst_188 = arith.constant 2.500000e-01 : f32
    %363 = vector.broadcast %cst_188 : f32 to vector<8x10xf32>
    %364 = arith.mulf %362, %363 : vector<8x10xf32>
    %c0_189 = arith.constant 0 : index
    %c0_190 = arith.constant 0 : index
    %365 = vector.load %arg31[%c0_189, %c0_190] : memref<8x32xbf16, #tpu.memory_space<vmem>>, vector<8x32xbf16>
    %c0_191 = arith.constant 0 : index
    %c0_192 = arith.constant 0 : index
    %c0_193 = arith.constant 0 : index
    %366 = vector.load %arg18[%c0_191, %c0_192, %c0_193] : memref<1x32x32xbf16, #tpu.memory_space<vmem>>, vector<1x32x32xbf16>
    %367 = vector.shape_cast %366 : vector<1x32x32xbf16> to vector<32x32xbf16>
    %cst_194 = arith.constant dense<0.000000e+00> : vector<8x32xf32>
    %368 = tpu.matmul %365, %367, %cst_194 {dimension_numbers = #tpu.dot_dimension_numbers<[1], [0], [0], [1], [0, 0, 1, 1], [], []>} : vector<8x32xbf16>, vector<32x32xbf16>, vector<8x32xf32> -> vector<8x32xf32>
    %369 = arith.addf %184, %368 : vector<8x32xf32>
    %c0_195 = arith.constant 0 : index
    %c0_196 = arith.constant 0 : index
    %c0_197 = arith.constant 0 : index
    %370 = vector.load %arg19[%c0_195, %c0_196, %c0_197] : memref<1x1x32xf32, #tpu.memory_space<vmem>>, vector<1x1x32xf32>
    %371 = vector.shape_cast %370 : vector<1x1x32xf32> to vector<1x32xf32>
    %c0_198 = arith.constant 0 : index
    %c0_199 = arith.constant 0 : index
    %c0_200 = arith.constant 0 : index
    %372 = vector.load %arg20[%c0_198, %c0_199, %c0_200] : memref<1x1x32xf32, #tpu.memory_space<vmem>>, vector<1x1x32xf32>
    %373 = vector.shape_cast %372 : vector<1x1x32xf32> to vector<1x32xf32>
    %cst_201 = arith.constant dense<0.000000e+00> : vector<8xf32>
    %374 = vector.multi_reduction <add>, %369, %cst_201 [1] : vector<8x32xf32> to vector<8xf32>
    %375 = vector.shape_cast %374 : vector<8xf32> to vector<8x1xf32>
    %cst_202 = arith.constant 3.200000e+01 : f32
    %376 = vector.broadcast %cst_202 : f32 to vector<8x1xf32>
    %377 = arith.divf %375, %376 : vector<8x1xf32>
    %378 = vector.broadcast %377 : vector<8x1xf32> to vector<8x32xf32>
    %379 = arith.subf %369, %378 : vector<8x32xf32>
    %380 = arith.mulf %379, %379 : vector<8x32xf32>
    %cst_203 = arith.constant dense<0.000000e+00> : vector<8xf32>
    %381 = vector.multi_reduction <add>, %380, %cst_203 [1] : vector<8x32xf32> to vector<8xf32>
    %382 = vector.shape_cast %381 : vector<8xf32> to vector<8x1xf32>
    %cst_204 = arith.constant 0.0322580636 : f32
    %383 = vector.broadcast %cst_204 : f32 to vector<8x1xf32>
    %384 = arith.mulf %382, %383 : vector<8x1xf32>
    %385 = vector.broadcast %371 : vector<1x32xf32> to vector<8x32xf32>
    %386 = arith.mulf %385, %379 : vector<8x32xf32>
    %387 = math.sqrt %384 : vector<8x1xf32>
    %cst_205 = arith.constant 9.99999997E-7 : f32
    %388 = vector.broadcast %cst_205 : f32 to vector<8x1xf32>
    %389 = arith.addf %387, %388 : vector<8x1xf32>
    %390 = vector.broadcast %389 : vector<8x1xf32> to vector<8x32xf32>
    %391 = arith.divf %386, %390 : vector<8x32xf32>
    %392 = vector.broadcast %373 : vector<1x32xf32> to vector<8x32xf32>
    %393 = arith.addf %391, %392 : vector<8x32xf32>
    %c2_i32_206 = arith.constant 2 : i32
    %394 = tpu.dynamic_rotate %393 by %c2_i32_206 dim 0 : vector<8x32xf32>, i32 -> vector<8x32xf32>
    %cst_207 = arith.constant 0.000000e+00 : f32
    %395 = vector.broadcast %cst_207 : f32 to vector<8x32xf32>
    %396 = vector.shape_cast %20 : vector<8x1xi1> to vector<8x1xi1>
    %397 = vector.broadcast %396 : vector<8x1xi1> to vector<8x32xi1>
    %398 = arith.select %397, %394, %395 : vector<8x32xi1>, vector<8x32xf32>
    %399 = arith.truncf %398 : vector<8x32xf32> to vector<8x32xbf16>
    %c0_208 = arith.constant 0 : index
    %c0_209 = arith.constant 0 : index
    %400 = vector.load %arg32[%c0_208, %c0_209] : memref<8x96xbf16, #tpu.memory_space<vmem>>, vector<8x32xbf16>
    tpu.vector_store %arg32[%c0_208, %c0_209], %399 {strides = array<i32>} : memref<8x96xbf16, #tpu.memory_space<vmem>>, vector<8x32xbf16>,
    %c1_i32_210 = arith.constant 1 : i32
    %401 = tpu.dynamic_rotate %393 by %c1_i32_210 dim 0 : vector<8x32xf32>, i32 -> vector<8x32xf32>
    %cst_211 = arith.constant 0.000000e+00 : f32
    %402 = vector.broadcast %cst_211 : f32 to vector<8x32xf32>
    %403 = vector.shape_cast %18 : vector<8x1xi1> to vector<8x1xi1>
    %404 = vector.broadcast %403 : vector<8x1xi1> to vector<8x32xi1>
    %405 = arith.select %404, %401, %402 : vector<8x32xi1>, vector<8x32xf32>
    %406 = arith.truncf %405 : vector<8x32xf32> to vector<8x32xbf16>
    %c0_212 = arith.constant 0 : index
    %c32 = arith.constant 32 : index
    %407 = vector.load %arg32[%c0_212, %c32] : memref<8x96xbf16, #tpu.memory_space<vmem>>, vector<8x32xbf16>
    tpu.vector_store %arg32[%c0_212, %c32], %406 {strides = array<i32>} : memref<8x96xbf16, #tpu.memory_space<vmem>>, vector<8x32xbf16>,
    %408 = arith.truncf %393 : vector<8x32xf32> to vector<8x32xbf16>
    %c0_213 = arith.constant 0 : index
    %c64 = arith.constant 64 : index
    %409 = vector.load %arg32[%c0_213, %c64] : memref<8x96xbf16, #tpu.memory_space<vmem>>, vector<8x32xbf16>
    tpu.vector_store %arg32[%c0_213, %c64], %408 {strides = array<i32>} : memref<8x96xbf16, #tpu.memory_space<vmem>>, vector<8x32xbf16>,
    %c0_214 = arith.constant 0 : index
    %c0_215 = arith.constant 0 : index
    %410 = vector.load %arg32[%c0_214, %c0_215] : memref<8x96xbf16, #tpu.memory_space<vmem>>, vector<8x96xbf16>
    %c0_216 = arith.constant 0 : index
    %c0_217 = arith.constant 0 : index
    %c0_218 = arith.constant 0 : index
    %411 = vector.load %arg21[%c0_216, %c0_217, %c0_218] : memref<1x96x64xbf16, #tpu.memory_space<vmem>>, vector<1x96x64xbf16>
    %412 = vector.shape_cast %411 : vector<1x96x64xbf16> to vector<96x64xbf16>
    %cst_219 = arith.constant dense<0.000000e+00> : vector<8x64xf32>
    %413 = tpu.matmul %410, %412, %cst_219 {dimension_numbers = #tpu.dot_dimension_numbers<[1], [0], [0], [1], [0, 0, 1, 1], [], []>} : vector<8x96xbf16>, vector<96x64xbf16>, vector<8x64xf32> -> vector<8x64xf32>
    %c0_220 = arith.constant 0 : index
    %c0_221 = arith.constant 0 : index
    %c0_222 = arith.constant 0 : index
    %414 = vector.load %arg22[%c0_220, %c0_221, %c0_222] : memref<1x1x64xf32, #tpu.memory_space<vmem>>, vector<1x1x64xf32>
    %415 = vector.shape_cast %414 : vector<1x1x64xf32> to vector<1x64xf32>
    %416 = vector.broadcast %415 : vector<1x64xf32> to vector<8x64xf32>
    %417 = arith.addf %413, %416 : vector<8x64xf32>
    %cst_223 = arith.constant 0.000000e+00 : f32
    %418 = vector.broadcast %cst_223 : f32 to vector<8x64xf32>
    %419 = arith.maximumf %417, %418 : vector<8x64xf32>
    %c2_i32_224 = arith.constant 2 : i32
    %420 = tpu.dynamic_rotate %419 by %c2_i32_224 dim 0 : vector<8x64xf32>, i32 -> vector<8x64xf32>
    %cst_225 = arith.constant 0.000000e+00 : f32
    %421 = vector.broadcast %cst_225 : f32 to vector<8x64xf32>
    %422 = vector.shape_cast %20 : vector<8x1xi1> to vector<8x1xi1>
    %423 = vector.broadcast %422 : vector<8x1xi1> to vector<8x64xi1>
    %424 = arith.select %423, %420, %421 : vector<8x64xi1>, vector<8x64xf32>
    %425 = arith.truncf %424 : vector<8x64xf32> to vector<8x64xbf16>
    %c0_226 = arith.constant 0 : index
    %c0_227 = arith.constant 0 : index
    %426 = vector.load %arg33[%c0_226, %c0_227] : memref<8x192xbf16, #tpu.memory_space<vmem>>, vector<8x64xbf16>
    tpu.vector_store %arg33[%c0_226, %c0_227], %425 {strides = array<i32>} : memref<8x192xbf16, #tpu.memory_space<vmem>>, vector<8x64xbf16>,
    %c1_i32_228 = arith.constant 1 : i32
    %427 = tpu.dynamic_rotate %419 by %c1_i32_228 dim 0 : vector<8x64xf32>, i32 -> vector<8x64xf32>
    %cst_229 = arith.constant 0.000000e+00 : f32
    %428 = vector.broadcast %cst_229 : f32 to vector<8x64xf32>
    %429 = vector.shape_cast %18 : vector<8x1xi1> to vector<8x1xi1>
    %430 = vector.broadcast %429 : vector<8x1xi1> to vector<8x64xi1>
    %431 = arith.select %430, %427, %428 : vector<8x64xi1>, vector<8x64xf32>
    %432 = arith.truncf %431 : vector<8x64xf32> to vector<8x64xbf16>
    %c0_230 = arith.constant 0 : index
    %c64_231 = arith.constant 64 : index
    %433 = vector.load %arg33[%c0_230, %c64_231] : memref<8x192xbf16, #tpu.memory_space<vmem>>, vector<8x64xbf16>
    tpu.vector_store %arg33[%c0_230, %c64_231], %432 {strides = array<i32>} : memref<8x192xbf16, #tpu.memory_space<vmem>>, vector<8x64xbf16>,
    %434 = arith.truncf %419 : vector<8x64xf32> to vector<8x64xbf16>
    %c0_232 = arith.constant 0 : index
    %c128 = arith.constant 128 : index
    %435 = vector.load %arg33[%c0_232, %c128] : memref<8x192xbf16, #tpu.memory_space<vmem>>, vector<8x64xbf16>
    tpu.vector_store %arg33[%c0_232, %c128], %434 {strides = array<i32>} : memref<8x192xbf16, #tpu.memory_space<vmem>>, vector<8x64xbf16>,
    %c0_233 = arith.constant 0 : index
    %c0_234 = arith.constant 0 : index
    %436 = vector.load %arg33[%c0_233, %c0_234] : memref<8x192xbf16, #tpu.memory_space<vmem>>, vector<8x192xbf16>
    %c0_235 = arith.constant 0 : index
    %c0_236 = arith.constant 0 : index
    %c0_237 = arith.constant 0 : index
    %437 = vector.load %arg23[%c0_235, %c0_236, %c0_237] : memref<1x192x32xbf16, #tpu.memory_space<vmem>>, vector<1x192x32xbf16>
    %438 = vector.shape_cast %437 : vector<1x192x32xbf16> to vector<192x32xbf16>
    %cst_238 = arith.constant dense<0.000000e+00> : vector<8x32xf32>
    %439 = tpu.matmul %436, %438, %cst_238 {dimension_numbers = #tpu.dot_dimension_numbers<[1], [0], [0], [1], [0, 0, 1, 1], [], []>} : vector<8x192xbf16>, vector<192x32xbf16>, vector<8x32xf32> -> vector<8x32xf32>
    %440 = arith.addf %369, %439 : vector<8x32xf32>
    %c0_239 = arith.constant 0 : index
    %c0_240 = arith.constant 0 : index
    %c0_241 = arith.constant 0 : index
    %441 = vector.load %arg24[%c0_239, %c0_240, %c0_241] : memref<1x1x32xf32, #tpu.memory_space<vmem>>, vector<1x1x32xf32>
    %442 = vector.shape_cast %441 : vector<1x1x32xf32> to vector<1x32xf32>
    %443 = vector.broadcast %442 : vector<1x32xf32> to vector<8x32xf32>
    %444 = arith.addf %440, %443 : vector<8x32xf32>
    %c0_242 = arith.constant 0 : index
    %c0_243 = arith.constant 0 : index
    %445 = vector.load %arg27[%c0_242, %c0_243] : memref<8x32xf32, #tpu.memory_space<vmem>>, vector<8x32xf32>
    tpu.vector_store %arg27[%c0_242, %c0_243], %444 {strides = array<i32>} : memref<8x32xf32, #tpu.memory_space<vmem>>, vector<8x32xf32>,
    %c1_i32_244 = arith.constant 1 : i32
    %446 = arith.cmpi eq, %arg1, %c1_i32_244 : i32
    %447 = arith.extui %446 : i1 to i32
    %c0_i32_245 = arith.constant 0 : i32
    %448 = arith.cmpi ne, %447, %c0_i32_245 : i32
    scf.if %448 {
      %c0_246 = arith.constant 0 : index
      %c0_247 = arith.constant 0 : index
      %449 = vector.load %arg8[%c0_246, %c0_247] : memref<1x32xf32, #tpu.memory_space<vmem>>, vector<1x32xf32>
      %c0_248 = arith.constant 0 : index
      %c0_249 = arith.constant 0 : index
      %450 = vector.load %arg9[%c0_248, %c0_249] : memref<1x32xf32, #tpu.memory_space<vmem>>, vector<1x32xf32>
      %cst_250 = arith.constant dense<0.000000e+00> : vector<8xf32>
      %451 = vector.multi_reduction <add>, %444, %cst_250 [1] : vector<8x32xf32> to vector<8xf32>
      %452 = vector.shape_cast %451 : vector<8xf32> to vector<8x1xf32>
      %cst_251 = arith.constant 3.200000e+01 : f32
      %453 = vector.broadcast %cst_251 : f32 to vector<8x1xf32>
      %454 = arith.divf %452, %453 : vector<8x1xf32>
      %455 = vector.broadcast %454 : vector<8x1xf32> to vector<8x32xf32>
      %456 = arith.subf %444, %455 : vector<8x32xf32>
      %457 = arith.mulf %456, %456 : vector<8x32xf32>
      %cst_252 = arith.constant dense<0.000000e+00> : vector<8xf32>
      %458 = vector.multi_reduction <add>, %457, %cst_252 [1] : vector<8x32xf32> to vector<8xf32>
      %459 = vector.shape_cast %458 : vector<8xf32> to vector<8x1xf32>
      %cst_253 = arith.constant 0.0322580636 : f32
      %460 = vector.broadcast %cst_253 : f32 to vector<8x1xf32>
      %461 = arith.mulf %459, %460 : vector<8x1xf32>
      %462 = vector.broadcast %449 : vector<1x32xf32> to vector<8x32xf32>
      %463 = arith.mulf %462, %456 : vector<8x32xf32>
      %464 = math.sqrt %461 : vector<8x1xf32>
      %cst_254 = arith.constant 9.99999997E-7 : f32
      %465 = vector.broadcast %cst_254 : f32 to vector<8x1xf32>
      %466 = arith.addf %464, %465 : vector<8x1xf32>
      %467 = vector.broadcast %466 : vector<8x1xf32> to vector<8x32xf32>
      %468 = arith.divf %463, %467 : vector<8x32xf32>
      %469 = vector.broadcast %450 : vector<1x32xf32> to vector<8x32xf32>
      %470 = arith.addf %468, %469 : vector<8x32xf32>
      %cst_255 = arith.constant 0.000000e+00 : f32
      %471 = vector.broadcast %cst_255 : f32 to vector<8x96xf32>
      %472 = tpu.concatenate %470, %471 in 1 : vector<8x32xf32>, vector<8x96xf32> -> vector<8x128xf32>
      %c0_256 = arith.constant 0 : index
      %c0_257 = arith.constant 0 : index
      %c0_258 = arith.constant 0 : index
      %473 = vector.load %arg25[%c0_256, %c0_257, %c0_258] : memref<1x8x128xf32, #tpu.memory_space<vmem>>, vector<1x8x128xf32>
      %474 = vector.shape_cast %473 : vector<1x8x128xf32> to vector<8x128xf32>
      %475 = vector.shape_cast %472 : vector<8x128xf32> to vector<1x8x128xf32>
      tpu.vector_store %arg25[%c0_256, %c0_257, %c0_258], %475 {strides = array<i32>} : memref<1x8x128xf32, #tpu.memory_space<vmem>>, vector<1x8x128xf32>,
      %cst_259 = arith.constant 0.000000e+00 : f32
      %476 = vector.broadcast %cst_259 : f32 to vector<8x118xf32>
      %477 = tpu.concatenate %364, %476 in 1 : vector<8x10xf32>, vector<8x118xf32> -> vector<8x128xf32>
      %c0_260 = arith.constant 0 : index
      %c0_261 = arith.constant 0 : index
      %c0_262 = arith.constant 0 : index
      %478 = vector.load %arg26[%c0_260, %c0_261, %c0_262] : memref<1x8x128xf32, #tpu.memory_space<vmem>>, vector<1x8x128xf32>
      %479 = vector.shape_cast %478 : vector<1x8x128xf32> to vector<8x128xf32>
      %480 = vector.shape_cast %477 : vector<8x128xf32> to vector<1x8x128xf32>
      tpu.vector_store %arg26[%c0_260, %c0_261, %c0_262], %480 {strides = array<i32>} : memref<1x8x128xf32, #tpu.memory_space<vmem>>, vector<1x8x128xf32>,
    } else {
    }
    return
  }
  func.func @transform_0(%arg0: i32, %arg1: i32) -> (i32, i32, i32) {
    %c0_i32 = arith.constant 0 : i32
    %c0_i32_0 = arith.constant 0 : i32
    %c0_i32_1 = arith.constant 0 : i32
    return %arg0, %c0_i32, %c0_i32_0 : i32, i32, i32
  }
  func.func @transform_1(%arg0: i32, %arg1: i32) -> (i32, i32, i32) {
    %c0_i32 = arith.constant 0 : i32
    %c0_i32_0 = arith.constant 0 : i32
    %c0_i32_1 = arith.constant 0 : i32
    return %arg0, %c0_i32, %c0_i32_0 : i32, i32, i32
  }
  func.func @transform_2(%arg0: i32, %arg1: i32) -> (i32, i32, i32) {
    %c0_i32 = arith.constant 0 : i32
    %c0_i32_0 = arith.constant 0 : i32
    %c0_i32_1 = arith.constant 0 : i32
    return %arg0, %c0_i32, %c0_i32_0 : i32, i32, i32
  }
  func.func @transform_3(%arg0: i32, %arg1: i32) -> (i32, i32, i32) {
    %c0_i32 = arith.constant 0 : i32
    %c0_i32_0 = arith.constant 0 : i32
    %c0_i32_1 = arith.constant 0 : i32
    return %arg0, %c0_i32, %c0_i32_0 : i32, i32, i32
  }
  func.func @transform_4(%arg0: i32, %arg1: i32) -> (i32, i32) {
    %c0_i32 = arith.constant 0 : i32
    %c0_i32_0 = arith.constant 0 : i32
    %c0_i32_1 = arith.constant 0 : i32
    return %c0_i32, %c0_i32_0 : i32, i32
  }
  func.func @transform_5(%arg0: i32, %arg1: i32) -> (i32, i32) {
    %c0_i32 = arith.constant 0 : i32
    %c0_i32_0 = arith.constant 0 : i32
    %c0_i32_1 = arith.constant 0 : i32
    return %c0_i32, %c0_i32_0 : i32, i32
  }
  func.func @transform_6(%arg0: i32, %arg1: i32) -> (i32, i32) {
    %c0_i32 = arith.constant 0 : i32
    %c0_i32_0 = arith.constant 0 : i32
    %c0_i32_1 = arith.constant 0 : i32
    return %c0_i32, %c0_i32_0 : i32, i32
  }
  func.func @transform_7(%arg0: i32, %arg1: i32) -> (i32, i32) {
    %c0_i32 = arith.constant 0 : i32
    %c0_i32_0 = arith.constant 0 : i32
    %c0_i32_1 = arith.constant 0 : i32
    return %c0_i32, %c0_i32_0 : i32, i32
  }
  func.func @transform_8(%arg0: i32, %arg1: i32) -> (i32, i32, i32) {
    %c0_i32 = arith.constant 0 : i32
    %c0_i32_0 = arith.constant 0 : i32
    %c0_i32_1 = arith.constant 0 : i32
    return %arg1, %c0_i32, %c0_i32_0 : i32, i32, i32
  }
  func.func @transform_9(%arg0: i32, %arg1: i32) -> (i32, i32, i32) {
    %c0_i32 = arith.constant 0 : i32
    %c0_i32_0 = arith.constant 0 : i32
    %c0_i32_1 = arith.constant 0 : i32
    return %arg1, %c0_i32, %c0_i32_0 : i32, i32, i32
  }
  func.func @transform_10(%arg0: i32, %arg1: i32) -> (i32, i32, i32) {
    %c0_i32 = arith.constant 0 : i32
    %c0_i32_0 = arith.constant 0 : i32
    %c0_i32_1 = arith.constant 0 : i32
    return %arg1, %c0_i32, %c0_i32_0 : i32, i32, i32
  }
  func.func @transform_11(%arg0: i32, %arg1: i32) -> (i32, i32, i32) {
    %c0_i32 = arith.constant 0 : i32
    %c0_i32_0 = arith.constant 0 : i32
    %c0_i32_1 = arith.constant 0 : i32
    return %arg1, %c0_i32, %c0_i32_0 : i32, i32, i32
  }
  func.func @transform_12(%arg0: i32, %arg1: i32) -> (i32, i32, i32) {
    %c0_i32 = arith.constant 0 : i32
    %c0_i32_0 = arith.constant 0 : i32
    %c0_i32_1 = arith.constant 0 : i32
    return %arg1, %c0_i32, %c0_i32_0 : i32, i32, i32
  }
  func.func @transform_13(%arg0: i32, %arg1: i32) -> (i32, i32, i32) {
    %c0_i32 = arith.constant 0 : i32
    %c0_i32_0 = arith.constant 0 : i32
    %c0_i32_1 = arith.constant 0 : i32
    return %arg1, %c0_i32, %c0_i32_0 : i32, i32, i32
  }
  func.func @transform_14(%arg0: i32, %arg1: i32) -> (i32, i32, i32) {
    %c0_i32 = arith.constant 0 : i32
    %c0_i32_0 = arith.constant 0 : i32
    %c0_i32_1 = arith.constant 0 : i32
    return %arg1, %c0_i32, %c0_i32_0 : i32, i32, i32
  }
  func.func @transform_15(%arg0: i32, %arg1: i32) -> (i32, i32, i32) {
    %c0_i32 = arith.constant 0 : i32
    %c0_i32_0 = arith.constant 0 : i32
    %c0_i32_1 = arith.constant 0 : i32
    return %arg1, %c0_i32, %c0_i32_0 : i32, i32, i32
  }
  func.func @transform_16(%arg0: i32, %arg1: i32) -> (i32, i32, i32) {
    %c0_i32 = arith.constant 0 : i32
    %c0_i32_0 = arith.constant 0 : i32
    %c0_i32_1 = arith.constant 0 : i32
    return %arg1, %c0_i32, %c0_i32_0 : i32, i32, i32
  }
  func.func @transform_17(%arg0: i32, %arg1: i32) -> (i32, i32, i32) {
    %c0_i32 = arith.constant 0 : i32
    %c0_i32_0 = arith.constant 0 : i32
    %c0_i32_1 = arith.constant 0 : i32
    return %arg1, %c0_i32, %c0_i32_0 : i32, i32, i32
  }
  func.func @transform_18(%arg0: i32, %arg1: i32) -> (i32, i32, i32) {
    %c0_i32 = arith.constant 0 : i32
    %c0_i32_0 = arith.constant 0 : i32
    %c0_i32_1 = arith.constant 0 : i32
    return %arg1, %c0_i32, %c0_i32_0 : i32, i32, i32
  }
  func.func @transform_19(%arg0: i32, %arg1: i32) -> (i32, i32, i32) {
    %c0_i32 = arith.constant 0 : i32
    %c0_i32_0 = arith.constant 0 : i32
    %c0_i32_1 = arith.constant 0 : i32
    return %arg1, %c0_i32, %c0_i32_0 : i32, i32, i32
  }
  func.func @transform_20(%arg0: i32, %arg1: i32) -> (i32, i32, i32) {
    %c0_i32 = arith.constant 0 : i32
    %c0_i32_0 = arith.constant 0 : i32
    %c0_i32_1 = arith.constant 0 : i32
    return %arg1, %c0_i32, %c0_i32_0 : i32, i32, i32
  }
  func.func @transform_21(%arg0: i32, %arg1: i32) -> (i32, i32, i32) {
    %c0_i32 = arith.constant 0 : i32
    %c0_i32_0 = arith.constant 0 : i32
    %c0_i32_1 = arith.constant 0 : i32
    return %arg1, %c0_i32, %c0_i32_0 : i32, i32, i32
  }
  func.func @transform_22(%arg0: i32, %arg1: i32) -> (i32, i32, i32) {
    %c0_i32 = arith.constant 0 : i32
    %c0_i32_0 = arith.constant 0 : i32
    %c0_i32_1 = arith.constant 0 : i32
    return %arg1, %c0_i32, %c0_i32_0 : i32, i32, i32
  }
  func.func @transform_23(%arg0: i32, %arg1: i32) -> (i32, i32, i32) {
    %c0_i32 = arith.constant 0 : i32
    %c0_i32_0 = arith.constant 0 : i32
    %c0_i32_1 = arith.constant 0 : i32
    return %arg0, %c0_i32, %c0_i32_0 : i32, i32, i32
  }
  func.func @transform_24(%arg0: i32, %arg1: i32) -> (i32, i32, i32) {
    %c0_i32 = arith.constant 0 : i32
    %c0_i32_0 = arith.constant 0 : i32
    %c0_i32_1 = arith.constant 0 : i32
    return %arg0, %c0_i32, %c0_i32_0 : i32, i32, i32
  }
}

</mosaic_0001>

<bundles_post_ra>
// kernel: tpu_custom_call.1
= control target key start
LH: loop header
LB: loop body
LE: loop exit
PB: predicated region body
PF: predicated region fallthrough
CT: control target
= control target key end

     0   :  { %s4711_s0 = inlined_call_operand.vmem [shape: f32[2,8,32], index: 0, kind: input, shape index: {}]   ;;  %s4712_s1 = inlined_call_operand.vmem [shape: f32[2,10,32], index: 1, kind: input, shape index: {}]   ;;  %s4713_s2 = inlined_call_operand.vmem [shape: f32[2,1,10], index: 2, kind: input, shape index: {}]   ;;  %s4714_s3 = inlined_call_operand.vmem [shape: f32[2,1,8], index: 3, kind: input, shape index: {}]   ;;  %s4715_s4 = inlined_call_operand.vmem [shape: f32[8,32], index: 4, kind: input, shape index: {}]   ;;  %s4716_s5 = inlined_call_operand.vmem [shape: bf16[32,32], index: 5, kind: input, shape index: {}]   ;;  %s4717_s6 = inlined_call_operand.vmem [shape: f32[1,32], index: 6, kind: input, shape index: {}]   ;;  %s4718_s7 = inlined_call_operand.vmem [shape: f32[1,32], index: 7, kind: input, shape index: {}]   ;;  %s4719_s8 = inlined_call_operand.vmem [shape: f32[2,1,32], index: 8, kind: input, shape index: {}]   ;;  %s4720_s9 = inlined_call_operand.vmem [shape: f32[2,1,32], index: 9, kind: input, shape index: {}]   ;;  %s4721_s10 = inlined_call_operand.vmem [shape: bf16[2,32,96], index: 10, kind: input, shape index: {}]   ;;  %s4722_s11 = inlined_call_operand.vmem [shape: bf16[2,32,32], index: 11, kind: input, shape index: {}]   ;;  %s4723_s12 = inlined_call_operand.vmem [shape: f32[2,1,32], index: 12, kind: input, shape index: {}]   ;;  %s4724_s13 = inlined_call_operand.vmem [shape: f32[2,1,32], index: 13, kind: input, shape index: {}]   ;;  %s4725_s14 = inlined_call_operand.vmem [shape: bf16[2,32,32], index: 14, kind: input, shape index: {}]   ;;  %s4726_s15 = inlined_call_operand.vmem [shape: bf16[2,32,64], index: 15, kind: input, shape index: {}]   ;;  %s4727_s16 = inlined_call_operand.vmem [shape: bf16[2,32,32], index: 16, kind: input, shape index: {}]   ;;  %s4728_s17 = inlined_call_operand.vmem [shape: f32[2,1,32], index: 17, kind: input, shape index: {}]   ;;  %s4729_s18 = inlined_call_operand.vmem [shape: f32[2,1,32], index: 18, kind: input, shape index: {}]   ;;  %s4730_s19 = inlined_call_operand.vmem [shape: bf16[2,96,64], index: 19, kind: input, shape index: {}]   ;;  %s4731_s20 = inlined_call_operand.vmem [shape: f32[2,1,64], index: 20, kind: input, shape index: {}]   ;;  %s4732_s21 = inlined_call_operand.vmem [shape: bf16[2,192,32], index: 21, kind: input, shape index: {}]   ;;  %s4733_s22 = inlined_call_operand.vmem [shape: f32[2,1,32], index: 22, kind: input, shape index: {}]   ;;  %s4734_s23 = inlined_call_operand.hbm [shape: f32[2,8,128], index: 23, kind: output, shape index: {0}]   ;;  %s4735_s24 = inlined_call_operand.hbm [shape: f32[2,8,128], index: 24, kind: output, shape index: {1}]  }
   0x1   :  { %4753 = sst [smem:[#allocation29_spill]] %s4711_s0 }
   0x2   :  { %4754 = sst [smem:[#allocation30_spill]] %s4712_s1 }
   0x3   :  { %4755 = sst [smem:[#allocation31_spill]] %s4713_s2 }
   0x4   :  { %4756 = sst [smem:[#allocation32_spill]] %s4714_s3 }
   0x5   :  { %4757 = sst [smem:[#allocation33_spill]] %s4715_s4 }
   0x6   :  { %4758 = sst [smem:[#allocation34_spill]] %s4716_s5 }
   0x7   :  { %4759 = sst [smem:[#allocation35_spill]] %s4717_s6 }
   0x8   :  { %4760 = sst [smem:[#allocation36_spill]] %s4718_s7 }
   0x9   :  { %4761 = sst [smem:[#allocation37_spill]] %s4719_s8 }
   0xa   :  { %4762 = sst [smem:[#allocation38_spill]] %s4721_s10 }
   0xb   :  { %4763 = sst [smem:[#allocation39_spill]] %s4722_s11 }
   0xc   :  { %4764 = sst [smem:[#allocation40_spill]] %s4725_s14 }
   0xd   :  { %4765 = sst [smem:[#allocation41_spill]] %s4726_s15 }
   0xe   :  { %4766 = sst [smem:[#allocation42_spill]] %s4727_s16 }
   0xf   :  { %4767 = sst [smem:[#allocation43_spill]] %s4730_s19 }
  0x10   :  { %4768 = sst [smem:[#allocation44_spill]] %s4731_s20 }
  0x11   :  { %4769 = sst [smem:[#allocation45_spill]] %s4732_s21 }
  0x12   :  { %4770 = sst [smem:[#allocation46_spill]] %s4733_s22 }
  0x13   :  { %4771 = sst [smem:[#allocation47_spill]] %s4734_s23 }
  0x14   :  { %4772 = sst [smem:[#allocation48_spill]] %s4735_s24 }
  0x15   :  { %30 = vsyncpa [#allocation10], 0 }
  0x16   :  { %32 = vsyncpa [#allocation10 + $0x1], 0 }
  0x17   :  { %33 = vsyncpa [#allocation12], 0 }
  0x18   :  { %35 = vsyncpa [#allocation12 + $0x1], 0  ;;  %s4101_s5 = smov 0   ;;  %s4103_s26 = smov 0  }
  0x19   :  { %s4105_s27 = smov 0   ;;  %s4107_s28 = smov 0  }
  0x1a   :  { %s4109_s6 = smov 0   ;;  %s4111_s2 = smov 0  }
  0x1b   :  { %s4113_s29 = smov 0   ;;  %s4115_s0 = smov 0  }
  0x1c LB: > { %4773 = sst [smem:[#allocation15_spill]] %s3928_s5  ;;  %s3299_s7 = sadd.s32 4294967295, %s3956_s0   ;;  %s3956_s0 = sphi %s4115_s0, %s41_s0   ;;  %s3952_s29 = sphi %s4113_s29, %s4837_s29   ;;  %s3948_s2 = sphi %s4111_s2, %s4836_s2   ;;  %s3944_s6 = sphi %s4109_s6, %s4835_s6   ;;  %s3940_s28 = sphi %s4107_s28, %s4834_s28   ;;  %s3936_s27 = sphi %s4105_s27, %s4833_s27   ;;  %s3932_s26 = sphi %s4103_s26, %s4832_s26   ;;  %s3928_s5 = sphi %s4101_s5, %s4831_s5  }
  0x1d   : > { %4774 = sst [smem:[#allocation16_spill]] %s3932_s26  ;;  %s3300_s30 = sadd.s32 4294967294, %s3956_s0  }
  0x1e   : > { %4775 = sst [smem:[#allocation17_spill]] %s3936_s27  ;;  %s50_s3 = sadd.s32 1, %s3948_s2 }
  0x1f   : > { %4776 = sst [smem:[#allocation18_spill]] %s3940_s28  ;;  %p51_p0 = scmp.ge.s32.totalorder %s50_s3, 2 }
  0x20   : > { %4777 = sst [smem:[#allocation19_spill]] %s3944_s6  ;;  %s53_s25 = sadd.s32 1, %s3952_s29 }
  0x21   : > { %4778 = sst [smem:[#allocation20_spill]] %s3948_s2  ;;  %p648_p1 = scmp.ne.s32.totalorder %s3936_s27, %s3932_s26 }
  0x22   : > { %4779 = sst [smem:[#allocation21_spill]] %s3952_s29  ;;  %p649_p2 = scmp.eq.s32.totalorder %s3299_s7, 3 }
  0x23   : > { %4780 = sst [smem:[#allocation22_spill]] %s3956_s0  ;;  %s4839_s3 = smov (%p51_p0, %s50_s3), 0 }
  0x24   : > { %4781 = sst [smem:[#allocation23_spill]] %s4839_s3  ;;  %s4841_s25 = smov (!%p51_p0, %s53_s25), %s3952_s29 }
  0x25   : > { %p4150_p3 = por %p649_p2, %p648_p1  ;;  %p654_p4 = scmp.ne.s32.totalorder %s3932_s26, %s3928_s5 }
  0x26   : > { %p55_p5 = scmp.ge.s32.totalorder %s4841_s25, 2  ;;  %p655_p6 = scmp.eq.s32.totalorder %s3300_s30, 3 }
  0x27   : > { %s4782_s8 = scalar_select %p4150_p3, 1, 0 }
  0x28   : > { %p3303_p7 = scmp.ge.s32.totalorder %s3956_s0, 1  ;;  %p842_p8 = scmp.lt.s32.totalorder %s3956_s0, 5 }
  0x29   : > { %4783 = sst [smem:[#allocation24_spill]] %s4782_s8  ;;  %s4843_s25 = smov (%p55_p5, %s4841_s25), 0 }
  0x2a   : > { %4784 = sst [smem:[#allocation25_spill]] %s4843_s25  ;;  %p4160_p9 = por %p655_p6, %p654_p4 }
  0x2b   : > { %p843_p10 = pnand %p3303_p7, %p842_p8  ;;  %s635_s1 = ssub.s32 %s3952_s29, %s4843_s25 }
  0x2c   : > { %s4785_s4 = scalar_select %p4160_p9, 1, 0 }
  0x2d   : > { %s638_s7 = sadd.s32 1, %s3936_s27  ;;  %p636_p11 = scmp.eq.s32.totalorder %s635_s1, 0 }
  0x2e   : > { %4786 = sst [smem:[#allocation26_spill]] %s4785_s4  ;;  %846 = sbr.rel (%p843_p10) target bundleno = 5598 (0x15de), region = 112 }
  0x2f   : > { %s4168_s3 = scalar_select %p636_p11, %s3936_s27, %s638_s7  }
  0x31   : > { %4787 = sst [smem:[#allocation27_spill]] %s4168_s3 }
  0x33   : > { %s4171_s30 = sand.u32 1, %s3932_s26   ;;  %p982_p12 = scmp.lt.s32.totalorder %s3944_s6, 1  ;;  %v1057_v0 = vlaneseq  ;;  %v3958_v7 = vmov 0   ;;  %v3959_v10 = vmov 0.0  }
  0x34   : > { %p997_p13 = scmp.lt.s32.totalorder %s3940_s28, 1  ;;  %s4788_s26 = sld [smem:[#allocation29_spill]] }
  0x35   : > { %v4176_v1 = vshrl.u32 %v1057_v0, 7  ;;  %s983_s25 = scalar_select %p982_p12, %s3944_s6, 1  ;;  %v1058_v2 = vand.u32 127, %v1057_v0 }
  0x36   : > { %s4180_s29 = scalar_select %p997_p13, %s3940_s28, 1 }
  0x37   : > { %vm1074_vm0 = vcmp.ge.s32.totalorder %v4176_v1, 1  ;;  %vm1075_vm1 = vcmp.ge.s32.totalorder %v4176_v1, 2  ;;  %s3306_s1 = sshll.u32 %s983_s25, 3  ;;  %s3416_s7 = sshll.u32 %s983_s25, 4  ;;  %v1067_v3 = vsub.s32 0, %v4176_v1  ;;  %vm1061_vm3 = vcmp.gt.s32.totalorder %v1058_v2, %v4176_v1 }
  0x38   : > { %s4790_s0 = sld [smem:[#allocation30_spill]]  ;;  %s3417_s23 = sshll.u32 %s4180_s29, 4 }
  0x39   : > { %s4791_s6 = sld [smem:[#allocation31_spill]] }
  0x3a   : > { %s4187_s2 = scalar_lea.vmem %s4788_s26, %s3306_s1  ;;  %s4792_s22 = sld [smem:[#allocation32_spill]] }
  0x3b   : > { %4789 = sst [smem:[#allocation28_spill]] %s4187_s2 }
  0x3c   : > { %s4794_s10 = sld [smem:[#allocation38_spill]] }
  0x3d   : > { %s4795_s11 = sld [smem:[#allocation39_spill]] }
  0x3e   : > { %s4192_s24 = scalar_lea.vmem %s4790_s0, %s3416_s7  ;;  %s4796_s14 = sld [smem:[#allocation40_spill]] }
  0x3f   : > { %s993_s28 = scalar_lea.vmem %s4791_s6, %s983_s25  ;;  %s4797_s15 = sld [smem:[#allocation41_spill]] }
  0x40   : > { %s996_s20 = scalar_lea.vmem %s4792_s22, %s983_s25  ;;  %v1072_v5 = vld [vmem:[%s993_s28] sm:$0x1]  ;;  %s4798_s16 = sld [smem:[#allocation42_spill]] }
  0x41   : > { %v1062_v4 = vld [vmem:[%s996_s20] sm:$0x1]  ;;  %v4214_v6 = vmul.f32 -1e+18, %v1072_v5  ;;  %s3652_s0 = smul.u32 48, %s4180_s29  ;;  %s4801_s27 = sld [smem:[#allocation43_spill]] }
  0x42   : > { %vm1063_vm2 = vcmp.gt.f32.partialorder %v1062_v4, 0.5  ;;  %s4219_s8 = scalar_lea.vmem %s4794_s10, %s3417_s23  ;;  %s4803_s6 = sshll.u32 %s4171_s30, 3 }
  0x43   : > { %s4224_s28 = scalar_lea.vmem %s4795_s11, %s3417_s23  ;;  %v1064_v8 = vsel %vm1063_vm2, 1, %v3958_v7  ;;  %s3653_s11 = smul.u32 96, %s4180_s29 }
  0x44   : > { %s4234_s5 = scalar_lea.vmem %s4796_s14, %s3417_s23  ;;  %v1068_v9 = vrot.slane %v1064_v8, %v1067_v3  ;;  %s4282_s19 = scalar_lea.vmem [#allocation9], %s4803_s6 }
  0x45   : > { %s4242_s22 = scalar_lea.vmem %s4797_s15, %s3417_s23  ;;  %s4802_s15 = sld [smem:[#allocation45_spill]] }
  0x46   : > { %s4247_s20 = scalar_lea.vmem %s4798_s16, %s3417_s23  ;;  %vm1069_vm4 = vcmp.eq.s32.totalorder %v1068_v9, 1  ;;  %s4804_s10 = smov %s4803_s6 }
  0x47   : > { %vm1070_vm5 = vmor %vm1061_vm3, %vm1069_vm4  ;;  %s4273_s3 = scalar_lea.vmem %s4801_s27, %s3652_s0  ;;  %s4286_s14 = scalar_lea.vmem [#allocation11], %s4804_s10 }
  0x48   : > { %v4268_v11 = vsel %vm1070_vm5, -1e+18, %v3959_v10  ;;  %s4805_s25 = sld [smem:[#allocation18_spill]] }
  0x4b   : > { %s4278_s1 = scalar_lea.vmem %s4802_s15, %s3653_s11 }
  0x4e   : > { %p3321_p0 = scmp.ne.s32.totalorder %s4805_s25, 0 }
  0x4f   : > { %s4806_s16 = sld [smem:[#allocation34_spill]] (!%p3321_p0) }
  0x50   : > { %1079 = sbr.rel (%p3321_p0) target bundleno = 293 (0x125), region = 116  ;;  %s4807_s4 = sld [smem:[#allocation28_spill]] (!%p3321_p0) }
  0x51   : > { %s4808_s21 = sld [smem:[#allocation33_spill]] (!%p3321_p0) }
  0x55   : > { %v3746_v12 = vld [vmem:[%s4806_s16 + $0x8] sm:$0xff]   ;;  %v3960_v13 = vmov 0.0   ;;  %v3747_v14 = vld [vmem:[%s4806_s16] sm:$0xff]   ;;  %vm3961_vm6 = vmmov 0   ;;  %vm1099_vm7 = vcmask 261120  }
  0x56   : > { %3492 = vmatprep.subr.bf16.mxu0 %v3960_v13  ;;  %3496 = vmatprep.mubr.msk.bf16.mxu0 %vm3961_vm6, %v3960_v13  ;;  %v1080_v15 = vld [vmem:[%s4807_s4] sm:$0xff] }
  0x57   : > { %3493 = vmatpush3.bf16.msra.mxu0 %v3746_v12  ;;  %v1081_v16 = vpack.c.bf16 %v1080_v15, %v1080_v15  ;;  %v1086_v17 = vld [vmem:[%s4808_s21] sm:$0xff] }
  0x58   : > { %3494 = vmatprep.subr.bf16.mxu0 %v3960_v13 }
  0x5b   : > { %3495 = vmatpush3.bf16.msra.mxu0 %v3747_v14 }
  0x5e   : > { %3497 = vmatmul.mubr.msk.bf16.vlgmr.msra.gmra.mxu0 %vm1099_vm7, %v1081_v16 }
 0x11e   : > { %v1137_v18 = vpop.f32.mrf.mxu0 }
 0x11f   : > { %v1138_v19 = vadd.f32 %v1137_v18, %v1086_v17 }
 0x120   : > { %v3498_v20 = vpop.f32.mrf.mxu0 }
 0x121   : > { %1143 = vst.msk [vmem:[#allocation2] sm:$0xff] %vm1099_vm7, %v1138_v19 }
 0x122   : > { %v1140_v21 = vpop.f32.mrf.mxu0 }
 0x124   : > { %v3499_v22 = vpop.f32.mrf.mxu0 }
 0x125 PF: > { %vm1150_vm8 = vcmask 261120   ;;  %3500 = vmatprep.subr.bf16.mxu1 %v3959_v10  ;;  %3526 = vmatprep.subr.bf16.mxu0 %v3959_v10  ;;  %v3748_v30 = vld [vmem:[%s4219_s8 + $0x8] sm:$0xff]   ;;  %vm3962_vm9 = vmmov 0   ;;  %v3749_v31 = vld [vmem:[%s4219_s8] sm:$0xff]   ;;  %s4809_s2 = sld [smem:[#allocation37_spill]]  ;;  %s4811_s25 = scalar_lea.vmem %s4720_s9, %s4180_s29  ;;  %vm1247_vm12 = vcmask 191488  }
 0x126   : > { %3504 = vmatprep.mubr.msk.bf16.mxu1 %vm3962_vm9, %v3959_v10  ;;  %3528 = vmatprep.mubr.msk.bf16.mxu0 %vm3962_vm9, %v3959_v10  ;;  %v3326_v43 = vld [vmem:[%s4811_s25] ss:$0 sm:$0xff]  ;;  %s3963_s23 = smov 104   ;;  %s3964_s4 = smov 80   ;;  %vm1273_vm13 = vcmask 64512   ;;  %vm1339_vm14 = vcmask 1043456  }
 0x127   : > { %3501 = vmatpush3.bf16.msra.mxu1 %v3748_v30  ;;  %s3965_s0 = smov 56   ;;  %s3966_s11 = smov 120   ;;  %vm1384_vm15 = vcmask 60416   ;;  %vm1507_vm2 = vcmask 126016   ;;  %vm1630_vm3 = vcmask 191616   ;;  %vm1753_vm4 = vcmask 257216  }
 0x128   : > { %v4299_v23 = vld [vmem:[#allocation2] sm:$0xff]  ;;  %3502 = vmatprep.subr.bf16.mxu1 %v3959_v10  ;;  %s3967_s10 = smov 112   ;;  %s3968_s15 = smov 8   ;;  %vm1982_vm7 = vcmask 125952  }
 0x129   : > { %v1151_v24 = vsel %vm1150_vm8, %v4299_v23, 0.0  ;;  %s3969_s21 = smov 16   ;;  %s3970_s8 = smov 24  }
 0x12a   : > { %1152 = vadd.xlane.f32.xlu0 %v1151_v24  ;;  %s4814_s6 = scalar_lea.vmem %s4728_s17, %s4180_s29 }
 0x12b   : > { %3503 = vmatpush3.bf16.msra.mxu1 %v3749_v31  ;;  %s4810_s7 = scalar_lea.vmem %s4809_s2, %s4180_s29  ;;  %s4813_s2 = scalar_lea.vmem %s4724_s13, %s4180_s29 }
 0x12c   : > { %3508 = vmatprep.subr.bf16.mxu1 %v3959_v10  ;;  %v3325_v40 = vld [vmem:[%s4810_s7] ss:$0 sm:$0xff]  ;;  %s3971_s7 = smov 96  }
 0x1b3   : > { %v1153_v25 = vpop.xlane.xlu0 %1152 }
 0x1b4   : > { %v1155_v26 = vmul.f32 0.03125, %v1153_v25 }
 0x1b6   : > { %v1156_v27 = vsub.f32 %v4299_v23, %v1155_v26 }
 0x1b8   : > { %v1157_v28 = vmul.f32 %v1156_v27, %v1156_v27  ;;  %v1168_v41 = vmul.f32 %v3325_v40, %v1156_v27 }
 0x1ba   : > { %v1158_v29 = vsel %vm1150_vm8, %v1157_v28, 0.0 }
 0x1bb   : > { %1159 = vadd.xlane.f32.xlu0 %v1158_v29 }
 0x244   : > { %v1160_v32 = vpop.xlane.xlu0 %1159 }
 0x245   : > { %v1161_v33 = vmul.f32 0.032258064, %v1160_v32 }
 0x247   : > { %3786 = vrsqrt.f32 %v1161_v33  ;;  %vm1171_vm10 = vcmp.eq.f32.partialorder %v1161_v33, inf  ;;  %v1174_v36 = vand.u32 2147483648, %v1161_v33  ;;  %vm1173_vm11 = vcmp.eq.f32.partialorder %v1161_v33, 0.0 }
 0x254   : > { %v3787_v34 = vpop.eup %3786 }
 0x255   : > { %v1170_v35 = vmul.f32 %v3787_v34, %v1161_v33 }
 0x257   : > { %v1172_v37 = vsel %vm1171_vm10, %v1161_v33, %v1170_v35  ;;  %vm1984_vm10 = vcmask 122880  }
 0x258   : > { %v1175_v38 = vsel %vm1173_vm11, %v1174_v36, %v1172_v37  ;;  %vm2093_vm11 = vcmask 80896  }
 0x259   : > { %v1176_v39 = vadd.f32 1e-06, %v1175_v38 }
 0x25b   : > { %3788 = vrcp.f32 %v1176_v39 }
 0x268   : > { %v3789_v42 = vpop.eup %3788 }
 0x269   : > { %v1178_v44 = vmul.f32 %v3789_v42, %v1168_v41 }
 0x26b   : > { %v1185_v45 = vadd.f32 %v3326_v43, %v1178_v44 }
 0x26d   : > { %v1186_v46 = vpack.c.bf16 %v1185_v45, %v1185_v45 }
 0x26f   : > { %3505 = vmatmul.mubr.msk.bf16.vlgmr.msra.gmra.mxu1 %vm1150_vm8, %v1186_v46 }
 0x270   : > { %3510 = vmatprep.mubr.msk.bf16.mxu1 %vm3962_vm9, %v3959_v10 }
 0x32f   : > { %v1240_v47 = vpop.f32.mrf.mxu1 }
 0x330   : > { %v1246_v48 = vpack.c.bf16 %v1240_v47, %v1240_v47 }
 0x331   : > { %v3506_v49 = vpop.f32.mrf.mxu1 }
 0x332   : > { %1248 = vst.msk [vmem:[#allocation3] sm:$0xf] %vm1247_vm12, %v1246_v48  ;;  %1252 = vrot.lane.b32.xlu0 %v1246_v48, %s3963_s23 }
 0x333   : > { %v1243_v50 = vpop.f32.mrf.mxu1 }
 0x335   : > { %v3507_v51 = vpop.f32.mrf.mxu1 }
 0x336   : > { %1257 = vrot.lane.b32.xlu0 %v1246_v48, %s3964_s4 }
 0x339   : > { %v1267_v52 = vld [vmem:[#allocation3] sm:$0xf] }
 0x33a   : > { %1262 = vrot.lane.b32.xlu0 %v1246_v48, %s3965_s0  ;;  %v3331_v53 = vcombine.low %v1267_v52, %v1267_v52  ;;  %s3972_s0 = smov 64  }
 0x33c   : > { %1271 = vrot.lane.b32.xlu1 %v3331_v53, %s3966_s11 }
 0x3a4   : > { %v1253_v54 = vpop.permute.xlu0 %1252 }
 0x3a5   : > { %1256 = vst.msk [vmem:[#allocation3 + $0x4] sm:$0xf] %vm1247_vm12, %v1253_v54 }
 0x3a8   : > { %v1258_v55 = vpop.permute.xlu0 %1257 }
 0x3a9   : > { %1261 = vst.msk [vmem:[#allocation3 + $0x8] sm:$0xf] %vm1247_vm12, %v1258_v55 }
 0x3ac   : > { %v1263_v56 = vpop.permute.xlu0 %1262  ;;  %v1386_v4 = vld [vmem:[#allocation3 + $0x4] sm:$0xf] }
 0x3ad   : > { %1266 = vst.msk [vmem:[#allocation3 + $0xc] sm:$0xf] %vm1247_vm12, %v1263_v56  ;;  %v4343_v5 = vcombine.low %v1386_v4, %v1386_v4  ;;  %vm2111_vm12 = vcmask 1044480  }
 0x3ae   : > { %v1272_v57 = vpop.permute.xlu1 %1271 }
 0x3af   : > { %v1278_v58 = vsel %vm1273_vm13, %v1272_v57, 0 }
 0x3b0   : > { %3509 = vmatpush3.bf16.xpose.msra.mxu1 %v1278_v58  ;;  %v1509_v8 = vld [vmem:[#allocation3 + $0x8] sm:$0xf] }
 0x3b1   : > { %3514 = vmatprep.subr.bf16.mxu1 %v3959_v10  ;;  %v4347_v9 = vcombine.low %v1509_v8, %v1509_v8 }
 0x3b4   : > { %v1632_v12 = vld [vmem:[#allocation3 + $0xc] sm:$0xf] }
 0x3b5   : > { %v4351_v13 = vcombine.low %v1632_v12, %v1632_v12 }
 0x3b7   : > { %3511 = vmatmul.mubr.msk.bf16.vlgmr.msra.gmra.mxu1 %vm1273_vm13, %v1267_v52 }
 0x3b8   : > { %3516 = vmatprep.mubr.msk.bf16.mxu1 %vm3962_vm9, %v3959_v10 }
 0x477   : > { %v1314_v59 = vpop.f32.mrf.mxu1 }
 0x478   : > { %v1320_v60 = vmul.f32 0.35355338, %v1314_v59 }
 0x479   : > { %v3512_v61 = vpop.f32.mrf.mxu1 }
 0x47a   : > { %v1321_v62 = vadd.f32 %v1320_v60, %v4268_v11 }
 0x47b   : > { %v1317_v63 = vpop.f32.mrf.mxu1 }
 0x47c   : > { %v1322_v0 = vsel %vm1273_vm13, %v1321_v62, -inf }
 0x47d   : > { %1323 = vmax.xlane.f32.xlu1 %v1322_v0  ;;  %v3513_v2 = vpop.f32.mrf.mxu1 }
 0x48e   : > { %1334 = vrot.lane.b32.xlu1 %v3331_v53, %s3967_s10 }
 0x492   : > { %1390 = vrot.lane.b32.xlu1 %v4343_v5, %s3966_s11 }
 0x496   : > { %1513 = vrot.lane.b32.xlu1 %v4347_v9, %s3966_s11 }
 0x49a   : > { %1636 = vrot.lane.b32.xlu1 %v4351_v13, %s3966_s11 }
 0x506   : > { %v1324_v14 = vpop.xlane.xlu1 %1323 }
 0x507   : > { %v1325_v15 = vsub.f32 %v1321_v62, %v1324_v14 }
 0x509   : > { %v1326_v16 = vmul.f32 1.442695, %v1325_v15 }
 0x50a   : > { %v1335_v17 = vpop.permute.xlu1 %1334 }
 0x50b   : > { %3790 = vpow2.f32 %v1326_v16  ;;  %v1341_v18 = vsel %vm1339_vm14, %v1335_v17, 0 }
 0x50c   : > { %3515 = vmatpush3.bf16.msra.mxu1 %v1341_v18 }
 0x50d   : > { %3520 = vmatprep.subr.bf16.mxu1 %v3959_v10 }
 0x50e   : > { %v1391_v25 = vpop.permute.xlu1 %1390 }
 0x50f   : > { %v1396_v27 = vsel %vm1273_vm13, %v1391_v25, 0 }
 0x512   : > { %v1514_v28 = vpop.permute.xlu1 %1513 }
 0x513   : > { %v1519_v29 = vsel %vm1273_vm13, %v1514_v28, 0 }
 0x516   : > { %v1637_v30 = vpop.permute.xlu1 %1636 }
 0x517   : > { %v1642_v31 = vsel %vm1273_vm13, %v1637_v30, 0 }
 0x518   : > { %v3791_v19 = vpop.eup %3790 }
 0x519   : > { %v1328_v20 = vsel %vm1273_vm13, %v3791_v19, 0.0 }
 0x51a   : > { %1329 = vadd.xlane.f32.xlu0 %v1328_v20 }
 0x5a3   : > { %v1330_v21 = vpop.xlane.xlu0 %1329 }
 0x5a4   : > { %3792 = vrcp.f32 %v1330_v21 }
 0x5b1   : > { %v3793_v22 = vpop.eup %3792 }
 0x5b2   : > { %v1332_v24 = vmul.f32 %v3793_v22, %v3791_v19 }
 0x5b4   : > { %v1333_v26 = vpack.c.bf16 %v1332_v24, %v1332_v24 }
 0x5b6   : > { %3517 = vmatmul.mubr.msk.bf16.vlgmr.msra.gmra.mxu1 %vm1273_vm13, %v1333_v26 }
 0x5b7   : > { %3521 = vmatpush3.bf16.xpose.msra.mxu1 %v1396_v27  ;;  %3522 = vmatprep.mubr.msk.bf16.mxu1 %vm3962_vm9, %v3959_v10 }
 0x5b8   : > { %3532 = vmatprep.subr.bf16.mxu1 %v3959_v10 }
 0x5be   : > { %3523 = vmatmul.mubr.msk.bf16.vlgmr.msra.gmra.mxu1 %vm1273_vm13, %v1386_v4 }
 0x5bf   : > { %3533 = vmatpush3.bf16.xpose.msra.mxu1 %v1519_v29  ;;  %3534 = vmatprep.mubr.msk.bf16.mxu1 %vm3962_vm9, %v3959_v10 }
 0x5c0   : > { %3544 = vmatprep.subr.bf16.mxu1 %v3959_v10 }
 0x5c6   : > { %3535 = vmatmul.mubr.msk.bf16.vlgmr.msra.gmra.mxu1 %vm1273_vm13, %v1509_v8 }
 0x5c7   : > { %3545 = vmatpush3.bf16.xpose.msra.mxu1 %v1642_v31  ;;  %3546 = vmatprep.mubr.msk.bf16.mxu1 %vm3962_vm9, %v3959_v10 }
 0x5c8   : > { %3556 = vmatprep.subr.bf16.mxu1 %v3959_v10 }
 0x5ce   : > { %3547 = vmatmul.mubr.msk.bf16.vlgmr.msra.gmra.mxu1 %vm1273_vm13, %v1632_v12 }
 0x5cf   : > { %3560 = vmatprep.mubr.msk.bf16.mxu1 %vm3962_vm9, %v3959_v10 }
 0x676   : > { %v1377_v32 = vpop.f32.mrf.mxu1 }
 0x677   : > { %v1383_v33 = vpack.c.bf16 %v1377_v32, %v1377_v32 }
 0x678   : > { %v3518_v34 = vpop.f32.mrf.mxu1 }
 0x679   : > { %1385 = vst.msk [vmem:[#allocation6] sm:$0xf] %vm1384_vm15, %v1383_v33 }
 0x67a   : > { %v1380_v35 = vpop.f32.mrf.mxu1 }
 0x67c   : > { %v3519_v36 = vpop.f32.mrf.mxu1 }
 0x67e   : > { %v1432_v37 = vpop.f32.mrf.mxu1 }
 0x67f   : > { %v1438_v38 = vmul.f32 0.35355338, %v1432_v37 }
 0x680   : > { %v3524_v39 = vpop.f32.mrf.mxu1 }
 0x681   : > { %v1439_v40 = vadd.f32 %v1438_v38, %v4268_v11  ;;  %v3754_v38 = vld [vmem:[%s4224_s28 + $0x8] sm:$0xff]  }
 0x682   : > { %v1435_v41 = vpop.f32.mrf.mxu1  ;;  %3557 = vmatpush3.bf16.msra.mxu1 %v3754_v38 }
 0x683   : > { %v1440_v42 = vsel %vm1273_vm13, %v1439_v40, -inf  ;;  %3558 = vmatprep.subr.bf16.mxu1 %v3959_v10 }
 0x684   : > { %1441 = vmax.xlane.f32.xlu0 %v1440_v42  ;;  %v3525_v43 = vpop.f32.mrf.mxu1 }
 0x686   : > { %v1555_v44 = vpop.f32.mrf.mxu1 }
 0x687   : > { %v1561_v45 = vmul.f32 0.35355338, %v1555_v44 }
 0x688   : > { %v3536_v46 = vpop.f32.mrf.mxu1 }
 0x689   : > { %v1562_v47 = vadd.f32 %v1561_v45, %v4268_v11 }
 0x68a   : > { %v1558_v48 = vpop.f32.mrf.mxu1 }
 0x68b   : > { %v1563_v49 = vsel %vm1273_vm13, %v1562_v47, -inf }
 0x68c   : > { %1564 = vmax.xlane.f32.xlu1 %v1563_v49  ;;  %v3537_v50 = vpop.f32.mrf.mxu1 }
 0x68e   : > { %v1678_v51 = vpop.f32.mrf.mxu1 }
 0x68f   : > { %v1684_v52 = vmul.f32 0.35355338, %v1678_v51 }
 0x690   : > { %v3548_v53 = vpop.f32.mrf.mxu1 }
 0x691   : > { %v1685_v54 = vadd.f32 %v1684_v52, %v4268_v11 }
 0x692   : > { %v1681_v55 = vpop.f32.mrf.mxu1 }
 0x693   : > { %v1686_v56 = vsel %vm1273_vm13, %v1685_v54, -inf }
 0x694   : > { %1687 = vmax.xlane.f32.xlu0 %v1686_v56  ;;  %v3549_v57 = vpop.f32.mrf.mxu1 }
 0x69d   : > { %1575 = vrot.lane.b32.xlu1 %v4347_v9, %s3967_s10 }
 0x70d   : > { %v1442_v58 = vpop.xlane.xlu0 %1441 }
 0x70e   : > { %v1443_v59 = vsub.f32 %v1439_v40, %v1442_v58  ;;  %v3755_v40 = vld [vmem:[%s4224_s28] sm:$0xff]  }
 0x70f   : > { %3559 = vmatpush3.bf16.msra.mxu1 %v3755_v40 }
 0x710   : > { %v1444_v60 = vmul.f32 1.442695, %v1443_v59  ;;  %3572 = vmatprep.subr.bf16.mxu1 %v3959_v10 }
 0x712   : > { %3794 = vpow2.f32 %v1444_v60 }
 0x715   : > { %v1565_v11 = vpop.xlane.xlu1 %1564 }
 0x716   : > { %v1566_v63 = vsub.f32 %v1562_v47, %v1565_v11 }
 0x718   : > { %v1567_v2 = vmul.f32 1.442695, %v1566_v63 }
 0x719   : > { %v1576_v20 = vpop.permute.xlu1 %1575 }
 0x71a   : > { %3796 = vpow2.f32 %v1567_v2  ;;  %v1581_v22 = vsel %vm1339_vm14, %v1576_v20, 0  ;;  %v1145_v2 = vld [vmem:[%s4192_s24] sm:$0xff] }
 0x71d   : > { %v1688_v0 = vpop.xlane.xlu0 %1687 }
 0x71e   : > { %v1689_v4 = vsub.f32 %v1685_v54, %v1688_v0  ;;  %v3757_v0 = vld [vmem:[%s4242_s22] sm:$0xff]  }
 0x71f   : > { %v3795_v61 = vpop.eup %3794 }
 0x720   : > { %v1446_v62 = vsel %vm1273_vm13, %v3795_v61, 0.0  ;;  %v1690_v8 = vmul.f32 1.442695, %v1689_v4  ;;  %v1146_v4 = vld [vmem:[%s4192_s24 + $0x8] sm:$0x3]  ;;  %s4818_s24 = sld [smem:[#allocation46_spill]] }
 0x721   : > { %1447 = vadd.xlane.f32.xlu0 %v1446_v62 }
 0x722   : > { %3798 = vpow2.f32 %v1690_v8  ;;  %v1147_v8 = vpack.c.bf16 %v1146_v4, %v1145_v2 }
 0x726   : > { %s4819_s28 = scalar_lea.vmem %s4818_s24, %s4180_s29 }
 0x727   : > { %v3797_v9 = vpop.eup %3796  ;;  %v3406_v1 = vld [vmem:[%s4819_s28] ss:$0 sm:$0xff] }
 0x728   : > { %v1569_v12 = vsel %vm1273_vm13, %v3797_v9, 0.0 }
 0x72f   : > { %v3799_v14 = vpop.eup %3798 }
 0x730   : > { %v1692_v15 = vsel %vm1273_vm13, %v3799_v14, 0.0 }
 0x737   : > { %1452 = vrot.lane.b32.xlu0 %v4343_v5, %s3967_s10 }
 0x756   : > { %1570 = vadd.xlane.f32.xlu0 %v1569_v12  ;;  %v3759_v12 = vld [vmem:[%s4234_s5] sm:$0xff]  }
 0x75a   : > { %1693 = vadd.xlane.f32.xlu0 %v1692_v15 }
 0x770   : > { %1698 = vrot.lane.b32.xlu0 %v4351_v13, %s3967_s10 }
 0x7aa   : > { %v1448_v5 = vpop.xlane.xlu0 %1447 }
 0x7ab   : > { %3800 = vrcp.f32 %v1448_v5 }
 0x7ae   : > { %v1453_v16 = vpop.permute.xlu0 %1452 }
 0x7af   : > { %v1458_v17 = vsel %vm1339_vm14, %v1453_v16, 0 }
 0x7b0   : > { %3527 = vmatpush3.bf16.msra.mxu0 %v1458_v17 }
 0x7b1   : > { %3538 = vmatprep.subr.bf16.mxu0 %v3959_v10 }
 0x7b8   : > { %v3801_v18 = vpop.eup %3800 }
 0x7b9   : > { %v1450_v19 = vmul.f32 %v3801_v18, %v3795_v61 }
 0x7bb   : > { %v1451_v21 = vpack.c.bf16 %v1450_v19, %v1450_v19 }
 0x7bd   : > { %3529 = vmatmul.mubr.msk.bf16.vlgmr.msra.gmra.mxu0 %vm1273_vm13, %v1451_v21 }
 0x7be   : > { %3539 = vmatpush3.bf16.msra.mxu0 %v1581_v22  ;;  %3540 = vmatprep.mubr.msk.bf16.mxu0 %vm3962_vm9, %v3959_v10 }
 0x7bf   : > { %3550 = vmatprep.subr.bf16.mxu0 %v3959_v10 }
 0x7df   : > { %v1571_v13 = vpop.xlane.xlu0 %1570 }
 0x7e0   : > { %3802 = vrcp.f32 %v1571_v13 }
 0x7e3   : > { %v1694_v24 = vpop.xlane.xlu0 %1693 }
 0x7e4   : > { %3804 = vrcp.f32 %v1694_v24  ;;  %v3350_v24 = vld [vmem:[%s4813_s2] ss:$0 sm:$0xff] }
 0x7e7   : > { %v1699_v27 = vpop.permute.xlu0 %1698 }
 0x7e8   : > { %v1704_v30 = vsel %vm1339_vm14, %v1699_v27, 0  ;;  %vm2635_vm14 = vcmask 257024  }
 0x7ed   : > { %v3803_v25 = vpop.eup %3802 }
 0x7ee   : > { %v1573_v26 = vmul.f32 %v3803_v25, %v3797_v9  ;;  %v3758_v9 = vld [vmem:[%s4234_s5 + $0x8] sm:$0xff]   ;;  %s4812_s5 = scalar_lea.vmem %s4723_s12, %s4180_s29 }
 0x7ef   : > { %v3349_v21 = vld [vmem:[%s4812_s5] ss:$0 sm:$0xff]  ;;  %s4820_s5 = sld [smem:[#allocation18_spill]] }
 0x7f0   : > { %v1574_v28 = vpack.c.bf16 %v1573_v26, %v1573_v26 }
 0x7f1   : > { %v3805_v29 = vpop.eup %3804 }
 0x7f2   : > { %3541 = vmatmul.mubr.msk.bf16.vlgmr.msra.gmra.mxu0 %vm1273_vm13, %v1574_v28  ;;  %v1696_v31 = vmul.f32 %v3805_v29, %v3799_v14 }
 0x7f3   : > { %3551 = vmatpush3.bf16.msra.mxu0 %v1704_v30  ;;  %3552 = vmatprep.mubr.msk.bf16.mxu0 %vm3962_vm9, %v3959_v10 }
 0x7f4   : > { %3564 = vmatprep.subr.bf16.mxu0 %v3959_v10  ;;  %v1697_v32 = vpack.c.bf16 %v1696_v31, %v1696_v31 }
 0x7f5   : > { %p3407_p1 = scmp.ne.s32.totalorder %s4820_s5, 1 }
 0x7f6   : > { %s4821_s26 = sld [smem:[#allocation35_spill]] (!%p3407_p1) }
 0x7fa   : > { %3553 = vmatmul.mubr.msk.bf16.vlgmr.msra.gmra.mxu0 %vm1273_vm13, %v1697_v32 }
 0x7fb   : > { %3568 = vmatprep.mubr.msk.bf16.mxu0 %vm3962_vm9, %v3959_v10  ;;  %3565 = vmatpush3.bf16.msra.mxu0 %v3758_v9 }
 0x7fc   : > { %3566 = vmatprep.subr.bf16.mxu0 %v3959_v10 }
 0x7ff   : > { %3567 = vmatpush3.bf16.msra.mxu0 %v3759_v12 }
 0x800   : > { %3580 = vmatprep.subr.bf16.mxu0 %v3959_v10 }
 0x87d   : > { %v1494_v33 = vpop.f32.mrf.mxu0 }
 0x87e   : > { %v3423_v34 = vpack.c.bf16 %v1494_v33, %v1494_v33 }
 0x87f   : > { %v3530_v35 = vpop.f32.mrf.mxu0 }
 0x880   : > { %1504 = vrot.lane.b32.xlu0 %v3423_v34, %s3968_s15 }
 0x881   : > { %v1497_v36 = vpop.f32.mrf.mxu0 }
 0x883   : > { %v3531_v37 = vpop.f32.mrf.mxu0 }
 0x8b2   : > { %v1617_v39 = vpop.f32.mrf.mxu0 }
 0x8b3   : > { %v3424_v41 = vpack.c.bf16 %v1617_v39, %v1617_v39 }
 0x8b4   : > { %v3542_v42 = vpop.f32.mrf.mxu0 }
 0x8b5   : > { %1627 = vrot.lane.b32.xlu0 %v3424_v41, %s3969_s21 }
 0x8b6   : > { %v1620_v43 = vpop.f32.mrf.mxu0 }
 0x8b8   : > { %v3543_v44 = vpop.f32.mrf.mxu0 }
 0x8ba   : > { %v1740_v45 = vpop.f32.mrf.mxu0 }
 0x8bb   : > { %v3425_v46 = vpack.c.bf16 %v1740_v45, %v1740_v45 }
 0x8bc   : > { %v3554_v47 = vpop.f32.mrf.mxu0 }
 0x8bd   : > { %1750 = vrot.lane.b32.xlu1 %v3425_v46, %s3970_s8 }
 0x8be   : > { %v1743_v48 = vpop.f32.mrf.mxu0 }
 0x8c0   : > { %v3555_v49 = vpop.f32.mrf.mxu0 }
 0x8f2   : > { %v1505_v50 = vpop.permute.xlu0 %1504 }
 0x8f3   : > { %1508 = vst.msk [vmem:[#allocation6] sm:$0xf] %vm1507_vm2, %v1505_v50 }
 0x927   : > { %v1628_v51 = vpop.permute.xlu0 %1627 }
 0x928   : > { %1631 = vst.msk [vmem:[#allocation6] sm:$0xf] %vm1630_vm3, %v1628_v51 }
 0x92f   : > { %v1751_v52 = vpop.permute.xlu1 %1750 }
 0x930   : > { %1754 = vst.msk [vmem:[#allocation6] sm:$0xf] %vm1753_vm4, %v1751_v52 }
 0x937   : > { %v1755_v53 = vld [vmem:[#allocation6] sm:$0xf] }
 0x938   : > { %3561 = vmatmul.mubr.msk.bf16.vlgmr.msra.gmra.mxu1 %vm1150_vm8, %v1755_v53 }
 0x939   : > { %3576 = vmatprep.mubr.msk.bf16.mxu1 %vm3962_vm9, %v3959_v10 }
 0x9f8   : > { %v1809_v54 = vpop.f32.mrf.mxu1 }
 0x9f9   : > { %v4421_v55 = vadd.f32 %v1809_v54, %v4299_v23  ;;  %v3756_v23 = vld [vmem:[%s4242_s22 + $0x8] sm:$0xff]  }
 0x9fa   : > { %v3562_v56 = vpop.f32.mrf.mxu1  ;;  %3573 = vmatpush3.bf16.msra.mxu1 %v3756_v23 }
 0x9fb   : > { %v1818_v57 = vsel %vm1150_vm8, %v4421_v55, 0.0  ;;  %3574 = vmatprep.subr.bf16.mxu1 %v3959_v10 }
 0x9fc   : > { %1819 = vadd.xlane.f32.xlu0 %v1818_v57  ;;  %v1812_v58 = vpop.f32.mrf.mxu1 }
 0x9fe   : > { %v3563_v59 = vpop.f32.mrf.mxu1  ;;  %3575 = vmatpush3.bf16.msra.mxu1 %v3757_v0 }
 0x9ff   : > { %3586 = vmatprep.subr.bf16.mxu1 %v3959_v10 }
 0xa01   : > { %3577 = vmatmul.mubr.msk.bf16.vlgmr.msra.gmra.mxu1 %vm1150_vm8, %v1147_v8 }
 0xa02   : > { %3588 = vmatprep.mubr.msk.bf16.mxu1 %vm3962_vm9, %v3959_v10 }
 0xa85   : > { %v1820_v60 = vpop.xlane.xlu0 %1819 }
 0xa86   : > { %v1821_v61 = vmul.f32 0.03125, %v1820_v60 }
 0xa88   : > { %v1822_v62 = vsub.f32 %v4421_v55, %v1821_v61  ;;  %v2090_v61 = vrot.slane %v4214_v6, %v1067_v3 }
 0xa8a   : > { %v1823_v11 = vmul.f32 %v1822_v62, %v1822_v62  ;;  %v1834_v22 = vmul.f32 %v3349_v21, %v1822_v62 }
 0xa8c   : > { %v1824_v63 = vsel %vm1150_vm8, %v1823_v11, 0.0 }
 0xa8d   : > { %1825 = vadd.xlane.f32.xlu1 %v1824_v63 }
 0xac1   : > { %v1965_v28 = vpop.f32.mrf.mxu1 }
 0xac2   : > { %v3426_v29 = vpack.c.bf16 %v1965_v28, %v1965_v28 }
 0xac3   : > { %v3578_v30 = vpop.f32.mrf.mxu1 }
 0xac4   : > { %1983 = vst.msk [vmem:[#allocation5] sm:$0xf] %vm1982_vm7, %v3426_v29  ;;  %1994 = vrot.lane.b32.xlu0 %v3426_v29, %s3967_s10 }
 0xac5   : > { %v1968_v31 = vpop.f32.mrf.mxu1 }
 0xac6   : > { %v3427_v32 = vpack.c.bf16 %v1968_v31, %v1968_v31 }
 0xac7   : > { %v3579_v33 = vpop.f32.mrf.mxu1 }
 0xac8   : > { %1985 = vst.msk [vmem:[#allocation5 + $0x4] sm:$0x1] %vm1984_vm10, %v3427_v32  ;;  %1996 = vrot.lane.b32.xlu1 %v3427_v32, %s3967_s10  ;;  %2008 = vrot.lane.b32.xlu0 %v3426_v29, %s3971_s7 }
 0xacc   : > { %2010 = vrot.lane.b32.xlu1 %v3427_v32, %s3971_s7 }
 0xacf   : > { %v4458_v34 = vld [vmem:[#allocation5] sm:$0x1f]  }
 0xad0   : > { %2022 = vrot.lane.b32.xlu1 %v3426_v29, %s3964_s4  ;;  %v2043_v35 = vsel %vm1273_vm13, %v4458_v34, 0 }
 0xb16   : > { %v1826_v14 = vpop.xlane.xlu1 %1825 }
 0xb17   : > { %v1827_v15 = vmul.f32 0.032258064, %v1826_v14 }
 0xb19   : > { %3806 = vrsqrt.f32 %v1827_v15  ;;  %vm1837_vm5 = vcmp.eq.f32.partialorder %v1827_v15, inf  ;;  %v1840_v17 = vand.u32 2147483648, %v1827_v15  ;;  %vm1839_vm6 = vcmp.eq.f32.partialorder %v1827_v15, 0.0 }
 0xb26   : > { %v3807_v5 = vpop.eup %3806 }
 0xb27   : > { %v1836_v16 = vmul.f32 %v3807_v5, %v1827_v15 }
 0xb29   : > { %v1838_v18 = vsel %vm1837_vm5, %v1827_v15, %v1836_v16  ;;  %vm2774_vm5 = vcmask 1043968  }
 0xb2a   : > { %v1841_v19 = vsel %vm1839_vm6, %v1840_v17, %v1838_v18  ;;  %vm2881_vm6 = vcmask 523264  }
 0xb2b   : > { %v1842_v20 = vadd.f32 1e-06, %v1841_v19 }
 0xb2d   : > { %3808 = vrcp.f32 %v1842_v20 }
 0xb36   : > { %v1995_v36 = vpop.permute.xlu0 %1994 }
 0xb37   : > { %2001 = vst.msk [vmem:[#allocation5 + $0x8] sm:$0xf] %vm1982_vm7, %v1995_v36 }
 0xb3a   : > { %v3809_v13 = vpop.eup %3808  ;;  %v1997_v37 = vpop.permute.xlu1 %1996 }
 0xb3b   : > { %v1844_v25 = vmul.f32 %v3809_v13, %v1834_v22  ;;  %v2009_v38 = vpop.permute.xlu0 %2008  ;;  %2002 = vst.msk [vmem:[#allocation5 + $0xc] sm:$0x1] %vm1984_vm10, %v1997_v37 }
 0xb3c   : > { %2015 = vst.msk [vmem:[#allocation5 + $0x10] sm:$0xf] %vm1982_vm7, %v2009_v38 }
 0xb3d   : > { %v1851_v26 = vadd.f32 %v3350_v24, %v1844_v25 }
 0xb3e   : > { %v2011_v39 = vpop.permute.xlu1 %2010 }
 0xb3f   : > { %v1852_v27 = vpack.c.bf16 %v1851_v26, %v1851_v26  ;;  %2016 = vst.msk [vmem:[#allocation5 + $0x14] sm:$0x1] %vm1984_vm10, %v2011_v39 }
 0xb41   : > { %3569 = vmatmul.mubr.msk.bf16.vlgmr.msra.gmra.mxu0 %vm1150_vm8, %v1852_v27 }
 0xb42   : > { %3582 = vmatprep.mubr.msk.bf16.mxu0 %vm3962_vm9, %v3959_v10  ;;  %3581 = vmatpush3.bf16.xpose.msra.mxu0 %v2043_v35  ;;  %v2023_v40 = vpop.permute.xlu1 %2022  ;;  %v4471_v45 = vld [vmem:[#allocation5 + $0x8] sm:$0x1f]  }
 0xb43   : > { %3592 = vmatprep.subr.bf16.mxu0 %v3959_v10  ;;  %2029 = vst.msk [vmem:[#allocation5 + $0x18] sm:$0xf] %vm1982_vm7, %v2023_v40  ;;  %v2169_v47 = vsel %vm1273_vm13, %v4471_v45, 0 }
 0xb46   : > { %v4484_v52 = vld [vmem:[#allocation5 + $0x10] sm:$0x1f]  }
 0xb47   : > { %v2294_v56 = vsel %vm1273_vm13, %v4484_v52, 0 }
 0xc01   : > { %v1906_v41 = vpop.f32.mrf.mxu0 }
 0xc02   : > { %v1972_v42 = vpack.c.bf16 %v1906_v41, %v1906_v41 }
 0xc03   : > { %v3570_v43 = vpop.f32.mrf.mxu0 }
 0xc04   : > { %1973 = vst.msk [vmem:[#allocation4] sm:$0xf] %vm1384_vm15, %v1972_v42  ;;  %1989 = vrot.lane.b32.xlu0 %v1972_v42, %s3966_s11  ;;  %2003 = vrot.lane.b32.xlu1 %v1972_v42, %s3967_s10 }
 0xc05   : > { %v1909_v44 = vpop.f32.mrf.mxu0 }
 0xc07   : > { %v3571_v46 = vpop.f32.mrf.mxu0 }
 0xc08   : > { %2024 = vrot.lane.b32.xlu0 %v3427_v32, %s3964_s4  ;;  %s4815_s4 = scalar_lea.vmem %s4729_s18, %s4180_s29 }
 0xc0b   : > { %v2031_v48 = vld [vmem:[#allocation4] sm:$0xf] }
 0xc0c   : > { %2017 = vrot.lane.b32.xlu0 %v1972_v42, %s3963_s23  ;;  %3583 = vmatmul.mubr.msk.bf16.vlgmr.msra.gmra.mxu0 %vm1273_vm13, %v2031_v48 }
 0xc0d   : > { %3593 = vmatpush3.bf16.xpose.msra.mxu0 %v2169_v47  ;;  %3594 = vmatprep.mubr.msk.bf16.mxu0 %vm3962_vm9, %v3959_v10 }
 0xc0e   : > { %3604 = vmatprep.subr.bf16.mxu0 %v3959_v10 }
 0xc76   : > { %v1990_v49 = vpop.permute.xlu0 %1989  ;;  %v2004_v50 = vpop.permute.xlu1 %2003 }
 0xc77   : > { %1993 = vst.msk [vmem:[#allocation4 + $0x4] sm:$0xf] %vm1384_vm15, %v1990_v49  ;;  %2007 = vst.msk [vmem:[#allocation4 + $0x8] sm:$0xf] %vm1384_vm15, %v2004_v50 }
 0xc7a   : > { %v2025_v51 = vpop.permute.xlu0 %2024 }
 0xc7b   : > { %2030 = vst.msk [vmem:[#allocation5 + $0x1c] sm:$0x1] %vm1984_vm10, %v2025_v51 }
 0xc7e   : > { %v2018_v53 = vpop.permute.xlu0 %2017  ;;  %v2157_v54 = vld [vmem:[#allocation4 + $0x4] sm:$0xf]  ;;  %v2282_v58 = vld [vmem:[#allocation4 + $0x8] sm:$0xf] }
 0xc7f   : > { %2021 = vst.msk [vmem:[#allocation4 + $0xc] sm:$0xf] %vm1384_vm15, %v2018_v53  ;;  %3595 = vmatmul.mubr.msk.bf16.vlgmr.msra.gmra.mxu0 %vm1273_vm13, %v2157_v54 }
 0xc80   : > { %3605 = vmatpush3.bf16.xpose.msra.mxu0 %v2294_v56  ;;  %3606 = vmatprep.mubr.msk.bf16.mxu0 %vm3962_vm9, %v3959_v10 }
 0xc81   : > { %3616 = vmatprep.subr.bf16.mxu0 %v3959_v10 }
 0xc82   : > { %v4493_v57 = vld [vmem:[#allocation5 + $0x18] sm:$0x1f]  }
 0xc83   : > { %v2419_v59 = vsel %vm1273_vm13, %v4493_v57, 0 }
 0xc86   : > { %v2407_v60 = vld [vmem:[#allocation4 + $0xc] sm:$0xf] }
 0xc87   : > { %3607 = vmatmul.mubr.msk.bf16.vlgmr.msra.gmra.mxu0 %vm1273_vm13, %v2282_v58 }
 0xc88   : > { %3617 = vmatpush3.bf16.xpose.msra.mxu0 %v2419_v59  ;;  %3618 = vmatprep.mubr.msk.bf16.mxu0 %vm3962_vm9, %v3959_v10 }
 0xc89   : > { %3628 = vmatprep.subr.bf16.mxu0 %v3959_v10 }
 0xc8f   : > { %3619 = vmatmul.mubr.msk.bf16.vlgmr.msra.gmra.mxu0 %vm1273_vm13, %v2407_v60 }
 0xc90   : > { %3632 = vmatprep.mubr.msk.bf16.mxu0 %vm3962_vm9, %v3959_v10 }
 0xccc   : > { %v2079_v62 = vpop.f32.mrf.mxu0 }
 0xccd   : > { %v2085_v11 = vmul.f32 0.35355338, %v2079_v62 }
 0xcce   : > { %v3584_v63 = vpop.f32.mrf.mxu0 }
 0xccf   : > { %v2092_v23 = vadd.f32 %v2090_v61, %v2085_v11 }
 0xcd0   : > { %v2082_v0 = vpop.f32.mrf.mxu0 }
 0xcd1   : > { %v2094_v2 = vsel %vm2093_vm11, %v2092_v23, -inf }
 0xcd2   : > { %2095 = vmax.xlane.f32.xlu1 %v2094_v2  ;;  %v3585_v4 = vpop.f32.mrf.mxu0 }
 0xd3f   : > { %v2205_v8 = vpop.f32.mrf.mxu0 }
 0xd40   : > { %v2211_v9 = vmul.f32 0.35355338, %v2205_v8 }
 0xd41   : > { %v3596_v12 = vpop.f32.mrf.mxu0 }
 0xd42   : > { %v2212_v14 = vadd.f32 %v2211_v9, %v2090_v61 }
 0xd43   : > { %v2208_v15 = vpop.f32.mrf.mxu0 }
 0xd44   : > { %v2213_v5 = vsel %vm2093_vm11, %v2212_v14, -inf }
 0xd45   : > { %2214 = vmax.xlane.f32.xlu0 %v2213_v5  ;;  %v3597_v16 = vpop.f32.mrf.mxu0 }
 0xd47   : > { %v2330_v3 = vpop.f32.mrf.mxu0 }
 0xd48   : > { %v2336_v6 = vmul.f32 0.35355338, %v2330_v3 }
 0xd49   : > { %v3608_v17 = vpop.f32.mrf.mxu0 }
 0xd4a   : > { %v2337_v18 = vadd.f32 %v2336_v6, %v2090_v61 }
 0xd4b   : > { %v2333_v19 = vpop.f32.mrf.mxu0 }
 0xd4c   : > { %v2338_v20 = vsel %vm2093_vm11, %v2337_v18, -inf }
 0xd4d   : > { %2339 = vmax.xlane.f32.xlu0 %v2338_v20  ;;  %v3609_v21 = vpop.f32.mrf.mxu0 }
 0xd4f   : > { %v2455_v22 = vpop.f32.mrf.mxu0 }
 0xd50   : > { %v2461_v13 = vmul.f32 0.35355338, %v2455_v22 }
 0xd51   : > { %v3620_v24 = vpop.f32.mrf.mxu0 }
 0xd52   : > { %v2462_v25 = vadd.f32 %v2461_v13, %v2090_v61 }
 0xd53   : > { %v2458_v26 = vpop.f32.mrf.mxu0 }
 0xd54   : > { %v2463_v27 = vsel %vm2093_vm11, %v2462_v25, -inf }
 0xd55   : > { %2464 = vmax.xlane.f32.xlu0 %v2463_v27  ;;  %v3621_v28 = vpop.f32.mrf.mxu0  ;;  %v3764_v27 = vld [vmem:[%s4247_s20 + $0x8] sm:$0xff]  }
 0xd56   : > { %3629 = vmatpush3.bf16.msra.mxu0 %v3764_v27  ;;  %v3776_v27 = vld [vmem:[%s4278_s1 + $0x18] sm:$0xff]  }
 0xd57   : > { %3630 = vmatprep.subr.bf16.mxu0 %v3959_v10 }
 0xd5b   : > { %v2096_v29 = vpop.xlane.xlu1 %2095 }
 0xd5c   : > { %v2097_v30 = vsub.f32 %v2092_v23, %v2096_v29  ;;  %v3765_v29 = vld [vmem:[%s4247_s20] sm:$0xff]   ;;  %s4822_s20 = sld [smem:[#allocation36_spill]] (!%p3407_p1) }
 0xd5d   : > { %3631 = vmatpush3.bf16.msra.mxu0 %v3765_v29  ;;  %v3778_v29 = vld [vmem:[%s4278_s1 + $0x8] sm:$0xff]  }
 0xd5e   : > { %v2098_v31 = vmul.f32 1.442695, %v2097_v30  ;;  %2885 = vmatprep.subr.bf16.mxu0 %v3958_v7 }
 0xd60   : > { %3810 = vpow2.f32 %v2098_v31 }
 0xd6d   : > { %v3811_v32 = vpop.eup %3810 }
 0xd6e   : > { %v2100_v33 = vsel %vm2093_vm11, %v3811_v32, 0.0 }
 0xd6f   : > { %2101 = vadd.xlane.f32.xlu1 %v2100_v33 }
 0xd80   : > { %2106 = vrot.lane.b32.xlu1 %v4458_v34, %s3966_s11 }
 0xdce   : > { %v2215_v35 = vpop.xlane.xlu0 %2214 }
 0xdcf   : > { %v2216_v36 = vsub.f32 %v2212_v14, %v2215_v35 }
 0xdd1   : > { %v2217_v37 = vmul.f32 1.442695, %v2216_v36 }
 0xdd3   : > { %3812 = vpow2.f32 %v2217_v37 }
 0xdd6   : > { %v2340_v38 = vpop.xlane.xlu0 %2339 }
 0xdd7   : > { %v2341_v39 = vsub.f32 %v2337_v18, %v2340_v38 }
 0xdd9   : > { %v2342_v40 = vmul.f32 1.442695, %v2341_v39 }
 0xddb   : > { %3814 = vpow2.f32 %v2342_v40 }
 0xdde   : > { %v2465_v41 = vpop.xlane.xlu0 %2464 }
 0xddf   : > { %v2466_v42 = vsub.f32 %v2462_v25, %v2465_v41 }
 0xde0   : > { %v3813_v43 = vpop.eup %3812 }
 0xde1   : > { %v2467_v44 = vmul.f32 1.442695, %v2466_v42  ;;  %v2219_v46 = vsel %vm2093_vm11, %v3813_v43, 0.0 }
 0xde2   : > { %2220 = vadd.xlane.f32.xlu0 %v2219_v46 }
 0xde3   : > { %3816 = vpow2.f32 %v2467_v44 }
 0xde8   : > { %v3815_v47 = vpop.eup %3814 }
 0xde9   : > { %v2344_v48 = vsel %vm2093_vm11, %v3815_v47, 0.0 }
 0xdea   : > { %2345 = vadd.xlane.f32.xlu1 %v2344_v48 }
 0xdf0   : > { %v3817_v34 = vpop.eup %3816 }
 0xdf1   : > { %v2469_v49 = vsel %vm2093_vm11, %v3817_v34, 0.0 }
 0xdf2   : > { %2470 = vadd.xlane.f32.xlu0 %v2469_v49 }
 0xdf8   : > { %v2102_v50 = vpop.xlane.xlu1 %2101 }
 0xdf9   : > { %3818 = vrcp.f32 %v2102_v50 }
 0xdfb   : > { %2350 = vrot.lane.b32.xlu1 %v4484_v52, %s3966_s11 }
 0xdfc   : > { %v2107_v51 = vpop.permute.xlu1 %2106 }
 0xdfd   : > { %v2113_v53 = vsel %vm2111_vm12, %v2107_v51, 0 }
 0xdfe   : > { %3587 = vmatpush3.bf16.msra.mxu1 %v2113_v53 }
 0xdff   : > { %2475 = vrot.lane.b32.xlu1 %v4493_v57, %s3966_s11  ;;  %3598 = vmatprep.subr.bf16.mxu1 %v3959_v10 }
 0xe06   : > { %v3819_v54 = vpop.eup %3818 }
 0xe07   : > { %v2104_v56 = vmul.f32 %v3819_v54, %v3811_v32 }
 0xe08   : > { %2225 = vrot.lane.b32.xlu0 %v4471_v45, %s3966_s11 }
 0xe09   : > { %v2105_v58 = vpack.c.bf16 %v2104_v56, %v2104_v56 }
 0xe0b   : > { %3589 = vmatmul.mubr.msk.bf16.vlgmr.msra.gmra.mxu1 %vm2093_vm11, %v2105_v58  ;;  %v3766_v58 = vld [vmem:[%s4273_s3 + $0x28] sm:$0xff]  }
 0xe0c   : > { %3600 = vmatprep.mubr.msk.bf16.mxu1 %vm3962_vm9, %v3959_v10 }
 0xe6b   : > { %v2221_v52 = vpop.xlane.xlu0 %2220 }
 0xe6c   : > { %3820 = vrcp.f32 %v2221_v52  ;;  %v3768_v52 = vld [vmem:[%s4273_s3 + $0x18] sm:$0xff]  }
 0xe73   : > { %v2346_v59 = vpop.xlane.xlu1 %2345 }
 0xe74   : > { %3822 = vrcp.f32 %v2346_v59 }
 0xe77   : > { %v2351_v23 = vpop.permute.xlu1 %2350 }
 0xe78   : > { %v2356_v4 = vsel %vm2111_vm12, %v2351_v23, 0 }
 0xe79   : > { %v3821_v60 = vpop.eup %3820 }
 0xe7a   : > { %v2223_v57 = vmul.f32 %v3821_v60, %v3813_v43 }
 0xe7b   : > { %v2471_v61 = vpop.xlane.xlu0 %2470  ;;  %v2476_v12 = vpop.permute.xlu1 %2475 }
 0xe7c   : > { %3824 = vrcp.f32 %v2471_v61  ;;  %v2224_v45 = vpack.c.bf16 %v2223_v57, %v2223_v57  ;;  %v2281_v0 = vadd.f32 %v2223_v57, %v2104_v56  ;;  %v2481_v5 = vsel %vm2111_vm12, %v2476_v12, 0  ;;  %v3771_v12 = vld [vmem:[%s4273_s3] sm:$0xff]  }
 0xe7f   : > { %v2226_v62 = vpop.permute.xlu0 %2225 }
 0xe80   : > { %v2231_v11 = vsel %vm2111_vm12, %v2226_v62, 0 }
 0xe81   : > { %v3823_v63 = vpop.eup %3822  ;;  %3599 = vmatpush3.bf16.msra.mxu1 %v2231_v11 }
 0xe82   : > { %3610 = vmatprep.subr.bf16.mxu1 %v3959_v10  ;;  %v2348_v2 = vmul.f32 %v3823_v63, %v3815_v47 }
 0xe84   : > { %3601 = vmatmul.mubr.msk.bf16.vlgmr.msra.gmra.mxu1 %vm2093_vm11, %v2224_v45  ;;  %v2406_v8 = vadd.f32 %v2348_v2, %v2281_v0  ;;  %v2349_v14 = vpack.c.bf16 %v2348_v2, %v2348_v2  ;;  %v3769_v45 = vld [vmem:[%s4273_s3 + $0x10] sm:$0xff]   ;;  %v3378_v0 = vld [vmem:[%s4814_s6] ss:$0 sm:$0xff]  ;;  %v3770_v2 = vld [vmem:[%s4273_s3 + $0x8] sm:$0xff]  }
 0xe85   : > { %3611 = vmatpush3.bf16.msra.mxu1 %v2356_v4  ;;  %3612 = vmatprep.mubr.msk.bf16.mxu1 %vm3962_vm9, %v3959_v10 }
 0xe86   : > { %3622 = vmatprep.subr.bf16.mxu1 %v3959_v10 }
 0xe89   : > { %v3825_v9 = vpop.eup %3824 }
 0xe8a   : > { %v2473_v15 = vmul.f32 %v3825_v9, %v3817_v34  ;;  %v3379_v9 = vld [vmem:[%s4815_s4] ss:$0 sm:$0xff] }
 0xe8c   : > { %3613 = vmatmul.mubr.msk.bf16.vlgmr.msra.gmra.mxu1 %vm2093_vm11, %v2349_v14  ;;  %v2531_v16 = vadd.f32 %v2473_v15, %v2406_v8  ;;  %v2474_v6 = vpack.c.bf16 %v2473_v15, %v2473_v15 }
 0xe8d   : > { %3623 = vmatpush3.bf16.msra.mxu1 %v2481_v5  ;;  %3624 = vmatprep.mubr.msk.bf16.mxu1 %vm3962_vm9, %v3959_v10 }
 0xe8e   : > { %v4539_v3 = vmul.f32 0.25, %v2531_v16  ;;  %3636 = vmatprep.subr.bf16.mxu1 %v3959_v10 }
 0xe94   : > { %3625 = vmatmul.mubr.msk.bf16.vlgmr.msra.gmra.mxu1 %vm2093_vm11, %v2474_v6 }
 0xe95   : > { %3648 = vmatprep.mubr.msk.bf16.mxu1 %vm3962_vm9, %v3959_v10  ;;  %3637 = vmatpush3.bf16.msra.mxu1 %v3766_v58 }
 0xe96   : > { %3638 = vmatprep.subr.bf16.mxu1 %v3959_v10 }
 0xecb   : > { %v2149_v17 = vpop.f32.mrf.mxu1 }
 0xecc   : > { %v2155_v18 = vpack.c.bf16 %v2149_v17, %v2149_v17 }
 0xecd   : > { %v3590_v19 = vpop.f32.mrf.mxu1 }
 0xece   : > { %2156 = vst.msk [vmem:[#allocation6] sm:$0xf] %vm1384_vm15, %v2155_v18  ;;  %vm2648_vm15 = vcmask 519424  }
 0xecf   : > { %v2152_v20 = vpop.f32.mrf.mxu1 }
 0xed1   : > { %v3591_v21 = vpop.f32.mrf.mxu1 }
 0xf44   : > { %v2267_v22 = vpop.f32.mrf.mxu1 }
 0xf45   : > { %v3429_v13 = vpack.c.bf16 %v2267_v22, %v2267_v22 }
 0xf46   : > { %v3602_v24 = vpop.f32.mrf.mxu1 }
 0xf47   : > { %2277 = vrot.lane.b32.xlu1 %v3429_v13, %s3968_s15  ;;  %v3772_v13 = vld [vmem:[%s4278_s1 + $0x38] sm:$0xff]   ;;  %v3773_v24 = vld [vmem:[%s4278_s1 + $0x30] sm:$0xff]   ;;  %s4816_s15 = sld [smem:[#allocation44_spill]] }
 0xf48   : > { %v2270_v25 = vpop.f32.mrf.mxu1 }
 0xf49   : > { %v3774_v25 = vld [vmem:[%s4278_s1 + $0x28] sm:$0xff]  }
 0xf4a   : > { %v3603_v26 = vpop.f32.mrf.mxu1 }
 0xf4b   : > { %v3775_v26 = vld [vmem:[%s4278_s1 + $0x20] sm:$0xff]  }
 0xf4c   : > { %v2392_v28 = vpop.f32.mrf.mxu1 }
 0xf4d   : > { %v3430_v30 = vpack.c.bf16 %v2392_v28, %v2392_v28  ;;  %v3777_v28 = vld [vmem:[%s4278_s1 + $0x10] sm:$0xff]  }
 0xf4e   : > { %v3614_v31 = vpop.f32.mrf.mxu1 }
 0xf4f   : > { %2402 = vrot.lane.b32.xlu0 %v3430_v30, %s3969_s21  ;;  %v3779_v30 = vld [vmem:[%s4278_s1] sm:$0xff]   ;;  %v3780_v31 = vld [vmem:[%s4278_s1 + $0x58] sm:$0xff]   ;;  %s4817_s21 = scalar_lea.vmem %s4816_s15, %s4180_s29 }
 0xf50   : > { %v2395_v32 = vpop.f32.mrf.mxu1 }
 0xf51   : > { %v3781_v32 = vld [vmem:[%s4278_s1 + $0x50] sm:$0xff]  }
 0xf52   : > { %v3615_v33 = vpop.f32.mrf.mxu1 }
 0xf53   : > { %v3382_v33 = vld [vmem:[%s4817_s21] ss:$0 sm:$0xff] }
 0xf54   : > { %v2517_v35 = vpop.f32.mrf.mxu1 }
 0xf55   : > { %v3431_v36 = vpack.c.bf16 %v2517_v35, %v2517_v35  ;;  %v3782_v35 = vld [vmem:[%s4278_s1 + $0x48] sm:$0xff]  }
 0xf56   : > { %v3626_v37 = vpop.f32.mrf.mxu1 }
 0xf57   : > { %2527 = vrot.lane.b32.xlu1 %v3431_v36, %s3970_s8 }
 0xf58   : > { %v2520_v38 = vpop.f32.mrf.mxu1 }
 0xf5a   : > { %v3627_v39 = vpop.f32.mrf.mxu1 }
 0xf5b   : > { %v3783_v39 = vld [vmem:[%s4278_s1 + $0x40] sm:$0xff]  }
 0xfb9   : > { %v2278_v40 = vpop.permute.xlu1 %2277 }
 0xfba   : > { %2280 = vst.msk [vmem:[#allocation6] sm:$0xf] %vm1507_vm2, %v2278_v40  ;;  %vm2657_vm2 = vcmask 781824  }
 0xfc1   : > { %v2403_v41 = vpop.permute.xlu0 %2402 }
 0xfc2   : > { %2405 = vst.msk [vmem:[#allocation6] sm:$0xf] %vm1630_vm3, %v2403_v41  ;;  %vm2715_vm3 = vcmask 785408  }
 0xfc9   : > { %v2528_v42 = vpop.permute.xlu1 %2527 }
 0xfca   : > { %2530 = vst.msk [vmem:[#allocation6] sm:$0xf] %vm1753_vm4, %v2528_v42  ;;  %vm2763_vm4 = vcmask 519168  }
 0xfd1   : > { %v2533_v43 = vld [vmem:[#allocation6] sm:$0xf] }
 0xfd2   : > { %3633 = vmatmul.mubr.msk.bf16.vlgmr.msra.gmra.mxu0 %vm1150_vm8, %v2533_v43 }
 0xfd3   : > { %2886 = vmatpush1.bf16.msra.mxu0 %v3772_v13 }
 0xfd4   : > { %2887 = vmatprep.subr.bf16.mxu0 %v3958_v7 }
 0xfd7   : > { %2888 = vmatpush1.bf16.msra.mxu0 %v3773_v24 }
 0xfd8   : > { %2889 = vmatprep.subr.bf16.mxu0 %v3958_v7 }
 0xfdb   : > { %2890 = vmatpush1.bf16.msra.mxu0 %v3774_v25 }
 0xfdc   : > { %2891 = vmatprep.subr.bf16.mxu0 %v3958_v7 }
 0xfdf   : > { %2892 = vmatpush1.bf16.msra.mxu0 %v3775_v26 }
 0xfe0   : > { %2893 = vmatprep.subr.bf16.mxu0 %v3958_v7 }
 0xfe3   : > { %2894 = vmatpush1.bf16.msra.mxu0 %v3776_v27 }
 0xfe4   : > { %2895 = vmatprep.subr.bf16.mxu0 %v3958_v7 }
 0xfe7   : > { %2896 = vmatpush1.bf16.msra.mxu0 %v3777_v28 }
 0xfe8   : > { %2897 = vmatprep.subr.bf16.mxu0 %v3958_v7 }
 0xfeb   : > { %2898 = vmatpush1.bf16.msra.mxu0 %v3778_v29 }
 0xfec   : > { %2899 = vmatprep.subr.bf16.mxu0 %v3958_v7 }
 0xfef   : > { %2900 = vmatpush1.bf16.msra.mxu0 %v3779_v30 }
 0xff0   : > { %2909 = vmatprep.subr.bf16.mxu0 %v3958_v7 }
 0xff3   : > { %2910 = vmatpush2.bf16.msra.mxu0 %v3780_v31 }
 0xff4   : > { %2911 = vmatprep.subr.bf16.mxu0 %v3958_v7 }
 0xff7   : > { %2912 = vmatpush2.bf16.msra.mxu0 %v3781_v32 }
 0xff8   : > { %2913 = vmatprep.subr.bf16.mxu0 %v3958_v7 }
 0xffb   : > { %2914 = vmatpush2.bf16.msra.mxu0 %v3782_v35 }
 0xffc   : > { %2915 = vmatprep.subr.bf16.mxu0 %v3958_v7 }
 0xfff   : > { %2916 = vmatpush2.bf16.msra.mxu0 %v3783_v39 }
0x1092   : > { %v2587_v44 = vpop.f32.mrf.mxu0 }
0x1093   : > { %v4558_v46 = vadd.f32 %v2587_v44, %v4421_v55  ;;  %v3767_v55 = vld [vmem:[%s4273_s3 + $0x20] sm:$0xff]   ;;  %s3973_s3 = smov 32  }
0x1094   : > { %v3634_v47 = vpop.f32.mrf.mxu0  ;;  %3639 = vmatpush3.bf16.msra.mxu1 %v3767_v55 }
0x1095   : > { %v2596_v48 = vsel %vm1150_vm8, %v4558_v46, 0.0  ;;  %3640 = vmatprep.subr.bf16.mxu1 %v3959_v10 }
0x1096   : > { %2597 = vadd.xlane.f32.xlu0 %v2596_v48  ;;  %v2590_v34 = vpop.f32.mrf.mxu0 }
0x1098   : > { %v3635_v49 = vpop.f32.mrf.mxu0  ;;  %3641 = vmatpush3.bf16.msra.mxu1 %v3768_v52 }
0x1099   : > { %3642 = vmatprep.subr.bf16.mxu1 %v3959_v10 }
0x109c   : > { %3643 = vmatpush3.bf16.msra.mxu1 %v3769_v45 }
0x109d   : > { %3644 = vmatprep.subr.bf16.mxu1 %v3959_v10 }
0x10a0   : > { %3645 = vmatpush3.bf16.msra.mxu1 %v3770_v2 }
0x10a1   : > { %3646 = vmatprep.subr.bf16.mxu1 %v3959_v10 }
0x10a4   : > { %3647 = vmatpush3.bf16.msra.mxu1 %v3771_v12 }
0x111f   : > { %v2598_v50 = vpop.xlane.xlu0 %2597 }
0x1120   : > { %v2599_v51 = vmul.f32 0.03125, %v2598_v50 }
0x1122   : > { %v2600_v53 = vsub.f32 %v4558_v46, %v2599_v51 }
0x1124   : > { %v2601_v54 = vmul.f32 %v2600_v53, %v2600_v53  ;;  %v2612_v4 = vmul.f32 %v3378_v0, %v2600_v53 }
0x1126   : > { %v2602_v56 = vsel %vm1150_vm8, %v2601_v54, 0.0 }
0x1127   : > { %2603 = vadd.xlane.f32.xlu1 %v2602_v56 }
0x11b0   : > { %v2604_v59 = vpop.xlane.xlu1 %2603 }
0x11b1   : > { %v2605_v60 = vmul.f32 0.032258064, %v2604_v59 }
0x11b3   : > { %3826 = vrsqrt.f32 %v2605_v60  ;;  %vm2615_vm9 = vcmp.eq.f32.partialorder %v2605_v60, inf  ;;  %v2618_v62 = vand.u32 2147483648, %v2605_v60  ;;  %vm2617_vm13 = vcmp.eq.f32.partialorder %v2605_v60, 0.0 }
0x11c0   : > { %v3827_v61 = vpop.eup %3826 }
0x11c1   : > { %v2614_v57 = vmul.f32 %v3827_v61, %v2605_v60 }
0x11c3   : > { %v2616_v11 = vsel %vm2615_vm9, %v2605_v60, %v2614_v57 }
0x11c4   : > { %v2619_v63 = vsel %vm2617_vm13, %v2618_v62, %v2616_v11 }
0x11c5   : > { %v2620_v23 = vadd.f32 1e-06, %v2619_v63 }
0x11c7   : > { %3828 = vrcp.f32 %v2620_v23 }
0x11d4   : > { %v3829_v8 = vpop.eup %3828 }
0x11d5   : > { %v2622_v14 = vmul.f32 %v3829_v8, %v2612_v4 }
0x11d7   : > { %v2629_v15 = vadd.f32 %v3379_v9, %v2622_v14 }
0x11d9   : > { %v3433_v5 = vpack.c.bf16 %v2629_v15, %v2629_v15  ;;  %v2637_v16 = vrot.slane %v2629_v15, 7  ;;  %v2630_v6 = vrot.slane %v2629_v15, 6 }
0x11db   : > { %2654 = vrot.lane.b32.xlu1 %v3433_v5, %s3972_s0  ;;  %v2640_v17 = vsel %vm1074_vm0, %v2637_v16, 0.0  ;;  %v2633_v18 = vsel %vm1075_vm1, %v2630_v6, 0.0 }
0x11dc   : > { %v3432_v19 = vpack.c.bf16 %v2640_v17, %v2640_v17  ;;  %v2634_v20 = vpack.c.bf16 %v2633_v18, %v2633_v18 }
0x11de   : > { %2645 = vrot.lane.b32.xlu0 %v3432_v19, %s3973_s3  ;;  %2636 = vst.msk [vmem:[#allocation7] sm:$0xf] %vm2635_vm14, %v2634_v20 }
0x124d   : > { %v2655_v21 = vpop.permute.xlu1 %2654 }
0x1250   : > { %v2646_v10 = vpop.permute.xlu0 %2645 }
0x1251   : > { %2649 = vst.msk [vmem:[#allocation7] sm:$0xf] %vm2648_vm15, %v2646_v10 }
0x1252   : > { %2658 = vst.msk [vmem:[#allocation7] sm:$0xf] %vm2657_vm2, %v2655_v21 }
0x1259   : > { %v2659_v22 = vld [vmem:[#allocation7] sm:$0xf] }
0x125a   : > { %3649 = vmatmul.mubr.msk.bf16.vlgmr.msra.gmra.mxu1 %vm2715_vm3, %v2659_v22 }
0x131a   : > { %v2753_v36 = vpop.f32.mrf.mxu1 }
0x131b   : > { %v2754_v37 = vadd.f32 %v3382_v33, %v2753_v36 }
0x131c   : > { %v3650_v38 = vpop.f32.mrf.mxu1 }
0x131d   : > { %v2759_v40 = vmax.f32 %v2754_v37, 0.0 }
0x131e   : > { %v2756_v41 = vpop.f32.mrf.mxu1 }
0x131f   : > { %v2760_v42 = vrot.slane %v2759_v40, 6  ;;  %v2776_v43 = vpack.c.bf16 %v2759_v40, %v2759_v40  ;;  %v2765_v44 = vrot.slane %v2759_v40, 7 }
0x1320   : > { %v3651_v47 = vpop.f32.mrf.mxu1 }
0x1321   : > { %v2761_v48 = vsel %vm1075_vm1, %v2760_v42, 0.0  ;;  %v2766_v34 = vsel %vm1074_vm0, %v2765_v44, 0.0  ;;  %2777 = vst.msk [vmem:[#allocation8 + $0x4] sm:$0xf] %vm2763_vm4, %v2776_v43 }
0x1322   : > { %v3434_v49 = vpack.c.bf16 %v2766_v34, %v2766_v34  ;;  %v2762_v50 = vpack.c.bf16 %v2761_v48, %v2761_v48 }
0x1324   : > { %2771 = vrot.lane.b32.xlu0 %v3434_v49, %s3972_s0  ;;  %2764 = vst.msk [vmem:[#allocation8] sm:$0xf] %vm2763_vm4, %v2762_v50 }
0x1396   : > { %v2772_v7 = vpop.permute.xlu0 %2771 }
0x1397   : > { %2775 = vst.msk [vmem:[#allocation8] sm:$0xf] %vm2774_vm5, %v2772_v7 }
0x139e   : > { %v2778_v51 = vld [vmem:[#allocation8] sm:$0xff] }
0x139f   : > { %v3392_v53 = vcombine.high %v2778_v51, %v2778_v51  ;;  %v3391_v54 = vcombine.low %v2778_v51, %v2778_v51 }
0x13a1   : > { %3405 = vmatprep.mubr.msk.bf16.mxu0 %vm2881_vm6, %v3392_v53 }
0x13a2   : > { %2918 = vmatmul.mubr.bf16.vlgmr.msra.gmra.mxu0 %v3391_v54 }
0x1462   : > { %v2919_v56 = vpop.f32.mrf.mxu0 }
0x1463   : > { %v2925_v58 = vadd.f32 %v2919_v56, %v4558_v46 }
0x1464   : > { %v2921_v55 = vpop.f32.mrf.mxu0  ;;  %2938 = sbr.rel (%p3407_p1) target bundleno = 5551 (0x15af), region = 120 }
0x1465   : > { %v2933_v52 = vadd.f32 %v3406_v1, %v2925_v58 }
0x1466   : > { %v2922_v59 = vpop.f32.mrf.mxu0 }
0x1467   : > { %2934 = vst.msk [vmem:[#allocation2] sm:$0xff] %vm1150_vm8, %v2933_v52 }
0x1468   : > { %v2923_v60 = vpop.f32.mrf.mxu0 }
0x1469   : > { %v2941_v61 = vsel %vm1150_vm8, %v2933_v52, 0.0  ;;  %v2977_v46 = vsel %vm2093_vm11, %v4539_v3, 0.0  ;;  %v3408_v15 = vld [vmem:[%s4821_s26] ss:$0 sm:$0xff] }
0x146a   : > { %2942 = vadd.xlane.f32.xlu0 %v2941_v61  ;;  %2978 = vst [vmem:[%s4286_s14] sm:$0xff] %v2977_v46  ;;  %v3409_v16 = vld [vmem:[%s4822_s20] ss:$0 sm:$0xff] }
0x14f3   : > { %v2943_v57 = vpop.xlane.xlu0 %2942 }
0x14f4   : > { %v2944_v62 = vmul.f32 0.03125, %v2943_v57 }
0x14f6   : > { %v2945_v11 = vsub.f32 %v2933_v52, %v2944_v62 }
0x14f8   : > { %v2946_v63 = vmul.f32 %v2945_v11, %v2945_v11  ;;  %v2957_v5 = vmul.f32 %v3408_v15, %v2945_v11 }
0x14fa   : > { %v2947_v23 = vsel %vm1150_vm8, %v2946_v63, 0.0 }
0x14fb   : > { %2948 = vadd.xlane.f32.xlu0 %v2947_v23 }
0x1584   : > { %v2949_v45 = vpop.xlane.xlu0 %2948 }
0x1585   : > { %v2950_v0 = vmul.f32 0.032258064, %v2949_v45 }
0x1587   : > { %3830 = vrsqrt.f32 %v2950_v0  ;;  %vm2960_vm0 = vcmp.eq.f32.partialorder %v2950_v0, inf  ;;  %v2963_v8 = vand.u32 2147483648, %v2950_v0  ;;  %vm2962_vm1 = vcmp.eq.f32.partialorder %v2950_v0, 0.0 }
0x1594   : > { %v3831_v2 = vpop.eup %3830 }
0x1595   : > { %v2959_v4 = vmul.f32 %v3831_v2, %v2950_v0 }
0x1597   : > { %v2961_v9 = vsel %vm2960_vm0, %v2950_v0, %v2959_v4 }
0x1598   : > { %v2964_v12 = vsel %vm2962_vm1, %v2963_v8, %v2961_v9 }
0x1599   : > { %v2965_v14 = vadd.f32 1e-06, %v2964_v12 }
0x159b   : > { %3832 = vrcp.f32 %v2965_v14 }
0x15a8   : > { %v3833_v3 = vpop.eup %3832 }
0x15a9   : > { %v2967_v6 = vmul.f32 %v3833_v3, %v2957_v5 }
0x15ab   : > { %v2974_v17 = vadd.f32 %v3409_v16, %v2967_v6 }
0x15ad   : > { %v2975_v18 = vsel %vm1150_vm8, %v2974_v17, 0.0 }
0x15ae   : > { %2976 = vst [vmem:[%s4282_s19] sm:$0xff] %v2975_v18 }
0x15af PF: > { %s4823_s27 = sld [smem:[#allocation19_spill]]  ;;  %s2998_s10 = sshll.u32 %s4282_s19, 4  ;;  %s2999_s10 = int_to_ptr.vmem [resolvable:$true] %s2998_s10 }
0x15b0   : > { %s4825_s0 = sld [smem:[#allocation47_spill]]  ;;  %s2980_s15 = scalar_lea.sflag [#allocation10], %s4171_s30 }
0x15b1   : > { %s3834_s21 = scalar_lea.vmem %s2999_s10, 128  ;;  %s3974_s1 = smov [#allocation9]  }
0x15b2   : > { %p3835_p2 = scmp.ne.s32.totalorder %s2999_s10, %s3834_s21  ;;  %s3838_s8 = sshll.u32 %s3974_s1, 4  ;;  %s3839_s8 = int_to_ptr.vmem [resolvable:$false] %s3838_s8 }
0x15b3   : > { %s3840_s24 = scalar_lea.vmem %s3839_s8, 256  ;;  %p3841_p6 = scmp.lt.s32.totalorder %s2999_s10, %s3839_s8 }
0x15b4   : > { %p3836_p4 = pnand %p3835_p2, %p4150_p3  ;;  %p3842_p7 = scmp.lt.s32.totalorder %s3840_s24, %s3834_s21 }
0x15b5   : > { %s3412_s25 = sshll.u32 %s4823_s27, 7 }
0x15b6   : > { %s4826_s3 = smov %s4825_s0  ;;  %s2996_s11 = scalar_lea.hbm %s4825_s0, %s3412_s25 }
0x15b7   : > { %p3837_p5 = pneg %p3836_p4  ;;  %p3843_p8 = por %p3842_p7, %p3841_p6 }
0x15b9   : > { %p3844_p10 = pnand %p3843_p8, %p3837_p5 }
0x15bb   : > { %3847 = shalt.err (!%p3844_p10)
}
0x15bc   : > { %s3848_s28 = scalar_lea.hbm %s2996_s11, 128  ;;  %s3852_s29 = scalar_lea.hbm %s4826_s3, 256 }
0x15bd   : > { %p3849_p11 = scmp.ne.s32.totalorder %s2996_s11, %s3848_s28  ;;  %p3853_p0 = scmp.lt.s32.totalorder %s2996_s11, %s4826_s3 }
0x15be   : > { %p3854_p1 = scmp.lt.s32.totalorder %s3852_s29, %s3848_s28 }
0x15bf   : > { %p3850_p12 = pnand %p3849_p11, %p4150_p3 }
0x15c0   : > { %p3855_p2 = por %p3854_p1, %p3853_p0 }
0x15c1   : > { %p3851_p13 = pneg %p3850_p12 }
0x15c3   : > { %p3856_p4 = pnand %p3855_p2, %p3851_p13 }
0x15c5   : > { %3859 = shalt.err (!%p3856_p4)
}
0x15c6   : > { %3654 = dma.vmem_to_hbm [thread:$0]  (%p4150_p3), %s2999_s10, 128, %s2996_s11, %s2980_s15  }
0x15c7   : > { %s4827_s20 = sld [smem:[#allocation48_spill]]  ;;  %s3011_s4 = sshll.u32 %s4286_s14, 4  ;;  %s3012_s4 = int_to_ptr.vmem [resolvable:$true] %s3011_s4 }
0x15c8   : > { %s2985_s0 = scalar_lea.sflag [#allocation12], %s4171_s30  ;;  %s3860_s21 = scalar_lea.vmem %s3012_s4, 128 }
0x15c9   : > { %p3861_p5 = scmp.ne.s32.totalorder %s3012_s4, %s3860_s21  ;;  %s3975_s1 = smov [#allocation11]  }
0x15ca   : > { %s3864_s8 = sshll.u32 %s3975_s1, 4  ;;  %s3865_s8 = int_to_ptr.vmem [resolvable:$false] %s3864_s8 }
0x15cb   : > { %p3862_p6 = pnand %p3861_p5, %p4150_p3  ;;  %s3866_s24 = scalar_lea.vmem %s3865_s8, 256 }
0x15cc   : > { %p3867_p8 = scmp.lt.s32.totalorder %s3012_s4, %s3865_s8  ;;  %p3868_p10 = scmp.lt.s32.totalorder %s3866_s24, %s3860_s21 }
0x15cd   : > { %s3009_s23 = scalar_lea.hbm %s4827_s20, %s3412_s25  ;;  %p3863_p7 = pneg %p3862_p6 }
0x15ce   : > { %p3869_p11 = por %p3868_p10, %p3867_p8 }
0x15d0   : > { %p3870_p12 = pnand %p3869_p11, %p3863_p7 }
0x15d2   : > { %3873 = shalt.err (!%p3870_p12)
}
0x15d3   : > { %s3874_s27 = scalar_lea.hbm %s3009_s23, 128  ;;  %s3878_s25 = scalar_lea.hbm %s4827_s20, 256 }
0x15d4   : > { %p3875_p13 = scmp.ne.s32.totalorder %s3009_s23, %s3874_s27  ;;  %p3879_p2 = scmp.lt.s32.totalorder %s3009_s23, %s4827_s20 }
0x15d5   : > { %p3880_p4 = scmp.lt.s32.totalorder %s3878_s25, %s3874_s27 }
0x15d6   : > { %p3876_p0 = pnand %p3875_p13, %p4150_p3 }
0x15d7   : > { %p3881_p5 = por %p3880_p4, %p3879_p2 }
0x15d8   : > { %p3877_p1 = pneg %p3876_p0 }
0x15da   : > { %p3882_p6 = pnand %p3881_p5, %p3877_p1 }
0x15dc   : > { %3885 = shalt.err (!%p3882_p6)
}
0x15dd   : > { %3655 = dma.vmem_to_hbm [thread:$0]  (%p4150_p3), %s3012_s4, 128, %s3009_s23, %s2985_s0  }
0x15de PF: > { %s4828_s15 = sld [smem:[#allocation22_spill]] }
0x15df   : > { %s4829_s28 = sld [smem:[#allocation15_spill]] }
0x15e4   : > { %p3665_p7 = scmp.ge.s32.totalorder %s4828_s15, 2 }
0x15e5   : > { %s3023_s5 = sand.u32 1, %s4829_s28  }
0x15e6   : > { %p3659_p8 = pnand %p3665_p7, %p4160_p9  ;;  %s3024_s29 = scalar_lea.sflag [#allocation10], %s3023_s5 }
0x15e8   : > { %p3660_p10 = pneg %p3659_p8 }
0x15ea   : > { %3919 = dma.done.wait (%p3660_p10), %s3024_s29, 128  }
0x15eb   : > { %3921 = vsyncadd (%p3660_p10), %s3024_s29, 4294967168  ;;  %s3033_s22 = scalar_lea.sflag [#allocation12], %s3023_s5 }
0x15ec   : > { %3923 = dma.done.wait (%p3660_p10), %s3033_s22, 128  }
0x15ed   : > { %3925 = vsyncadd (%p3660_p10), %s3033_s22, 4294967168  ;;  %s41_s0 = sadd.s32 1, %s4828_s15   ;;  %s4831_s5 = sld [smem:[#allocation16_spill]] }
0x15ee   : > { %p38_p11 = scmp.ge.s32.totalorder %s41_s0, 6   ;;  %s4832_s26 = sld [smem:[#allocation17_spill]] }
0x15ef   : > { %s4833_s27 = sld [smem:[#allocation27_spill]] }
0x15f0   : > { %s4834_s28 = sld [smem:[#allocation20_spill]]  ;;  %40 = sbr.rel (!%p38_p11) target bundleno = 28 (0x1c), region = 235 }
0x15f1   : > { %s4835_s6 = sld [smem:[#allocation21_spill]] }
0x15f2   : > { %s4836_s2 = sld [smem:[#allocation23_spill]] }
0x15f3   : > { %s4837_s29 = sld [smem:[#allocation25_spill]] }
0x15f5   :  { %3038 = vsyncpa [#allocation10], 1 }
0x15f6   :  { %3040 = vsyncpa [#allocation10 + $0x1], 1 }
0x15f7   :  { %3041 = vsyncpa [#allocation12], 1 }
0x15f8   :  { %3043 = vsyncpa [#allocation12 + $0x1], 1 }

</bundles_post_ra>
